<compile_context>
chip_gen: v6e
topology: v6e:2x2x1
jax: 0.10.0
libtpu: 0.0.40
codegen_flags: <defaults>
</compile_context>

<pallas_src>
import functools

import jax
import jax.numpy as jnp
import numpy as np
from jax.experimental import pallas as pl
from jax.experimental.pallas import tpu as pltpu

NUM_POINTS = 128  # analog of the module-level `num_points` (kept small here)


def _default_elementwise_dtype():
    """bf16 elementwise on chips with a bf16 VPU/EUP (v6e/v7x); f32 on v5e/older."""
    try:
        kind = jax.devices()[0].device_kind.lower()
    except Exception:
        return jnp.float32
    if any(v in kind for v in ("v2", "v3", "v4", "v5")):
        return jnp.float32
    return jnp.bfloat16


# ----------------------------------------------------------------------------
# Pallas kernel: whole forward pass for `batch_tile` batch elements per step.
# Activations are kept flattened as (Bt*N, C); the point axis is only
# re-materialized (cheap leading-dim reshapes) for the per-element max pool
# and the broadcast-add of the global feature.
# ----------------------------------------------------------------------------
def _pointnet_kernel(x_ref,
                     w1, b1, w2, b2, w3, b3, w4, b4, w5, b5,
                     w6l, w6g, b6, w7, b7, w8, b8, w9, b9, w10, b10,
                     o_ref, *, batch_tile, num_points, elementwise_dtype):
    Bt, N = batch_tile, num_points
    f32, bf16 = jnp.float32, jnp.bfloat16
    edt = elementwise_dtype

    def lin(h, w_ref, b_ref):
        # bf16 MXU matmul, f32 accumulation, f32 bias add.
        return jnp.dot(h.astype(bf16), w_ref[...],
                       preferred_element_type=f32) + b_ref[...]

    def act(y):
        # tanh in `edt`: bf16 on v6e/v7x halves the vregs through the EUP/VPU
        # (the binding path here); f32 on v5e (no bf16 EUP there).
        return jnp.tanh(y.astype(edt))

    h = act(lin(x_ref[...], w1, b1))             # conv1 + bn1 + tanh
    h = act(lin(h, w2, b2))                      # conv2 + bn2 + tanh
    local = h                                    # local_feature   (Bt*N, C2)
    h = act(lin(h, w3, b3))                      # conv3 + bn3 + tanh
    h = act(lin(h, w4, b4))                      # conv4 + bn4 + tanh
    h = act(lin(h, w5, b5))                      # conv5 + bn5 + tanh (Bt*N, C5)

    # Global max-pool over the point axis, per batch element (in edt).
    c5 = h.shape[-1]
    g = jnp.max(h.reshape(Bt, N, c5), axis=1)    # (Bt, C5)

    # cat([local, g]) @ W6 + b6  ==  local @ W6[:C2]  +  (g @ W6[C2:] + b6)
    g_term = lin(g, w6g, b6)                     # (Bt, C6)  -- once per element
    l_term = jnp.dot(local.astype(bf16), w6l[...],
                     preferred_element_type=f32)  # (Bt*N, C6)
    c6 = l_term.shape[-1]
    h = act((l_term.reshape(Bt, N, c6)
             + g_term[:, None, :]).reshape(Bt * N, c6))      # conv6 + bn6 + tanh

    h = act(lin(h, w7, b7))                      # conv7 + bn7 + tanh
    h = act(lin(h, w8, b8))                      # conv8 + bn8 + tanh
    h = act(lin(h, w9, b9))                      # conv9 + bn9 + tanh

    # conv10 + sigmoid:  sigmoid(z) = 1 / (1 + exp(-z)); the divide goes to the
    # EUP approx-reciprocal path.  Narrow (c_out-wide) store, no lane padding.
    z = lin(h, w10, b10)
    out = pl.reciprocal(1.0 + jnp.exp(-z), approx=True)
    o_ref[...] = out.astype(o_ref.dtype)


# ----------------------------------------------------------------------------
# Wrapper: grid over batch tiles; weights passed as full (untiled) VMEM blocks.
# ----------------------------------------------------------------------------
def pointnet_mlp(x, weights, biases, *, batch_tile=4, elementwise_dtype=None,
                 single_buffer_weights=False):
    B, N, c_in = x.shape
    assert N == NUM_POINTS, "forward semantics require N == num_points"
    assert B % batch_tile == 0, "batch must be divisible by batch_tile"
    # NOTE(v7x): pick batch_tile so that B // batch_tile stays a multiple of 2,
    # otherwise one TensorCore idles under dimension_semantics=("parallel",).
    Bt = batch_tile
    edt = elementwise_dtype or _default_elementwise_dtype()

    c2 = weights[1].shape[1]        # local-feature channel width
    c_out = weights[-1].shape[1]

    # ---- layout prep (cheap, outside the kernel) ---------------------------
    pad_cin = max(8, -(-c_in // 8) * 8)          # pad input channels to >= 8
    x_p = jnp.pad(x, ((0, 0), (0, 0), (0, pad_cin - c_in)))
    x_flat = x_p.reshape(B * N, pad_cin)

    bf16 = jnp.bfloat16
    ws = [w.astype(bf16) for w in weights]
    bs = [b.astype(jnp.float32) for b in biases]

    ws[0] = jnp.pad(ws[0], ((0, pad_cin - c_in), (0, 0)))   # match padded x
    w6l, w6g = ws[5][:c2], ws[5][c2:]                       # split concat layer

    params = [ws[0], bs[0], ws[1], bs[1], ws[2], bs[2], ws[3], bs[3],
              ws[4], bs[4], w6l, w6g, bs[5], ws[6], bs[6], ws[7], bs[7],
              ws[8], bs[8], ws[9], bs[9]]

    in_specs = [pl.BlockSpec((Bt * N, pad_cin), lambda b: (b, 0))]
    # Constant-index full blocks: DMA'd once, resident across grid steps.
    # Single-buffering them (pl.Buffered(1)) saves the 2x resident-weight VMEM
    # and per-step bookkeeping; negligible at scaling=0.25, worthwhile for
    # v7x's 64 MiB VMEM at scaling=1.0 — left off by default for robustness.
    weight_kwargs = dict(pipeline_mode=pl.Buffered(1)) if single_buffer_weights else {}
    for p in params:
        in_specs.append(pl.BlockSpec(p.shape, lambda b: (0, 0), **weight_kwargs))

    # Advisory cost estimate so XLA can schedule/overlap around the call.
    flops = 2 * B * N * sum(int(w.shape[0]) * int(w.shape[1]) for w in weights)
    transcendentals = B * N * sum(int(b.shape[-1]) for b in biases)
    bytes_accessed = (int(x_flat.size) * 4
                      + sum(int(np.prod(p.shape)) * p.dtype.itemsize for p in params)
                      + B * N * c_out * 4)
    cost = pl.CostEstimate(flops=int(flops),
                           transcendentals=int(transcendentals),
                           bytes_accessed=int(bytes_accessed))

    kernel = functools.partial(_pointnet_kernel, batch_tile=Bt, num_points=N,
                               elementwise_dtype=edt)

    out_flat = pl.pallas_call(
        kernel,
        # Narrow output: c_out lanes only (block last dim == array last dim is
        # legal); total writeback is the real 32 KiB, not a padded 512 KiB.
        out_shape=jax.ShapeDtypeStruct((B * N, c_out), jnp.float32),
        grid_spec=pltpu.PrefetchScalarGridSpec(
            num_scalar_prefetch=0,
            grid=(B // Bt,),
            in_specs=in_specs,
            out_specs=pl.BlockSpec((Bt * N, c_out), lambda b: (b, 0)),
        ),
        compiler_params=pltpu.CompilerParams(
            # Disjoint output blocks per step -> genuinely parallel; shards
            # across the two TensorCores on v7x, no-op on v5e/v6e.
            dimension_semantics=("parallel",),
        ),
        cost_estimate=cost,
    )(x_flat, *params)

    # Contiguous row-major reshape: free, no slice / second HBM pass.
    return out_flat.reshape(B, N, c_out)


# ----------------------------------------------------------------------------
# Deterministic parameter init (conv weights + BatchNorm folded to affine).
# BatchNorm uses inference (running-stat) semantics: y = g*(x-mu)/sqrt(v+eps)+b
# ----------------------------------------------------------------------------
def init_params(key, input_channels, output_channels, scaling):
    c = lambda v: int(v * scaling)
    layer_io = [
        (input_channels, c(64)), (c(64), c(64)), (c(64), c(64)),
        (c(64), c(128)), (c(128), c(1024)),
        (c(1024) + c(64), c(512)), (c(512), c(256)),
        (c(256), c(128)), (c(128), c(128)), (c(128), output_channels),
    ]
    eps = 1e-5
    ws, bs = [], []
    for i, (cin, cout) in enumerate(layer_io):
        key, k1, k2, k3, k4, k5, k6 = jax.random.split(key, 7)
        w = jax.random.normal(k1, (cin, cout), jnp.float32) / np.sqrt(cin)
        b = 0.1 * jax.random.normal(k2, (cout,), jnp.float32)
        if i < 9:  # layers 1..9 have BatchNorm; conv10 does not
            gamma = 1.0 + 0.1 * jax.random.normal(k3, (cout,), jnp.float32)
            beta = 0.1 * jax.random.normal(k4, (cout,), jnp.float32)
            mean = 0.1 * jax.random.normal(k5, (cout,), jnp.float32)
            var = jnp.abs(1.0 + 0.1 * jax.random.normal(k6, (cout,), jnp.float32))
            s = gamma / jnp.sqrt(var + eps)
            w = w * s[None, :]
            b = b * s + (beta - mean * s)
        ws.append(w)
        bs.append(b.reshape(1, cout))
    return ws, bs


# ----------------------------------------------------------------------------
# References.
#  * reference_matched: original concat structure with the same bf16-matmul /
#    f32-accumulate / edt-elementwise numerics as the kernel (tight check of
#    the kernel structure: concat split, max pool, BN folding plumbing).
#  * reference_f32: pure f32 end-to-end (loose check of true accuracy of the
#    bf16 pipeline, per review).
# ----------------------------------------------------------------------------
def reference_matched(x, ws, bs, elementwise_dtype):
    bf16, edt = jnp.bfloat16, elementwise_dtype

    def lin(h, i):
        return jnp.dot(h.astype(bf16), ws[i].astype(bf16),
                       preferred_element_type=jnp.float32) + bs[i]

    h = jnp.tanh(lin(x, 0).astype(edt))
    h = jnp.tanh(lin(h, 1).astype(edt))
    local = h
    h = jnp.tanh(lin(h, 2).astype(edt))
    h = jnp.tanh(lin(h, 3).astype(edt))
    h = jnp.tanh(lin(h, 4).astype(edt))
    g = jnp.max(h, axis=1, keepdims=True)
    g = jnp.broadcast_to(g, h.shape)
    h = jnp.concatenate([local, g], axis=-1)
    h = jnp.tanh(lin(h, 5).astype(edt))
    h = jnp.tanh(lin(h, 6).astype(edt))
    h = jnp.tanh(lin(h, 7).astype(edt))
    h = jnp.tanh(lin(h, 8).astype(edt))
    return jax.nn.sigmoid(lin(h, 9))


def reference_f32(x, ws, bs):
    def lin(h, i):
        return jnp.dot(h, ws[i], preferred_element_type=jnp.float32) + bs[i]

    h = jnp.tanh(lin(x, 0))
    h = jnp.tanh(lin(h, 1))
    local = h
    h = jnp.tanh(lin(h, 2))
    h = jnp.tanh(lin(h, 3))
    h = jnp.tanh(lin(h, 4))
    g = jnp.max(h, axis=1, keepdims=True)
    g = jnp.broadcast_to(g, h.shape)
    h = jnp.concatenate([local, g], axis=-1)
    h = jnp.tanh(lin(h, 5))
    h = jnp.tanh(lin(h, 6))
    h = jnp.tanh(lin(h, 7))
    h = jnp.tanh(lin(h, 8))
    return jax.nn.sigmoid(lin(h, 9))


if __name__ == "__main__":
    key = jax.random.PRNGKey(0)
    k_params, k_x = jax.random.split(key)

    input_channels = 3     # xyz point coordinates
    output_channels = 8
    scaling = 0.25         # channel widths 16/16/16/32/256 -> 128/64/32/32
    batch = 8

    ws, bs = init_params(k_params, input_channels, output_channels, scaling)
    # channels-last input; the PyTorch module would receive x.transpose(1, 2)
    x = jax.random.normal(k_x, (batch, NUM_POINTS, input_channels), jnp.float32)

    edt = _default_elementwise_dtype()
    out = pointnet_mlp(x, ws, bs, batch_tile=4, elementwise_dtype=edt)
    out = jax.block_until_ready(out)

    # Tight check vs. a numerics-matched reference (bf16 matmuls, edt tanh).
    ref_m = np.asarray(reference_matched(x, ws, bs, edt))
    np.testing.assert_allclose(np.asarray(out), ref_m, atol=3e-2, rtol=3e-2)

    # Loose check vs. a pure-f32 reference: validates that the bf16 pipeline
    # (folded BN in bf16 weights, bf16 activations/tanh) stays accurate.
    ref_f = np.asarray(reference_f32(x, ws, bs))
    np.testing.assert_allclose(np.asarray(out), ref_f, atol=5e-2, rtol=5e-2)

    print("KERNEL_OK")
</pallas_src>

<mosaic_0001>
module attributes {stable_mosaic.version = 11 : i64} {
  func.func @_pointnet_kernel(%arg0: i32, %arg1: memref<512x8xf32, #tpu.memory_space<vmem>>, %arg2: memref<8x16xbf16, #tpu.memory_space<vmem>>, %arg3: memref<1x16xf32, #tpu.memory_space<vmem>>, %arg4: memref<16x16xbf16, #tpu.memory_space<vmem>>, %arg5: memref<1x16xf32, #tpu.memory_space<vmem>>, %arg6: memref<16x16xbf16, #tpu.memory_space<vmem>>, %arg7: memref<1x16xf32, #tpu.memory_space<vmem>>, %arg8: memref<16x32xbf16, #tpu.memory_space<vmem>>, %arg9: memref<1x32xf32, #tpu.memory_space<vmem>>, %arg10: memref<32x256xbf16, #tpu.memory_space<vmem>>, %arg11: memref<1x256xf32, #tpu.memory_space<vmem>>, %arg12: memref<16x128xbf16, #tpu.memory_space<vmem>>, %arg13: memref<256x128xbf16, #tpu.memory_space<vmem>>, %arg14: memref<1x128xf32, #tpu.memory_space<vmem>>, %arg15: memref<128x64xbf16, #tpu.memory_space<vmem>>, %arg16: memref<1x64xf32, #tpu.memory_space<vmem>>, %arg17: memref<64x32xbf16, #tpu.memory_space<vmem>>, %arg18: memref<1x32xf32, #tpu.memory_space<vmem>>, %arg19: memref<32x32xbf16, #tpu.memory_space<vmem>>, %arg20: memref<1x32xf32, #tpu.memory_space<vmem>>, %arg21: memref<32x8xbf16, #tpu.memory_space<vmem>>, %arg22: memref<1x8xf32, #tpu.memory_space<vmem>>, %arg23: memref<512x8xf32, #tpu.memory_space<vmem>>) attributes {dimension_semantics = [#tpu.dimension_semantics<parallel>], iteration_bounds = array<i64: 2>, scalar_prefetch = 0 : i64, scratch_operands = 0 : i64, tpu.core_type = #tpu.core_type<tc>, window_params = [{transform_indices = @transform_0, window_bounds = array<i64: 512, 8>}, {pipeline_mode = #tpu.pipeline_mode<synchronous>, transform_indices = @transform_1, window_bounds = array<i64: 8, 16>}, {pipeline_mode = #tpu.pipeline_mode<synchronous>, transform_indices = @transform_2, window_bounds = array<i64: 1, 16>}, {pipeline_mode = #tpu.pipeline_mode<synchronous>, transform_indices = @transform_3, window_bounds = array<i64: 16, 16>}, {pipeline_mode = #tpu.pipeline_mode<synchronous>, transform_indices = @transform_4, window_bounds = array<i64: 1, 16>}, {pipeline_mode = #tpu.pipeline_mode<synchronous>, transform_indices = @transform_5, window_bounds = array<i64: 16, 16>}, {pipeline_mode = #tpu.pipeline_mode<synchronous>, transform_indices = @transform_6, window_bounds = array<i64: 1, 16>}, {pipeline_mode = #tpu.pipeline_mode<synchronous>, transform_indices = @transform_7, window_bounds = array<i64: 16, 32>}, {pipeline_mode = #tpu.pipeline_mode<synchronous>, transform_indices = @transform_8, window_bounds = array<i64: 1, 32>}, {pipeline_mode = #tpu.pipeline_mode<synchronous>, transform_indices = @transform_9, window_bounds = array<i64: 32, 256>}, {pipeline_mode = #tpu.pipeline_mode<synchronous>, transform_indices = @transform_10, window_bounds = array<i64: 1, 256>}, {pipeline_mode = #tpu.pipeline_mode<synchronous>, transform_indices = @transform_11, window_bounds = array<i64: 16, 128>}, {pipeline_mode = #tpu.pipeline_mode<synchronous>, transform_indices = @transform_12, window_bounds = array<i64: 256, 128>}, {pipeline_mode = #tpu.pipeline_mode<synchronous>, transform_indices = @transform_13, window_bounds = array<i64: 1, 128>}, {pipeline_mode = #tpu.pipeline_mode<synchronous>, transform_indices = @transform_14, window_bounds = array<i64: 128, 64>}, {pipeline_mode = #tpu.pipeline_mode<synchronous>, transform_indices = @transform_15, window_bounds = array<i64: 1, 64>}, {pipeline_mode = #tpu.pipeline_mode<synchronous>, transform_indices = @transform_16, window_bounds = array<i64: 64, 32>}, {pipeline_mode = #tpu.pipeline_mode<synchronous>, transform_indices = @transform_17, window_bounds = array<i64: 1, 32>}, {pipeline_mode = #tpu.pipeline_mode<synchronous>, transform_indices = @transform_18, window_bounds = array<i64: 32, 32>}, {pipeline_mode = #tpu.pipeline_mode<synchronous>, transform_indices = @transform_19, window_bounds = array<i64: 1, 32>}, {pipeline_mode = #tpu.pipeline_mode<synchronous>, transform_indices = @transform_20, window_bounds = array<i64: 32, 8>}, {pipeline_mode = #tpu.pipeline_mode<synchronous>, transform_indices = @transform_21, window_bounds = array<i64: 1, 8>}, {transform_indices = @transform_22, window_bounds = array<i64: 512, 8>}]} {
    %c0 = arith.constant 0 : index
    %c0_0 = arith.constant 0 : index
    %0 = vector.load %arg1[%c0, %c0_0] : memref<512x8xf32, #tpu.memory_space<vmem>>, vector<512x8xf32>
    %1 = arith.truncf %0 : vector<512x8xf32> to vector<512x8xbf16>
    %c0_1 = arith.constant 0 : index
    %c0_2 = arith.constant 0 : index
    %2 = vector.load %arg2[%c0_1, %c0_2] : memref<8x16xbf16, #tpu.memory_space<vmem>>, vector<8x16xbf16>
    %cst = arith.constant dense<0.000000e+00> : vector<512x16xf32>
    %3 = tpu.matmul %1, %2, %cst {dimension_numbers = #tpu.dot_dimension_numbers<[1], [0], [0], [1], [0, 0, 1, 1], [], []>} : vector<512x8xbf16>, vector<8x16xbf16>, vector<512x16xf32> -> vector<512x16xf32>
    %c0_3 = arith.constant 0 : index
    %c0_4 = arith.constant 0 : index
    %4 = vector.load %arg3[%c0_3, %c0_4] : memref<1x16xf32, #tpu.memory_space<vmem>>, vector<1x16xf32>
    %5 = vector.broadcast %4 : vector<1x16xf32> to vector<512x16xf32>
    %6 = arith.addf %3, %5 : vector<512x16xf32>
    %7 = arith.truncf %6 : vector<512x16xf32> to vector<512x16xbf16>
    %8 = math.tanh %7 : vector<512x16xbf16>
    %c0_5 = arith.constant 0 : index
    %c0_6 = arith.constant 0 : index
    %9 = vector.load %arg4[%c0_5, %c0_6] : memref<16x16xbf16, #tpu.memory_space<vmem>>, vector<16x16xbf16>
    %cst_7 = arith.constant dense<0.000000e+00> : vector<512x16xf32>
    %10 = tpu.matmul %8, %9, %cst_7 {dimension_numbers = #tpu.dot_dimension_numbers<[1], [0], [0], [1], [0, 0, 1, 1], [], []>} : vector<512x16xbf16>, vector<16x16xbf16>, vector<512x16xf32> -> vector<512x16xf32>
    %c0_8 = arith.constant 0 : index
    %c0_9 = arith.constant 0 : index
    %11 = vector.load %arg5[%c0_8, %c0_9] : memref<1x16xf32, #tpu.memory_space<vmem>>, vector<1x16xf32>
    %12 = vector.broadcast %11 : vector<1x16xf32> to vector<512x16xf32>
    %13 = arith.addf %10, %12 : vector<512x16xf32>
    %14 = arith.truncf %13 : vector<512x16xf32> to vector<512x16xbf16>
    %15 = math.tanh %14 : vector<512x16xbf16>
    %c0_10 = arith.constant 0 : index
    %c0_11 = arith.constant 0 : index
    %16 = vector.load %arg6[%c0_10, %c0_11] : memref<16x16xbf16, #tpu.memory_space<vmem>>, vector<16x16xbf16>
    %cst_12 = arith.constant dense<0.000000e+00> : vector<512x16xf32>
    %17 = tpu.matmul %15, %16, %cst_12 {dimension_numbers = #tpu.dot_dimension_numbers<[1], [0], [0], [1], [0, 0, 1, 1], [], []>} : vector<512x16xbf16>, vector<16x16xbf16>, vector<512x16xf32> -> vector<512x16xf32>
    %c0_13 = arith.constant 0 : index
    %c0_14 = arith.constant 0 : index
    %18 = vector.load %arg7[%c0_13, %c0_14] : memref<1x16xf32, #tpu.memory_space<vmem>>, vector<1x16xf32>
    %19 = vector.broadcast %18 : vector<1x16xf32> to vector<512x16xf32>
    %20 = arith.addf %17, %19 : vector<512x16xf32>
    %21 = arith.truncf %20 : vector<512x16xf32> to vector<512x16xbf16>
    %22 = math.tanh %21 : vector<512x16xbf16>
    %c0_15 = arith.constant 0 : index
    %c0_16 = arith.constant 0 : index
    %23 = vector.load %arg8[%c0_15, %c0_16] : memref<16x32xbf16, #tpu.memory_space<vmem>>, vector<16x32xbf16>
    %cst_17 = arith.constant dense<0.000000e+00> : vector<512x32xf32>
    %24 = tpu.matmul %22, %23, %cst_17 {dimension_numbers = #tpu.dot_dimension_numbers<[1], [0], [0], [1], [0, 0, 1, 1], [], []>} : vector<512x16xbf16>, vector<16x32xbf16>, vector<512x32xf32> -> vector<512x32xf32>
    %c0_18 = arith.constant 0 : index
    %c0_19 = arith.constant 0 : index
    %25 = vector.load %arg9[%c0_18, %c0_19] : memref<1x32xf32, #tpu.memory_space<vmem>>, vector<1x32xf32>
    %26 = vector.broadcast %25 : vector<1x32xf32> to vector<512x32xf32>
    %27 = arith.addf %24, %26 : vector<512x32xf32>
    %28 = arith.truncf %27 : vector<512x32xf32> to vector<512x32xbf16>
    %29 = math.tanh %28 : vector<512x32xbf16>
    %c0_20 = arith.constant 0 : index
    %c0_21 = arith.constant 0 : index
    %30 = vector.load %arg10[%c0_20, %c0_21] : memref<32x256xbf16, #tpu.memory_space<vmem>>, vector<32x256xbf16>
    %cst_22 = arith.constant dense<0.000000e+00> : vector<512x256xf32>
    %31 = tpu.matmul %29, %30, %cst_22 {dimension_numbers = #tpu.dot_dimension_numbers<[1], [0], [0], [1], [0, 0, 1, 1], [], []>} : vector<512x32xbf16>, vector<32x256xbf16>, vector<512x256xf32> -> vector<512x256xf32>
    %c0_23 = arith.constant 0 : index
    %c0_24 = arith.constant 0 : index
    %32 = vector.load %arg11[%c0_23, %c0_24] : memref<1x256xf32, #tpu.memory_space<vmem>>, vector<1x256xf32>
    %33 = vector.broadcast %32 : vector<1x256xf32> to vector<512x256xf32>
    %34 = arith.addf %31, %33 : vector<512x256xf32>
    %35 = arith.truncf %34 : vector<512x256xf32> to vector<512x256xbf16>
    %36 = math.tanh %35 : vector<512x256xbf16>
    %37 = vector.shape_cast %36 : vector<512x256xbf16> to vector<4x128x256xbf16>
    %cst_25 = arith.constant dense<0xFF80> : vector<4x256xbf16>
    %38 = vector.multi_reduction <maximumf>, %37, %cst_25 [1] : vector<4x128x256xbf16> to vector<4x256xbf16>
    %c0_26 = arith.constant 0 : index
    %c0_27 = arith.constant 0 : index
    %39 = vector.load %arg13[%c0_26, %c0_27] : memref<256x128xbf16, #tpu.memory_space<vmem>>, vector<256x128xbf16>
    %cst_28 = arith.constant dense<0.000000e+00> : vector<4x128xf32>
    %40 = tpu.matmul %38, %39, %cst_28 {dimension_numbers = #tpu.dot_dimension_numbers<[1], [0], [0], [1], [0, 0, 1, 1], [], []>} : vector<4x256xbf16>, vector<256x128xbf16>, vector<4x128xf32> -> vector<4x128xf32>
    %c0_29 = arith.constant 0 : index
    %c0_30 = arith.constant 0 : index
    %41 = vector.load %arg14[%c0_29, %c0_30] : memref<1x128xf32, #tpu.memory_space<vmem>>, vector<1x128xf32>
    %42 = vector.broadcast %41 : vector<1x128xf32> to vector<4x128xf32>
    %43 = arith.addf %40, %42 : vector<4x128xf32>
    %c0_31 = arith.constant 0 : index
    %c0_32 = arith.constant 0 : index
    %44 = vector.load %arg12[%c0_31, %c0_32] : memref<16x128xbf16, #tpu.memory_space<vmem>>, vector<16x128xbf16>
    %cst_33 = arith.constant dense<0.000000e+00> : vector<512x128xf32>
    %45 = tpu.matmul %15, %44, %cst_33 {dimension_numbers = #tpu.dot_dimension_numbers<[1], [0], [0], [1], [0, 0, 1, 1], [], []>} : vector<512x16xbf16>, vector<16x128xbf16>, vector<512x128xf32> -> vector<512x128xf32>
    %46 = vector.shape_cast %45 : vector<512x128xf32> to vector<4x128x128xf32>
    %47 = vector.shape_cast %43 : vector<4x128xf32> to vector<4x1x128xf32>
    %48 = vector.broadcast %47 : vector<4x1x128xf32> to vector<4x128x128xf32>
    %49 = arith.addf %46, %48 : vector<4x128x128xf32>
    %50 = vector.shape_cast %49 : vector<4x128x128xf32> to vector<512x128xf32>
    %51 = arith.truncf %50 : vector<512x128xf32> to vector<512x128xbf16>
    %52 = math.tanh %51 : vector<512x128xbf16>
    %c0_34 = arith.constant 0 : index
    %c0_35 = arith.constant 0 : index
    %53 = vector.load %arg15[%c0_34, %c0_35] : memref<128x64xbf16, #tpu.memory_space<vmem>>, vector<128x64xbf16>
    %cst_36 = arith.constant dense<0.000000e+00> : vector<512x64xf32>
    %54 = tpu.matmul %52, %53, %cst_36 {dimension_numbers = #tpu.dot_dimension_numbers<[1], [0], [0], [1], [0, 0, 1, 1], [], []>} : vector<512x128xbf16>, vector<128x64xbf16>, vector<512x64xf32> -> vector<512x64xf32>
    %c0_37 = arith.constant 0 : index
    %c0_38 = arith.constant 0 : index
    %55 = vector.load %arg16[%c0_37, %c0_38] : memref<1x64xf32, #tpu.memory_space<vmem>>, vector<1x64xf32>
    %56 = vector.broadcast %55 : vector<1x64xf32> to vector<512x64xf32>
    %57 = arith.addf %54, %56 : vector<512x64xf32>
    %58 = arith.truncf %57 : vector<512x64xf32> to vector<512x64xbf16>
    %59 = math.tanh %58 : vector<512x64xbf16>
    %c0_39 = arith.constant 0 : index
    %c0_40 = arith.constant 0 : index
    %60 = vector.load %arg17[%c0_39, %c0_40] : memref<64x32xbf16, #tpu.memory_space<vmem>>, vector<64x32xbf16>
    %cst_41 = arith.constant dense<0.000000e+00> : vector<512x32xf32>
    %61 = tpu.matmul %59, %60, %cst_41 {dimension_numbers = #tpu.dot_dimension_numbers<[1], [0], [0], [1], [0, 0, 1, 1], [], []>} : vector<512x64xbf16>, vector<64x32xbf16>, vector<512x32xf32> -> vector<512x32xf32>
    %c0_42 = arith.constant 0 : index
    %c0_43 = arith.constant 0 : index
    %62 = vector.load %arg18[%c0_42, %c0_43] : memref<1x32xf32, #tpu.memory_space<vmem>>, vector<1x32xf32>
    %63 = vector.broadcast %62 : vector<1x32xf32> to vector<512x32xf32>
    %64 = arith.addf %61, %63 : vector<512x32xf32>
    %65 = arith.truncf %64 : vector<512x32xf32> to vector<512x32xbf16>
    %66 = math.tanh %65 : vector<512x32xbf16>
    %c0_44 = arith.constant 0 : index
    %c0_45 = arith.constant 0 : index
    %67 = vector.load %arg19[%c0_44, %c0_45] : memref<32x32xbf16, #tpu.memory_space<vmem>>, vector<32x32xbf16>
    %cst_46 = arith.constant dense<0.000000e+00> : vector<512x32xf32>
    %68 = tpu.matmul %66, %67, %cst_46 {dimension_numbers = #tpu.dot_dimension_numbers<[1], [0], [0], [1], [0, 0, 1, 1], [], []>} : vector<512x32xbf16>, vector<32x32xbf16>, vector<512x32xf32> -> vector<512x32xf32>
    %c0_47 = arith.constant 0 : index
    %c0_48 = arith.constant 0 : index
    %69 = vector.load %arg20[%c0_47, %c0_48] : memref<1x32xf32, #tpu.memory_space<vmem>>, vector<1x32xf32>
    %70 = vector.broadcast %69 : vector<1x32xf32> to vector<512x32xf32>
    %71 = arith.addf %68, %70 : vector<512x32xf32>
    %72 = arith.truncf %71 : vector<512x32xf32> to vector<512x32xbf16>
    %73 = math.tanh %72 : vector<512x32xbf16>
    %c0_49 = arith.constant 0 : index
    %c0_50 = arith.constant 0 : index
    %74 = vector.load %arg21[%c0_49, %c0_50] : memref<32x8xbf16, #tpu.memory_space<vmem>>, vector<32x8xbf16>
    %cst_51 = arith.constant dense<0.000000e+00> : vector<512x8xf32>
    %75 = tpu.matmul %73, %74, %cst_51 {dimension_numbers = #tpu.dot_dimension_numbers<[1], [0], [0], [1], [0, 0, 1, 1], [], []>} : vector<512x32xbf16>, vector<32x8xbf16>, vector<512x8xf32> -> vector<512x8xf32>
    %c0_52 = arith.constant 0 : index
    %c0_53 = arith.constant 0 : index
    %76 = vector.load %arg22[%c0_52, %c0_53] : memref<1x8xf32, #tpu.memory_space<vmem>>, vector<1x8xf32>
    %77 = vector.broadcast %76 : vector<1x8xf32> to vector<512x8xf32>
    %78 = arith.addf %75, %77 : vector<512x8xf32>
    %cst_54 = arith.constant 0.000000e+00 : f32
    %79 = vector.broadcast %cst_54 : f32 to vector<512x8xf32>
    %80 = arith.subf %79, %78 : vector<512x8xf32>
    %81 = math.exp %80 : vector<512x8xf32>
    %cst_55 = arith.constant 1.000000e+00 : f32
    %82 = vector.broadcast %cst_55 : f32 to vector<512x8xf32>
    %83 = arith.addf %82, %81 : vector<512x8xf32>
    %84 = tpu.reciprocal %83 {approx = true} : vector<512x8xf32> -> vector<512x8xf32>
    %c0_56 = arith.constant 0 : index
    %c0_57 = arith.constant 0 : index
    %85 = vector.load %arg23[%c0_56, %c0_57] : memref<512x8xf32, #tpu.memory_space<vmem>>, vector<512x8xf32>
    tpu.vector_store %arg23[%c0_56, %c0_57], %84 {strides = array<i32>} : memref<512x8xf32, #tpu.memory_space<vmem>>, vector<512x8xf32>,
    return
  }
  func.func @transform_0(%arg0: i32) -> (i32, i32) {
    %c0_i32 = arith.constant 0 : i32
    %c0_i32_0 = arith.constant 0 : i32
    return %arg0, %c0_i32 : i32, i32
  }
  func.func @transform_1(%arg0: i32) -> (i32, i32) {
    %c0_i32 = arith.constant 0 : i32
    %c0_i32_0 = arith.constant 0 : i32
    %c0_i32_1 = arith.constant 0 : i32
    return %c0_i32, %c0_i32_0 : i32, i32
  }
  func.func @transform_2(%arg0: i32) -> (i32, i32) {
    %c0_i32 = arith.constant 0 : i32
    %c0_i32_0 = arith.constant 0 : i32
    %c0_i32_1 = arith.constant 0 : i32
    return %c0_i32, %c0_i32_0 : i32, i32
  }
  func.func @transform_3(%arg0: i32) -> (i32, i32) {
    %c0_i32 = arith.constant 0 : i32
    %c0_i32_0 = arith.constant 0 : i32
    %c0_i32_1 = arith.constant 0 : i32
    return %c0_i32, %c0_i32_0 : i32, i32
  }
  func.func @transform_4(%arg0: i32) -> (i32, i32) {
    %c0_i32 = arith.constant 0 : i32
    %c0_i32_0 = arith.constant 0 : i32
    %c0_i32_1 = arith.constant 0 : i32
    return %c0_i32, %c0_i32_0 : i32, i32
  }
  func.func @transform_5(%arg0: i32) -> (i32, i32) {
    %c0_i32 = arith.constant 0 : i32
    %c0_i32_0 = arith.constant 0 : i32
    %c0_i32_1 = arith.constant 0 : i32
    return %c0_i32, %c0_i32_0 : i32, i32
  }
  func.func @transform_6(%arg0: i32) -> (i32, i32) {
    %c0_i32 = arith.constant 0 : i32
    %c0_i32_0 = arith.constant 0 : i32
    %c0_i32_1 = arith.constant 0 : i32
    return %c0_i32, %c0_i32_0 : i32, i32
  }
  func.func @transform_7(%arg0: i32) -> (i32, i32) {
    %c0_i32 = arith.constant 0 : i32
    %c0_i32_0 = arith.constant 0 : i32
    %c0_i32_1 = arith.constant 0 : i32
    return %c0_i32, %c0_i32_0 : i32, i32
  }
  func.func @transform_8(%arg0: i32) -> (i32, i32) {
    %c0_i32 = arith.constant 0 : i32
    %c0_i32_0 = arith.constant 0 : i32
    %c0_i32_1 = arith.constant 0 : i32
    return %c0_i32, %c0_i32_0 : i32, i32
  }
  func.func @transform_9(%arg0: i32) -> (i32, i32) {
    %c0_i32 = arith.constant 0 : i32
    %c0_i32_0 = arith.constant 0 : i32
    %c0_i32_1 = arith.constant 0 : i32
    return %c0_i32, %c0_i32_0 : i32, i32
  }
  func.func @transform_10(%arg0: i32) -> (i32, i32) {
    %c0_i32 = arith.constant 0 : i32
    %c0_i32_0 = arith.constant 0 : i32
    %c0_i32_1 = arith.constant 0 : i32
    return %c0_i32, %c0_i32_0 : i32, i32
  }
  func.func @transform_11(%arg0: i32) -> (i32, i32) {
    %c0_i32 = arith.constant 0 : i32
    %c0_i32_0 = arith.constant 0 : i32
    %c0_i32_1 = arith.constant 0 : i32
    return %c0_i32, %c0_i32_0 : i32, i32
  }
  func.func @transform_12(%arg0: i32) -> (i32, i32) {
    %c0_i32 = arith.constant 0 : i32
    %c0_i32_0 = arith.constant 0 : i32
    %c0_i32_1 = arith.constant 0 : i32
    return %c0_i32, %c0_i32_0 : i32, i32
  }
  func.func @transform_13(%arg0: i32) -> (i32, i32) {
    %c0_i32 = arith.constant 0 : i32
    %c0_i32_0 = arith.constant 0 : i32
    %c0_i32_1 = arith.constant 0 : i32
    return %c0_i32, %c0_i32_0 : i32, i32
  }
  func.func @transform_14(%arg0: i32) -> (i32, i32) {
    %c0_i32 = arith.constant 0 : i32
    %c0_i32_0 = arith.constant 0 : i32
    %c0_i32_1 = arith.constant 0 : i32
    return %c0_i32, %c0_i32_0 : i32, i32
  }
  func.func @transform_15(%arg0: i32) -> (i32, i32) {
    %c0_i32 = arith.constant 0 : i32
    %c0_i32_0 = arith.constant 0 : i32
    %c0_i32_1 = arith.constant 0 : i32
    return %c0_i32, %c0_i32_0 : i32, i32
  }
  func.func @transform_16(%arg0: i32) -> (i32, i32) {
    %c0_i32 = arith.constant 0 : i32
    %c0_i32_0 = arith.constant 0 : i32
    %c0_i32_1 = arith.constant 0 : i32
    return %c0_i32, %c0_i32_0 : i32, i32
  }
  func.func @transform_17(%arg0: i32) -> (i32, i32) {
    %c0_i32 = arith.constant 0 : i32
    %c0_i32_0 = arith.constant 0 : i32
    %c0_i32_1 = arith.constant 0 : i32
    return %c0_i32, %c0_i32_0 : i32, i32
  }
  func.func @transform_18(%arg0: i32) -> (i32, i32) {
    %c0_i32 = arith.constant 0 : i32
    %c0_i32_0 = arith.constant 0 : i32
    %c0_i32_1 = arith.constant 0 : i32
    return %c0_i32, %c0_i32_0 : i32, i32
  }
  func.func @transform_19(%arg0: i32) -> (i32, i32) {
    %c0_i32 = arith.constant 0 : i32
    %c0_i32_0 = arith.constant 0 : i32
    %c0_i32_1 = arith.constant 0 : i32
    return %c0_i32, %c0_i32_0 : i32, i32
  }
  func.func @transform_20(%arg0: i32) -> (i32, i32) {
    %c0_i32 = arith.constant 0 : i32
    %c0_i32_0 = arith.constant 0 : i32
    %c0_i32_1 = arith.constant 0 : i32
    return %c0_i32, %c0_i32_0 : i32, i32
  }
  func.func @transform_21(%arg0: i32) -> (i32, i32) {
    %c0_i32 = arith.constant 0 : i32
    %c0_i32_0 = arith.constant 0 : i32
    %c0_i32_1 = arith.constant 0 : i32
    return %c0_i32, %c0_i32_0 : i32, i32
  }
  func.func @transform_22(%arg0: i32) -> (i32, i32) {
    %c0_i32 = arith.constant 0 : i32
    %c0_i32_0 = arith.constant 0 : i32
    return %arg0, %c0_i32 : i32, i32
  }
}

</mosaic_0001>

<bundles_post_ra>
// kernel: tpu_custom_call.1
= control target key start
LH: loop header
LB: loop body
LE: loop exit
PB: predicated region body
PF: predicated region fallthrough
CT: control target
= control target key end

     0   :  { %s10245_s0 = inlined_call_operand.vmem [shape: f32[1024,8], index: 0, kind: input, shape index: {}]   ;;  %s10246_s1 = inlined_call_operand.vmem [shape: bf16[8,16], index: 1, kind: input, shape index: {}]   ;;  %s10247_s2 = inlined_call_operand.vmem [shape: f32[1,16], index: 2, kind: input, shape index: {}]   ;;  %s10248_s3 = inlined_call_operand.vmem [shape: bf16[16,16], index: 3, kind: input, shape index: {}]   ;;  %s10249_s4 = inlined_call_operand.vmem [shape: f32[1,16], index: 4, kind: input, shape index: {}]   ;;  %s10250_s5 = inlined_call_operand.vmem [shape: bf16[16,16], index: 5, kind: input, shape index: {}]   ;;  %s10251_s6 = inlined_call_operand.vmem [shape: f32[1,16], index: 6, kind: input, shape index: {}]   ;;  %s10252_s7 = inlined_call_operand.vmem [shape: bf16[16,32], index: 7, kind: input, shape index: {}]   ;;  %s10253_s8 = inlined_call_operand.vmem [shape: f32[1,32], index: 8, kind: input, shape index: {}]   ;;  %s10254_s9 = inlined_call_operand.vmem [shape: bf16[32,256], index: 9, kind: input, shape index: {}]   ;;  %s10255_s10 = inlined_call_operand.vmem [shape: f32[1,256], index: 10, kind: input, shape index: {}]   ;;  %s10256_s11 = inlined_call_operand.vmem [shape: bf16[16,128], index: 11, kind: input, shape index: {}]   ;;  %s10257_s12 = inlined_call_operand.vmem [shape: bf16[256,128], index: 12, kind: input, shape index: {}]   ;;  %s10258_s13 = inlined_call_operand.vmem [shape: f32[1,128], index: 13, kind: input, shape index: {}]   ;;  %s10259_s14 = inlined_call_operand.vmem [shape: bf16[128,64], index: 14, kind: input, shape index: {}]   ;;  %s10260_s15 = inlined_call_operand.vmem [shape: f32[1,64], index: 15, kind: input, shape index: {}]   ;;  %s10261_s16 = inlined_call_operand.vmem [shape: bf16[64,32], index: 16, kind: input, shape index: {}]   ;;  %s10262_s17 = inlined_call_operand.vmem [shape: f32[1,32], index: 17, kind: input, shape index: {}]   ;;  %s10263_s18 = inlined_call_operand.vmem [shape: bf16[32,32], index: 18, kind: input, shape index: {}]   ;;  %s10264_s19 = inlined_call_operand.vmem [shape: f32[1,32], index: 19, kind: input, shape index: {}]   ;;  %s10265_s20 = inlined_call_operand.vmem [shape: bf16[32,8], index: 20, kind: input, shape index: {}]   ;;  %s10266_s21 = inlined_call_operand.vmem [shape: f32[1,8], index: 21, kind: input, shape index: {}]   ;;  %s10267_s22 = inlined_call_operand.vmem [shape: f32[1024,8], index: 22, kind: output, shape index: {}]  }
   0x1   :  { %10280 = sst [smem:[#allocation13_spill]] %s10245_s0 }
   0x2   :  { %10281 = sst [smem:[#allocation14_spill]] %s10246_s1 }
   0x3   :  { %10282 = sst [smem:[#allocation15_spill]] %s10247_s2 }
   0x4   :  { %10283 = sst [smem:[#allocation16_spill]] %s10248_s3  ;;  %s8671_s3 = smov 0  }
   0x5   :  { %10284 = sst [smem:[#allocation17_spill]] %s10249_s4 }
   0x6   :  { %10285 = sst [smem:[#allocation18_spill]] %s10250_s5 }
   0x7   :  { %10286 = sst [smem:[#allocation19_spill]] %s10251_s6 }
   0x8 LB: > { %s6296_s28 = sadd.s32 4294967295, %s8552_s3   ;;  %p6300_p0 = scmp.ge.s32.totalorder %s8552_s3, 1  ;;  %s8552_s3 = sphi %s8671_s3, %s32_s3  }
   0x9   : > { %p613_p1 = scmp.lt.s32.totalorder %s8552_s3, 3 }
   0xb   : > { %p614_p2 = pnand %p6300_p0, %p613_p1 }
   0xd   : > { %617 = sbr.rel (%p614_p2) target bundleno = 2639 (0xa4f), region = 108 }
  0x12   : > { %s10287_s4 = sld [smem:[#allocation14_spill]]  ;;  %vm889_vm0 = vcmask 1043456   ;;  %s6301_s0 = sshll.u32 %s6296_s28, 6  ;;  %vm792_vm1 = vcmask 64512   ;;  %vm1261_vm2 = vcmask 130048   ;;  %vm2675_vm3 = vcmask 261120  }
  0x13   : > { %s10288_s5 = sld [smem:[#allocation16_spill]]  ;;  %p676_p3 = scmp.lt.s32.totalorder %s6301_s0, 127  ;;  %vm3444_vm4 = vcmask 1041409   ;;  %vm3446_vm5 = vcmask 1042434   ;;  %vm3448_vm6 = vcmask 1043459   ;;  %vm4526_vm7 = vcmask 523264  }
  0x14   : > { %s10289_s26 = sld [smem:[#allocation13_spill]] }
  0x15   : > { %s10317_s0 = smov (!%p676_p3, %s6301_s0), 127  ;;  %s10290_s29 = sld [smem:[#allocation18_spill]] }
  0x16   : > { %s6302_s24 = sshll.u32 %s10317_s0, 3  ;;  %s10291_s23 = sld [smem:[#allocation15_spill]] }
  0x17   : > { %s10302_s25 = sld [smem:[#allocation19_spill]]  ;;  %s10067_s6 = scalar_lea.vmem %s10267_s22, %s6302_s24 }
  0x18   : > { %v784_v0 = vld [vmem:[%s10287_s4] sm:$0xf] }
  0x19   : > { %v7607_v1 = vld [vmem:[%s10288_s5] sm:$0xff]   ;;  %7595 = vmatprep.subr.msk.bf16.mxu0 %vm889_vm0, %v784_v0  ;;  %v891_v2 = vsel %vm889_vm0, %v784_v0, 0  ;;  %7596 = vmatprep.subr.msk.bf16.mxu1 %vm889_vm0, %v784_v0 }
  0x1a   : > { %6976 = vmatpush3.bf16.msra.mxu0 %v891_v2  ;;  %7594 = vmatpush3.bf16.msra.mxu1 %v891_v2  ;;  %s8693_s2 = scalar_lea.vmem %s10289_s26, %s6302_s24  ;;  %s10292_s26 = sld [smem:[#allocation17_spill]] }
  0x1b   : > { %7041 = vmatprep.subr.bf16.mxu1 %v7607_v1  ;;  %v688_v3 = vld [vmem:[%s8693_s2] sm:$0xff]  ;;  %v689_v4 = vld [vmem:[%s8693_s2 + $0x8] sm:$0xff]  ;;  %v690_v5 = vld [vmem:[%s8693_s2 + $0x10] sm:$0xff] }
  0x1c   : > { %v752_v6 = vpack.c.bf16 %v689_v4, %v688_v3  ;;  %v691_v7 = vld [vmem:[%s8693_s2 + $0x18] sm:$0xff]  ;;  %v692_v8 = vld [vmem:[%s8693_s2 + $0x20] sm:$0xff]  ;;  %v693_v9 = vld [vmem:[%s8693_s2 + $0x28] sm:$0xff] }
  0x1d   : > { %v753_v10 = vpack.c.bf16 %v691_v7, %v690_v5  ;;  %v754_v11 = vpack.c.bf16 %v693_v9, %v692_v8  ;;  %v694_v12 = vld [vmem:[%s8693_s2 + $0x30] sm:$0xff]  ;;  %v695_v13 = vld [vmem:[%s8693_s2 + $0x38] sm:$0xff]  ;;  %v696_v14 = vld [vmem:[%s8693_s2 + $0x40] sm:$0xff] }
  0x1e   : > { %6977 = vmatprep.mubr.msk.bf16.mxu0 %vm792_vm1, %v752_v6  ;;  %v697_v15 = vld [vmem:[%s8693_s2 + $0x48] sm:$0xff]  ;;  %v755_v16 = vpack.c.bf16 %v695_v13, %v694_v12  ;;  %v698_v18 = vld [vmem:[%s8693_s2 + $0x50] sm:$0xff]  ;;  %v699_v19 = vld [vmem:[%s8693_s2 + $0x58] sm:$0xff] }
  0x1f   : > { %6978 = vmatmul.mubr.msk.bf16.vlgmr.msra.gmra.mxu0 %vm792_vm1, %v753_v10  ;;  %v756_v17 = vpack.c.bf16 %v697_v15, %v696_v14  ;;  %v724_v20 = vld [vmem:[%s8693_s2 + $0x120] sm:$0xff]  ;;  %v725_v21 = vld [vmem:[%s8693_s2 + $0x128] sm:$0xff]  ;;  %v726_v22 = vld [vmem:[%s8693_s2 + $0x130] sm:$0xff]  ;;  %v757_v31 = vpack.c.bf16 %v699_v19, %v698_v18 }
  0x20   : > { %6981 = vmatprep.mubr.msk.bf16.mxu0 %vm792_vm1, %v754_v11  ;;  %v770_v23 = vpack.c.bf16 %v725_v21, %v724_v20  ;;  %v727_v24 = vld [vmem:[%s8693_s2 + $0x138] sm:$0xff]  ;;  %v728_v25 = vld [vmem:[%s8693_s2 + $0x140] sm:$0xff]  ;;  %v729_v26 = vld [vmem:[%s8693_s2 + $0x148] sm:$0xff] }
  0x21   : > { %v700_v27 = vld [vmem:[%s8693_s2 + $0x60] sm:$0xff]  ;;  %v701_v28 = vld [vmem:[%s8693_s2 + $0x68] sm:$0xff]  ;;  %v771_v29 = vpack.c.bf16 %v727_v24, %v726_v22  ;;  %v772_v30 = vpack.c.bf16 %v729_v26, %v728_v25  ;;  %v730_v33 = vld [vmem:[%s8693_s2 + $0x150] sm:$0xff] }
  0x22   : > { %7013 = vmatprep.mubr.msk.bf16.mxu1 %vm792_vm1, %v770_v23  ;;  %v758_v32 = vpack.c.bf16 %v701_v28, %v700_v27  ;;  %v731_v34 = vld [vmem:[%s8693_s2 + $0x158] sm:$0xff]  ;;  %v732_v35 = vld [vmem:[%s8693_s2 + $0x160] sm:$0xff]  ;;  %v733_v36 = vld [vmem:[%s8693_s2 + $0x168] sm:$0xff] }
  0x23   : > { %7014 = vmatmul.mubr.msk.bf16.vlgmr.msra.gmra.mxu1 %vm792_vm1, %v771_v29  ;;  %v702_v37 = vld [vmem:[%s8693_s2 + $0x70] sm:$0xff]  ;;  %v703_v38 = vld [vmem:[%s8693_s2 + $0x78] sm:$0xff]  ;;  %v704_v39 = vld [vmem:[%s8693_s2 + $0x80] sm:$0xff]  ;;  %v773_v40 = vpack.c.bf16 %v731_v34, %v730_v33  ;;  %v774_v42 = vpack.c.bf16 %v733_v36, %v732_v35 }
  0x24   : > { %7017 = vmatprep.mubr.msk.bf16.mxu1 %vm792_vm1, %v772_v30  ;;  %7042 = vmatpush3.bf16.msra.mxu1 %v7607_v1  ;;  %v705_v41 = vld [vmem:[%s8693_s2 + $0x88] sm:$0xff]  ;;  %v734_v43 = vld [vmem:[%s8693_s2 + $0x170] sm:$0xff]  ;;  %v735_v44 = vld [vmem:[%s8693_s2 + $0x178] sm:$0xff]  ;;  %v759_v45 = vpack.c.bf16 %v703_v38, %v702_v37 }
  0x25   : > { %v736_v46 = vld [vmem:[%s8693_s2 + $0x180] sm:$0xff]  ;;  %v737_v47 = vld [vmem:[%s8693_s2 + $0x188] sm:$0xff]  ;;  %v760_v48 = vpack.c.bf16 %v705_v41, %v704_v39  ;;  %v706_v49 = vld [vmem:[%s8693_s2 + $0x90] sm:$0xff]  ;;  %v775_v53 = vpack.c.bf16 %v735_v44, %v734_v43 }
  0x26   : > { %v707_v50 = vld [vmem:[%s8693_s2 + $0x98] sm:$0xff]  ;;  %v708_v51 = vld [vmem:[%s8693_s2 + $0xa0] sm:$0xff]  ;;  %v709_v52 = vld [vmem:[%s8693_s2 + $0xa8] sm:$0xff]  ;;  %v776_v54 = vpack.c.bf16 %v737_v47, %v736_v46 }
  0x27   : > { %6982 = vmatmul.mubr.msk.bf16.gmra.mxu0 %vm792_vm1, %v755_v16  ;;  %v738_v55 = vld [vmem:[%s8693_s2 + $0x190] sm:$0xff]  ;;  %v739_v56 = vld [vmem:[%s8693_s2 + $0x198] sm:$0xff]  ;;  %v761_v57 = vpack.c.bf16 %v707_v50, %v706_v49  ;;  %v740_v58 = vld [vmem:[%s8693_s2 + $0x1a0] sm:$0xff]  ;;  %v762_v60 = vpack.c.bf16 %v709_v52, %v708_v51 }
  0x28   : > { %6985 = vmatprep.mubr.msk.bf16.mxu0 %vm792_vm1, %v756_v17  ;;  %v741_v59 = vld [vmem:[%s8693_s2 + $0x1a8] sm:$0xff]  ;;  %v710_v61 = vld [vmem:[%s8693_s2 + $0xb0] sm:$0xff]  ;;  %v711_v62 = vld [vmem:[%s8693_s2 + $0xb8] sm:$0xff]  ;;  %v777_v1 = vpack.c.bf16 %v739_v56, %v738_v55 }
  0x29   : > { %v712_v63 = vld [vmem:[%s8693_s2 + $0xc0] sm:$0xff]  ;;  %v713_v0 = vld [vmem:[%s8693_s2 + $0xc8] sm:$0xff]  ;;  %v778_v2 = vpack.c.bf16 %v741_v59, %v740_v58  ;;  %v763_v3 = vpack.c.bf16 %v711_v62, %v710_v61  ;;  %v742_v5 = vld [vmem:[%s8693_s2 + $0x1b0] sm:$0xff] }
  0x2a   : > { %v764_v4 = vpack.c.bf16 %v713_v0, %v712_v63  ;;  %v743_v6 = vld [vmem:[%s8693_s2 + $0x1b8] sm:$0xff]  ;;  %v744_v7 = vld [vmem:[%s8693_s2 + $0x1c0] sm:$0xff]  ;;  %v745_v8 = vld [vmem:[%s8693_s2 + $0x1c8] sm:$0xff] }
  0x2b   : > { %7018 = vmatmul.mubr.msk.bf16.gmra.mxu1 %vm792_vm1, %v773_v40  ;;  %v779_v9 = vpack.c.bf16 %v743_v6, %v742_v5  ;;  %v714_v10 = vld [vmem:[%s8693_s2 + $0xd0] sm:$0xff]  ;;  %v715_v11 = vld [vmem:[%s8693_s2 + $0xd8] sm:$0xff]  ;;  %v780_v12 = vpack.c.bf16 %v745_v8, %v744_v7  ;;  %v716_v13 = vld [vmem:[%s8693_s2 + $0xe0] sm:$0xff] }
  0x2c   : > { %7021 = vmatprep.mubr.msk.bf16.mxu1 %vm792_vm1, %v774_v42  ;;  %v717_v14 = vld [vmem:[%s8693_s2 + $0xe8] sm:$0xff]  ;;  %v765_v15 = vpack.c.bf16 %v715_v11, %v714_v10  ;;  %v746_v17 = vld [vmem:[%s8693_s2 + $0x1d0] sm:$0xff]  ;;  %v747_v18 = vld [vmem:[%s8693_s2 + $0x1d8] sm:$0xff] }
  0x2d   : > { %v766_v16 = vpack.c.bf16 %v717_v14, %v716_v13  ;;  %v748_v19 = vld [vmem:[%s8693_s2 + $0x1e0] sm:$0xff]  ;;  %v749_v20 = vld [vmem:[%s8693_s2 + $0x1e8] sm:$0xff]  ;;  %v781_v21 = vpack.c.bf16 %v747_v18, %v746_v17  ;;  %v718_v22 = vld [vmem:[%s8693_s2 + $0xf0] sm:$0xff] }
  0x2e   : > { %v719_v23 = vld [vmem:[%s8693_s2 + $0xf8] sm:$0xff]  ;;  %v782_v24 = vpack.c.bf16 %v749_v20, %v748_v19  ;;  %v720_v25 = vld [vmem:[%s8693_s2 + $0x100] sm:$0xff]  ;;  %v721_v26 = vld [vmem:[%s8693_s2 + $0x108] sm:$0xff] }
  0x2f   : > { %6986 = vmatmul.mubr.msk.bf16.gmra.mxu0 %vm792_vm1, %v757_v31  ;;  %v767_v27 = vpack.c.bf16 %v719_v23, %v718_v22  ;;  %v768_v28 = vpack.c.bf16 %v721_v26, %v720_v25  ;;  %v750_v29 = vld [vmem:[%s8693_s2 + $0x1f0] sm:$0xff]  ;;  %v751_v30 = vld [vmem:[%s8693_s2 + $0x1f8] sm:$0xff]  ;;  %v7608_v35 = vld [vmem:[%s10290_s29] sm:$0xff]  }
  0x30   : > { %6989 = vmatprep.mubr.msk.bf16.mxu0 %vm792_vm1, %v758_v32  ;;  %v783_v31 = vpack.c.bf16 %v751_v30, %v750_v29  ;;  %v722_v32 = vld [vmem:[%s8693_s2 + $0x110] sm:$0xff]  ;;  %v723_v33 = vld [vmem:[%s8693_s2 + $0x118] sm:$0xff]  ;;  %7107 = vmatprep.subr.bf16.mxu0 %v7608_v35  ;;  %v8797_v38 = vld [vmem:[%s10291_s23] ss:$0 sm:$0xff] }
  0x31   : > { %v769_v34 = vpack.c.bf16 %v723_v33, %v722_v32  ;;  %7108 = vmatpush3.bf16.msra.mxu0 %v7608_v35 }
  0x33   : > { %7022 = vmatmul.mubr.msk.bf16.gmra.mxu1 %vm792_vm1, %v775_v53 }
  0x34   : > { %7025 = vmatprep.mubr.msk.bf16.mxu1 %vm792_vm1, %v776_v54 }
  0x37   : > { %6990 = vmatmul.mubr.msk.bf16.gmra.mxu0 %vm792_vm1, %v759_v45 }
  0x38   : > { %6993 = vmatprep.mubr.msk.bf16.mxu0 %vm792_vm1, %v760_v48 }
  0x3b   : > { %7026 = vmatmul.mubr.msk.bf16.gmra.mxu1 %vm792_vm1, %v777_v1 }
  0x3c   : > { %7029 = vmatprep.mubr.msk.bf16.mxu1 %vm792_vm1, %v778_v2 }
  0x3f   : > { %6994 = vmatmul.mubr.msk.bf16.gmra.mxu0 %vm792_vm1, %v761_v57 }
  0x40   : > { %6997 = vmatprep.mubr.msk.bf16.mxu0 %vm792_vm1, %v762_v60 }
  0x43   : > { %7030 = vmatmul.mubr.msk.bf16.gmra.mxu1 %vm792_vm1, %v779_v9 }
  0x44   : > { %7033 = vmatprep.mubr.msk.bf16.mxu1 %vm792_vm1, %v780_v12 }
  0x47   : > { %6998 = vmatmul.mubr.msk.bf16.gmra.mxu0 %vm792_vm1, %v763_v3 }
  0x48   : > { %7001 = vmatprep.mubr.msk.bf16.mxu0 %vm792_vm1, %v764_v4 }
  0x4b   : > { %7034 = vmatmul.mubr.msk.bf16.gmra.mxu1 %vm792_vm1, %v781_v21 }
  0x4c   : > { %7037 = vmatprep.mubr.msk.bf16.mxu1 %vm792_vm1, %v782_v24 }
  0x4f   : > { %7002 = vmatmul.mubr.msk.bf16.gmra.mxu0 %vm792_vm1, %v765_v15 }
  0x50   : > { %7005 = vmatprep.mubr.msk.bf16.mxu0 %vm792_vm1, %v766_v16 }
  0x53   : > { %7038 = vmatmul.mubr.msk.bf16.gmra.mxu1 %vm792_vm1, %v783_v31 }
  0x57   : > { %7006 = vmatmul.mubr.msk.bf16.gmra.mxu0 %vm792_vm1, %v767_v27 }
  0x58   : > { %7009 = vmatprep.mubr.msk.bf16.mxu0 %vm792_vm1, %v768_v28 }
  0x5f   : > { %7010 = vmatmul.mubr.msk.bf16.gmra.mxu0 %vm792_vm1, %v769_v34 }
  0xdf   : > { %v6979_v36 = vpop.f32.mrf.mxu0 }
  0xe0   : > { %v936_v41 = vadd.f32 %v6979_v36, %v8797_v38 }
  0xe1   : > { %v927_v37 = vpop.f32.mrf.mxu0 }
  0xe2   : > { %v928_v43 = vadd.f32 %v8797_v38, %v927_v37 }
  0xe3   : > { %v6980_v39 = vpop.f32.mrf.mxu0  ;;  %v8804_v51 = vpop.f32.mrf.mxu1 }
  0xe4   : > { %v939_v40 = vadd.f32 %v6980_v39, %v8797_v38 }
  0xe5   : > { %v930_v42 = vpop.f32.mrf.mxu0  ;;  %v8808_v55 = vpop.f32.mrf.mxu1 }
  0xe6   : > { %v931_v44 = vadd.f32 %v8797_v38, %v930_v42  ;;  %v1183_v45 = vpack.c.bf16 %v939_v40, %v936_v41 }
  0xe7   : > { %v6983_v46 = vpop.f32.mrf.mxu0  ;;  %v8811_v61 = vpop.f32.mrf.mxu1 }
  0xe8   : > { %v1182_v47 = vpack.c.bf16 %v931_v44, %v928_v43  ;;  %v952_v49 = vadd.f32 %v6983_v46, %v8797_v38 }
  0xe9   : > { %v943_v48 = vpop.f32.mrf.mxu0  ;;  %v8816_v3 = vpop.f32.mrf.mxu1 }
  0xea   : > { %7649 = vtanh.bf16 %v1182_v47  ;;  %v944_v52 = vadd.f32 %v8797_v38, %v943_v48 }
  0xeb   : > { %7651 = vtanh.bf16 %v1183_v45  ;;  %v6984_v50 = vpop.f32.mrf.mxu0  ;;  %v8819_v7 = vpop.f32.mrf.mxu1 }
  0xec   : > { %v955_v53 = vadd.f32 %v6984_v50, %v8797_v38 }
  0xed   : > { %v946_v54 = vpop.f32.mrf.mxu0  ;;  %v8824_v14 = vpop.f32.mrf.mxu1 }
  0xee   : > { %v1185_v56 = vpack.c.bf16 %v955_v53, %v952_v49  ;;  %v947_v57 = vadd.f32 %v8797_v38, %v946_v54 }
  0xef   : > { %v6987_v58 = vpop.f32.mrf.mxu0  ;;  %v8829_v22 = vpop.f32.mrf.mxu1 }
  0xf0   : > { %v1184_v59 = vpack.c.bf16 %v947_v57, %v944_v52  ;;  %7653 = vtanh.bf16 %v1185_v56  ;;  %v968_v62 = vadd.f32 %v6987_v58, %v8797_v38 }
  0xf1   : > { %v959_v60 = vpop.f32.mrf.mxu0  ;;  %v8834_v28 = vpop.f32.mrf.mxu1 }
  0xf2   : > { %7655 = vtanh.bf16 %v1184_v59  ;;  %v960_v0 = vadd.f32 %v8797_v38, %v959_v60 }
  0xf3   : > { %v6988_v63 = vpop.f32.mrf.mxu0  ;;  %v8838_v32 = vpop.f32.mrf.mxu1 }
  0xf4   : > { %v971_v1 = vadd.f32 %v6988_v63, %v8797_v38 }
  0xf5   : > { %v962_v2 = vpop.f32.mrf.mxu0  ;;  %v8842_v41 = vpop.f32.mrf.mxu1 }
  0xf6   : > { %v1187_v4 = vpack.c.bf16 %v971_v1, %v968_v62  ;;  %v963_v5 = vadd.f32 %v8797_v38, %v962_v2 }
  0xf7   : > { %v6991_v6 = vpop.f32.mrf.mxu0  ;;  %v8848_v47 = vpop.f32.mrf.mxu1 }
  0xf8   : > { %v7650_v8 = vpop.eup %7649  ;;  %v1186_v9 = vpack.c.bf16 %v963_v5, %v960_v0  ;;  %7657 = vtanh.bf16 %v1187_v4  ;;  %v984_v12 = vadd.f32 %v6991_v6, %v8797_v38 }
  0xf9   : > { %v7652_v10 = vpop.eup %7651  ;;  %v975_v11 = vpop.f32.mrf.mxu0  ;;  %7043 = vmatprep.mubr.msk.bf16.mxu1 %vm1261_vm2, %v7650_v8 }
  0xfa   : > { %7659 = vtanh.bf16 %v1186_v9  ;;  %7044 = vmatmul.mubr.msk.bf16.vlgmr.msra.gmra.mxu1 %vm1261_vm2, %v7652_v10  ;;  %v976_v15 = vadd.f32 %v8797_v38, %v975_v11  ;;  %v8852_v57 = vpop.f32.mrf.mxu1 }
  0xfb   : > { %v6992_v13 = vpop.f32.mrf.mxu0 }
  0xfc   : > { %v987_v16 = vadd.f32 %v6992_v13, %v8797_v38  ;;  %v8856_v60 = vpop.f32.mrf.mxu1 }
  0xfd   : > { %v978_v17 = vpop.f32.mrf.mxu0 }
  0xfe   : > { %v1189_v18 = vpack.c.bf16 %v987_v16, %v984_v12  ;;  %v979_v19 = vadd.f32 %v8797_v38, %v978_v17  ;;  %v7654_v20 = vpop.eup %7653  ;;  %v8861_v6 = vpop.f32.mrf.mxu1 }
  0xff   : > { %v6995_v21 = vpop.f32.mrf.mxu0 }
 0x100   : > { %v7656_v23 = vpop.eup %7655  ;;  %v1188_v24 = vpack.c.bf16 %v979_v19, %v976_v15  ;;  %7661 = vtanh.bf16 %v1189_v18  ;;  %v1000_v26 = vadd.f32 %v6995_v21, %v8797_v38  ;;  %v8866_v13 = vpop.f32.mrf.mxu1 }
 0x101   : > { %7047 = vmatprep.mubr.msk.bf16.mxu1 %vm1261_vm2, %v7656_v23  ;;  %v991_v25 = vpop.f32.mrf.mxu0 }
 0x102   : > { %7663 = vtanh.bf16 %v1188_v24  ;;  %7048 = vmatmul.mubr.msk.bf16.gmra.mxu1 %vm1261_vm2, %v7654_v20  ;;  %v992_v29 = vadd.f32 %v8797_v38, %v991_v25  ;;  %v1122_v23 = vpop.f32.mrf.mxu1 }
 0x103   : > { %v6996_v27 = vpop.f32.mrf.mxu0 }
 0x104   : > { %v1003_v30 = vadd.f32 %v6996_v27, %v8797_v38  ;;  %v1075_v27 = vadd.f32 %v8797_v38, %v8816_v3 }
 0x105   : > { %v994_v31 = vpop.f32.mrf.mxu0 }
 0x106   : > { %v1191_v33 = vpack.c.bf16 %v1003_v30, %v1000_v26  ;;  %v995_v34 = vadd.f32 %v8797_v38, %v994_v31  ;;  %v7658_v35 = vpop.eup %7657  ;;  %v1072_v26 = vadd.f32 %v8797_v38, %v8808_v55 }
 0x107   : > { %v6999_v36 = vpop.f32.mrf.mxu0 }
 0x108   : > { %v7660_v37 = vpop.eup %7659  ;;  %v1190_v39 = vpack.c.bf16 %v995_v34, %v992_v29  ;;  %7665 = vtanh.bf16 %v1191_v33  ;;  %v1016_v42 = vadd.f32 %v6999_v36, %v8797_v38  ;;  %v8878_v33 = vpop.f32.mrf.mxu1  ;;  %v1200_v55 = vpack.c.bf16 %v1075_v27, %v1072_v26 }
 0x109   : > { %7051 = vmatprep.mubr.msk.bf16.mxu1 %vm1261_vm2, %v7660_v37  ;;  %v1007_v40 = vpop.f32.mrf.mxu0 }
 0x10a   : > { %7667 = vtanh.bf16 %v1190_v39  ;;  %7052 = vmatmul.mubr.msk.bf16.gmra.mxu1 %vm1261_vm2, %v7658_v35  ;;  %v1008_v44 = vadd.f32 %v8797_v38, %v1007_v40  ;;  %v1135_v40 = vpop.f32.mrf.mxu1 }
 0x10b   : > { %v7000_v43 = vpop.f32.mrf.mxu0 }
 0x10c   : > { %v1019_v45 = vadd.f32 %v7000_v43, %v8797_v38 }
 0x10d   : > { %v1010_v46 = vpop.f32.mrf.mxu0 }
 0x10e   : > { %v1193_v48 = vpack.c.bf16 %v1019_v45, %v1016_v42  ;;  %v1011_v49 = vadd.f32 %v8797_v38, %v1010_v46  ;;  %v7662_v50 = vpop.eup %7661  ;;  %v1083_v45 = vadd.f32 %v8811_v61, %v8797_v38  ;;  %v1088_v46 = vadd.f32 %v8797_v38, %v8824_v14 }
 0x10f   : > { %v7003_v52 = vpop.f32.mrf.mxu0  ;;  %v1099_v61 = vadd.f32 %v8829_v22, %v8797_v38  ;;  %v1104_v14 = vadd.f32 %v8797_v38, %v8842_v41  ;;  %v1115_v22 = vadd.f32 %v8848_v47, %v8797_v38  ;;  %v1120_v41 = vadd.f32 %v8797_v38, %v8861_v6 }
 0x110   : > { %v7664_v53 = vpop.eup %7663  ;;  %v1192_v54 = vpack.c.bf16 %v1011_v49, %v1008_v44  ;;  %7669 = vtanh.bf16 %v1193_v48  ;;  %v1032_v58 = vadd.f32 %v7003_v52, %v8797_v38  ;;  %v1080_v44 = vadd.f32 %v8804_v51, %v8797_v38  ;;  %v7032_v49 = vpop.f32.mrf.mxu1 }
 0x111   : > { %7055 = vmatprep.mubr.msk.bf16.mxu1 %vm1261_vm2, %v7664_v53  ;;  %v1023_v56 = vpop.f32.mrf.mxu0  ;;  %v1091_v48 = vadd.f32 %v8797_v38, %v8834_v28  ;;  %v1096_v51 = vadd.f32 %v8819_v7, %v8797_v38  ;;  %v1107_v28 = vadd.f32 %v8797_v38, %v8852_v57  ;;  %v1112_v7 = vadd.f32 %v8838_v32, %v8797_v38 }
 0x112   : > { %7056 = vmatmul.mubr.msk.bf16.gmra.mxu1 %vm1261_vm2, %v7662_v50  ;;  %7671 = vtanh.bf16 %v1192_v54  ;;  %v1024_v62 = vadd.f32 %v8797_v38, %v1023_v56  ;;  %v1201_v50 = vpack.c.bf16 %v1083_v45, %v1080_v44  ;;  %v1138_v54 = vpop.f32.mrf.mxu1  ;;  %v1123_v57 = vadd.f32 %v8797_v38, %v1122_v23 }
 0x113   : > { %v7004_v59 = vpop.f32.mrf.mxu0  ;;  %v1202_v52 = vpack.c.bf16 %v1091_v48, %v1088_v46  ;;  %v1128_v32 = vadd.f32 %v8856_v60, %v8797_v38  ;;  %v1131_v47 = vadd.f32 %v8866_v13, %v8797_v38  ;;  %v1136_v6 = vadd.f32 %v8797_v38, %v1135_v40  ;;  %v7609_v48 = vld [vmem:[%s10252_s7] sm:$0xff]  }
 0x114   : > { %v1035_v63 = vadd.f32 %v7004_v59, %v8797_v38  ;;  %v1203_v59 = vpack.c.bf16 %v1099_v61, %v1096_v51  ;;  %v1144_v60 = vadd.f32 %v8878_v33, %v8797_v38  ;;  %v1147_v13 = vadd.f32 %v7032_v49, %v8797_v38  ;;  %7173 = vmatprep.subr.bf16.mxu1 %v7609_v48 }
 0x115   : > { %v1026_v0 = vpop.f32.mrf.mxu0  ;;  %7174 = vmatpush3.bf16.msra.mxu1 %v7609_v48 }
 0x116   : > { %v1195_v1 = vpack.c.bf16 %v1035_v63, %v1032_v58  ;;  %v1027_v2 = vadd.f32 %v8797_v38, %v1026_v0  ;;  %v7666_v4 = vpop.eup %7665  ;;  %v7035_v58 = vpop.f32.mrf.mxu1  ;;  %v1204_v63 = vpack.c.bf16 %v1107_v28, %v1104_v14 }
 0x117   : > { %v7007_v5 = vpop.f32.mrf.mxu0 }
 0x118   : > { %v7668_v8 = vpop.eup %7667  ;;  %v1194_v9 = vpack.c.bf16 %v1027_v2, %v1024_v62  ;;  %7673 = vtanh.bf16 %v1195_v1  ;;  %v1048_v11 = vadd.f32 %v7007_v5, %v8797_v38  ;;  %v1151_v1 = vpop.f32.mrf.mxu1  ;;  %v1205_v5 = vpack.c.bf16 %v1115_v22, %v1112_v7 }
 0x119   : > { %7059 = vmatprep.mubr.msk.bf16.mxu1 %vm1261_vm2, %v7668_v8  ;;  %v1039_v10 = vpop.f32.mrf.mxu0  ;;  %v1206_v8 = vpack.c.bf16 %v1123_v57, %v1120_v41 }
 0x11a   : > { %7060 = vmatmul.mubr.msk.bf16.gmra.mxu1 %vm1261_vm2, %v7666_v4  ;;  %7675 = vtanh.bf16 %v1194_v9  ;;  %v1040_v15 = vadd.f32 %v8797_v38, %v1039_v10  ;;  %v7036_v4 = vpop.f32.mrf.mxu1 }
 0x11b   : > { %v7008_v12 = vpop.f32.mrf.mxu0  ;;  %v1163_v33 = vadd.f32 %v7036_v4, %v8797_v38 }
 0x11c   : > { %v1051_v16 = vadd.f32 %v7008_v12, %v8797_v38  ;;  %v1154_v10 = vpop.f32.mrf.mxu1  ;;  %v1139_v12 = vadd.f32 %v8797_v38, %v1138_v54 }
 0x11d   : > { %v1042_v17 = vpop.f32.mrf.mxu0  ;;  %v1155_v23 = vadd.f32 %v8797_v38, %v1154_v10 }
 0x11e   : > { %v1197_v18 = vpack.c.bf16 %v1051_v16, %v1048_v11  ;;  %v1043_v19 = vadd.f32 %v8797_v38, %v1042_v17  ;;  %v7670_v20 = vpop.eup %7669  ;;  %v1207_v16 = vpack.c.bf16 %v1131_v47, %v1128_v32  ;;  %v1208_v17 = vpack.c.bf16 %v1139_v12, %v1136_v6 }
 0x11f   : > { %v7011_v21 = vpop.f32.mrf.mxu0 }
 0x120   : > { %v7672_v24 = vpop.eup %7671  ;;  %v1196_v25 = vpack.c.bf16 %v1043_v19, %v1040_v15  ;;  %7677 = vtanh.bf16 %v1197_v18  ;;  %v1064_v30 = vadd.f32 %v7011_v21, %v8797_v38  ;;  %v7039_v15 = vpop.f32.mrf.mxu1  ;;  %v1152_v21 = vadd.f32 %v8797_v38, %v1151_v1 }
 0x121   : > { %7063 = vmatprep.mubr.msk.bf16.mxu1 %vm1261_vm2, %v7672_v24  ;;  %v1055_v29 = vpop.f32.mrf.mxu0 }
 0x122   : > { %7064 = vmatmul.mubr.msk.bf16.gmra.mxu1 %vm1261_vm2, %v7670_v20  ;;  %7679 = vtanh.bf16 %v1196_v25  ;;  %v1056_v34 = vadd.f32 %v8797_v38, %v1055_v29  ;;  %v1167_v19 = vpop.f32.mrf.mxu1  ;;  %v1209_v25 = vpack.c.bf16 %v1147_v13, %v1144_v60  ;;  %v1210_v26 = vpack.c.bf16 %v1155_v23, %v1152_v21 }
 0x123   : > { %v7012_v31 = vpop.f32.mrf.mxu0  ;;  %7681 = vtanh.bf16 %v1200_v55 }
 0x124   : > { %v1067_v35 = vadd.f32 %v7012_v31, %v8797_v38  ;;  %v7040_v24 = vpop.f32.mrf.mxu1  ;;  %v1160_v31 = vadd.f32 %v7035_v58, %v8797_v38 }
 0x125   : > { %v1058_v36 = vpop.f32.mrf.mxu0  ;;  %v1179_v40 = vadd.f32 %v7040_v24, %v8797_v38 }
 0x126   : > { %v1199_v37 = vpack.c.bf16 %v1067_v35, %v1064_v30  ;;  %v1059_v3 = vadd.f32 %v8797_v38, %v1058_v36  ;;  %v7674_v39 = vpop.eup %7673  ;;  %v1170_v29 = vpop.f32.mrf.mxu1  ;;  %v1211_v55 = vpack.c.bf16 %v1163_v33, %v1160_v31 }
 0x127   : > { %v1171_v35 = vadd.f32 %v8797_v38, %v1170_v29 }
 0x128   : > { %v7676_v42 = vpop.eup %7675  ;;  %v1198_v43 = vpack.c.bf16 %v1059_v3, %v1056_v34  ;;  %7683 = vtanh.bf16 %v1199_v37  ;;  %v1168_v34 = vadd.f32 %v8797_v38, %v1167_v19 }
 0x129   : > { %7067 = vmatprep.mubr.msk.bf16.mxu1 %vm1261_vm2, %v7676_v42 }
 0x12a   : > { %7068 = vmatmul.mubr.msk.bf16.gmra.mxu1 %vm1261_vm2, %v7674_v39  ;;  %7685 = vtanh.bf16 %v1198_v43  ;;  %v1212_v36 = vpack.c.bf16 %v1171_v35, %v1168_v34  ;;  %v1176_v39 = vadd.f32 %v7039_v15, %v8797_v38 }
 0x12b   : > { %7687 = vtanh.bf16 %v1201_v50 }
 0x12c   : > { %7689 = vtanh.bf16 %v1202_v52  ;;  %v1213_v42 = vpack.c.bf16 %v1179_v40, %v1176_v39  ;;  %v8949_v52 = vld [vmem:[%s10292_s26] ss:$0 sm:$0xff] }
 0x12d   : > { %7691 = vtanh.bf16 %v1203_v59 }
 0x12e   : > { %v7678_v53 = vpop.eup %7677  ;;  %7693 = vtanh.bf16 %v1204_v63 }
 0x12f   : > { %7695 = vtanh.bf16 %v1205_v5 }
 0x130   : > { %v7680_v56 = vpop.eup %7679  ;;  %7697 = vtanh.bf16 %v1206_v8 }
 0x131   : > { %7071 = vmatprep.mubr.msk.bf16.mxu1 %vm1261_vm2, %v7680_v56  ;;  %v7682_v62 = vpop.eup %7681  ;;  %7699 = vtanh.bf16 %v1207_v16 }
 0x132   : > { %7072 = vmatmul.mubr.msk.bf16.gmra.mxu1 %vm1261_vm2, %v7678_v53  ;;  %7701 = vtanh.bf16 %v1208_v17 }
 0x133   : > { %7703 = vtanh.bf16 %v1209_v25 }
 0x134   : > { %7705 = vtanh.bf16 %v1210_v26 }
 0x135   : > { %7707 = vtanh.bf16 %v1211_v55 }
 0x136   : > { %v7684_v0 = vpop.eup %7683  ;;  %7709 = vtanh.bf16 %v1212_v36 }
 0x137   : > { %7711 = vtanh.bf16 %v1213_v42 }
 0x138   : > { %v7686_v2 = vpop.eup %7685 }
 0x139   : > { %7075 = vmatprep.mubr.msk.bf16.mxu1 %vm1261_vm2, %v7686_v2  ;;  %v7688_v9 = vpop.eup %7687 }
 0x13a   : > { %7076 = vmatmul.mubr.msk.bf16.gmra.mxu1 %vm1261_vm2, %v7684_v0  ;;  %v7690_v11 = vpop.eup %7689 }
 0x13b   : > { %7079 = vmatprep.mubr.msk.bf16.mxu1 %vm1261_vm2, %v7682_v62  ;;  %v7692_v18 = vpop.eup %7691 }
 0x13c   : > { %v7694_v20 = vpop.eup %7693 }
 0x13d   : > { %v7696_v27 = vpop.eup %7695 }
 0x13e   : > { %v7698_v30 = vpop.eup %7697 }
 0x13f   : > { %v7700_v37 = vpop.eup %7699 }
 0x140   : > { %v7702_v3 = vpop.eup %7701 }
 0x141   : > { %v7704_v43 = vpop.eup %7703 }
 0x142   : > { %7080 = vmatmul.mubr.msk.bf16.gmra.mxu1 %vm1261_vm2, %v7688_v9  ;;  %v7706_v44 = vpop.eup %7705 }
 0x143   : > { %7083 = vmatprep.mubr.msk.bf16.mxu1 %vm1261_vm2, %v7690_v11  ;;  %v7708_v45 = vpop.eup %7707 }
 0x144   : > { %v7710_v46 = vpop.eup %7709 }
 0x145   : > { %v7712_v38 = vpop.eup %7711 }
 0x14a   : > { %7084 = vmatmul.mubr.msk.bf16.gmra.mxu1 %vm1261_vm2, %v7692_v18 }
 0x14b   : > { %7087 = vmatprep.mubr.msk.bf16.mxu1 %vm1261_vm2, %v7694_v20 }
 0x152   : > { %7088 = vmatmul.mubr.msk.bf16.gmra.mxu1 %vm1261_vm2, %v7696_v27 }
 0x153   : > { %7091 = vmatprep.mubr.msk.bf16.mxu1 %vm1261_vm2, %v7698_v30 }
 0x15a   : > { %7092 = vmatmul.mubr.msk.bf16.gmra.mxu1 %vm1261_vm2, %v7700_v37 }
 0x15b   : > { %7095 = vmatprep.mubr.msk.bf16.mxu1 %vm1261_vm2, %v7702_v3 }
 0x162   : > { %7096 = vmatmul.mubr.msk.bf16.gmra.mxu1 %vm1261_vm2, %v7704_v43 }
 0x163   : > { %7099 = vmatprep.mubr.msk.bf16.mxu1 %vm1261_vm2, %v7706_v44 }
 0x16a   : > { %7100 = vmatmul.mubr.msk.bf16.gmra.mxu1 %vm1261_vm2, %v7708_v45 }
 0x16b   : > { %7103 = vmatprep.mubr.msk.bf16.mxu1 %vm1261_vm2, %v7710_v46 }
 0x172   : > { %7104 = vmatmul.mubr.msk.bf16.gmra.mxu1 %vm1261_vm2, %v7712_v38 }
 0x1ba   : > { %v7045_v49 = vpop.f32.mrf.mxu1 }
 0x1bb   : > { %v1401_v56 = vadd.f32 %v7045_v49, %v8949_v52 }
 0x1bc   : > { %v1392_v50 = vpop.f32.mrf.mxu1 }
 0x1bd   : > { %v1393_v61 = vadd.f32 %v8949_v52, %v1392_v50 }
 0x1be   : > { %v7046_v53 = vpop.f32.mrf.mxu1 }
 0x1bf   : > { %v1404_v54 = vadd.f32 %v7046_v53, %v8949_v52 }
 0x1c0   : > { %v1395_v51 = vpop.f32.mrf.mxu1 }
 0x1c1   : > { %v1396_v14 = vadd.f32 %v8949_v52, %v1395_v51  ;;  %v1648_v28 = vpack.c.bf16 %v1404_v54, %v1401_v56 }
 0x1c2   : > { %v7049_v58 = vpop.f32.mrf.mxu1 }
 0x1c3   : > { %v1647_v59 = vpack.c.bf16 %v1396_v14, %v1393_v61  ;;  %v1417_v1 = vadd.f32 %v7049_v58, %v8949_v52 }
 0x1c4   : > { %v1408_v62 = vpop.f32.mrf.mxu1 }
 0x1c5   : > { %7713 = vtanh.bf16 %v1647_v59  ;;  %v1409_v7 = vadd.f32 %v8949_v52, %v1408_v62 }
 0x1c6   : > { %7715 = vtanh.bf16 %v1648_v28  ;;  %v7050_v63 = vpop.f32.mrf.mxu1 }
 0x1c7   : > { %v1420_v0 = vadd.f32 %v7050_v63, %v8949_v52 }
 0x1c8   : > { %v1411_v2 = vpop.f32.mrf.mxu1 }
 0x1c9   : > { %v1412_v22 = vadd.f32 %v8949_v52, %v1411_v2  ;;  %v1650_v41 = vpack.c.bf16 %v1420_v0, %v1417_v1 }
 0x1ca   : > { %v7053_v57 = vpop.f32.mrf.mxu1 }
 0x1cb   : > { %v1649_v4 = vpack.c.bf16 %v1412_v22, %v1409_v7  ;;  %v1433_v8 = vadd.f32 %v7053_v57, %v8949_v52 }
 0x1cc   : > { %v1424_v5 = vpop.f32.mrf.mxu1 }
 0x1cd   : > { %7717 = vtanh.bf16 %v1649_v4  ;;  %v1425_v10 = vadd.f32 %v8949_v52, %v1424_v5 }
 0x1ce   : > { %7719 = vtanh.bf16 %v1650_v41  ;;  %v7054_v9 = vpop.f32.mrf.mxu1 }
 0x1cf   : > { %v1436_v11 = vadd.f32 %v7054_v9, %v8949_v52 }
 0x1d0   : > { %v1427_v32 = vpop.f32.mrf.mxu1 }
 0x1d1   : > { %v1652_v47 = vpack.c.bf16 %v1436_v11, %v1433_v8  ;;  %v1428_v6 = vadd.f32 %v8949_v52, %v1427_v32 }
 0x1d2   : > { %v7057_v12 = vpop.f32.mrf.mxu1 }
 0x1d3   : > { %v8963_v15 = vpop.eup %7713  ;;  %v1651_v16 = vpack.c.bf16 %v1428_v6, %v1425_v10  ;;  %7721 = vtanh.bf16 %v1652_v47  ;;  %v1449_v19 = vadd.f32 %v7057_v12, %v8949_v52 }
 0x1d4   : > { %v8965_v17 = vpop.eup %7715  ;;  %v1440_v18 = vpop.f32.mrf.mxu1  ;;  %7109 = vmatprep.mubr.msk.bf16.mxu0 %vm1261_vm2, %v8963_v15 }
 0x1d5   : > { %7723 = vtanh.bf16 %v1651_v16  ;;  %7110 = vmatmul.mubr.msk.bf16.vlgmr.msra.gmra.mxu0 %vm1261_vm2, %v8965_v17  ;;  %v1441_v60 = vadd.f32 %v8949_v52, %v1440_v18 }
 0x1d6   : > { %v7058_v20 = vpop.f32.mrf.mxu1 }
 0x1d7   : > { %v1452_v13 = vadd.f32 %v7058_v20, %v8949_v52 }
 0x1d8   : > { %v1443_v21 = vpop.f32.mrf.mxu1 }
 0x1d9   : > { %v1654_v23 = vpack.c.bf16 %v1452_v13, %v1449_v19  ;;  %v1444_v24 = vadd.f32 %v8949_v52, %v1443_v21 }
 0x1da   : > { %v7061_v25 = vpop.f32.mrf.mxu1 }
 0x1db   : > { %v8975_v26 = vpop.eup %7717  ;;  %v1653_v27 = vpack.c.bf16 %v1444_v24, %v1441_v60  ;;  %7725 = vtanh.bf16 %v1654_v23  ;;  %v1465_v31 = vadd.f32 %v7061_v25, %v8949_v52 }
 0x1dc   : > { %v8977_v29 = vpop.eup %7719  ;;  %7113 = vmatprep.mubr.msk.bf16.mxu0 %vm1261_vm2, %v8975_v26  ;;  %v1456_v30 = vpop.f32.mrf.mxu1 }
 0x1dd   : > { %7727 = vtanh.bf16 %v1653_v27  ;;  %7114 = vmatmul.mubr.msk.bf16.gmra.mxu0 %vm1261_vm2, %v8977_v29  ;;  %v1457_v34 = vadd.f32 %v8949_v52, %v1456_v30 }
 0x1de   : > { %v7062_v33 = vpop.f32.mrf.mxu1 }
 0x1df   : > { %v1468_v35 = vadd.f32 %v7062_v33, %v8949_v52 }
 0x1e0   : > { %v1459_v55 = vpop.f32.mrf.mxu1 }
 0x1e1   : > { %v1656_v36 = vpack.c.bf16 %v1468_v35, %v1465_v31  ;;  %v1460_v37 = vadd.f32 %v8949_v52, %v1459_v55  ;;  %v8987_v3 = vpop.eup %7721 }
 0x1e2   : > { %v7065_v39 = vpop.f32.mrf.mxu1 }
 0x1e3   : > { %v8989_v40 = vpop.eup %7723  ;;  %v1655_v42 = vpack.c.bf16 %v1460_v37, %v1457_v34  ;;  %7729 = vtanh.bf16 %v1656_v36  ;;  %v1481_v44 = vadd.f32 %v7065_v39, %v8949_v52 }
 0x1e4   : > { %7117 = vmatprep.mubr.msk.bf16.mxu0 %vm1261_vm2, %v8989_v40  ;;  %v1472_v43 = vpop.f32.mrf.mxu1 }
 0x1e5   : > { %7731 = vtanh.bf16 %v1655_v42  ;;  %7118 = vmatmul.mubr.msk.bf16.gmra.mxu0 %vm1261_vm2, %v8987_v3  ;;  %v1473_v46 = vadd.f32 %v8949_v52, %v1472_v43 }
 0x1e6   : > { %v7066_v45 = vpop.f32.mrf.mxu1 }
 0x1e7   : > { %v1484_v38 = vadd.f32 %v7066_v45, %v8949_v52 }
 0x1e8   : > { %v1475_v48 = vpop.f32.mrf.mxu1 }
 0x1e9   : > { %v1658_v49 = vpack.c.bf16 %v1484_v38, %v1481_v44  ;;  %v1476_v50 = vadd.f32 %v8949_v52, %v1475_v48  ;;  %v8999_v53 = vpop.eup %7725 }
 0x1ea   : > { %v7069_v54 = vpop.f32.mrf.mxu1 }
 0x1eb   : > { %v9001_v56 = vpop.eup %7727  ;;  %v1657_v51 = vpack.c.bf16 %v1476_v50, %v1473_v46  ;;  %7733 = vtanh.bf16 %v1658_v49  ;;  %v1497_v14 = vadd.f32 %v7069_v54, %v8949_v52 }
 0x1ec   : > { %7121 = vmatprep.mubr.msk.bf16.mxu0 %vm1261_vm2, %v9001_v56  ;;  %v1488_v61 = vpop.f32.mrf.mxu1 }
 0x1ed   : > { %7122 = vmatmul.mubr.msk.bf16.gmra.mxu0 %vm1261_vm2, %v8999_v53  ;;  %7735 = vtanh.bf16 %v1657_v51  ;;  %v1489_v58 = vadd.f32 %v8949_v52, %v1488_v61 }
 0x1ee   : > { %v7070_v28 = vpop.f32.mrf.mxu1 }
 0x1ef   : > { %v1500_v59 = vadd.f32 %v7070_v28, %v8949_v52 }
 0x1f0   : > { %v1491_v62 = vpop.f32.mrf.mxu1 }
 0x1f1   : > { %v1660_v63 = vpack.c.bf16 %v1500_v59, %v1497_v14  ;;  %v1492_v0 = vadd.f32 %v8949_v52, %v1491_v62  ;;  %v9011_v1 = vpop.eup %7729 }
 0x1f2   : > { %v7073_v2 = vpop.f32.mrf.mxu1 }
 0x1f3   : > { %v9013_v7 = vpop.eup %7731  ;;  %v1659_v22 = vpack.c.bf16 %v1492_v0, %v1489_v58  ;;  %7737 = vtanh.bf16 %v1660_v63  ;;  %v1513_v57 = vadd.f32 %v7073_v2, %v8949_v52 }
 0x1f4   : > { %7125 = vmatprep.mubr.msk.bf16.mxu0 %vm1261_vm2, %v9013_v7  ;;  %v1504_v41 = vpop.f32.mrf.mxu1 }
 0x1f5   : > { %7126 = vmatmul.mubr.msk.bf16.gmra.mxu0 %vm1261_vm2, %v9011_v1  ;;  %7739 = vtanh.bf16 %v1659_v22  ;;  %v1505_v5 = vadd.f32 %v8949_v52, %v1504_v41 }
 0x1f6   : > { %v7074_v4 = vpop.f32.mrf.mxu1 }
 0x1f7   : > { %v1516_v8 = vadd.f32 %v7074_v4, %v8949_v52 }
 0x1f8   : > { %v1507_v9 = vpop.f32.mrf.mxu1 }
 0x1f9   : > { %v1662_v10 = vpack.c.bf16 %v1516_v8, %v1513_v57  ;;  %v1508_v11 = vadd.f32 %v8949_v52, %v1507_v9  ;;  %v9023_v32 = vpop.eup %7733 }
 0x1fa   : > { %v7077_v47 = vpop.f32.mrf.mxu1 }
 0x1fb   : > { %v9025_v6 = vpop.eup %7735  ;;  %v1661_v12 = vpack.c.bf16 %v1508_v11, %v1505_v5  ;;  %7741 = vtanh.bf16 %v1662_v10  ;;  %v1529_v18 = vadd.f32 %v7077_v47, %v8949_v52 }
 0x1fc   : > { %7129 = vmatprep.mubr.msk.bf16.mxu0 %vm1261_vm2, %v9025_v6  ;;  %v1520_v16 = vpop.f32.mrf.mxu1 }
 0x1fd   : > { %7130 = vmatmul.mubr.msk.bf16.gmra.mxu0 %vm1261_vm2, %v9023_v32  ;;  %7743 = vtanh.bf16 %v1661_v12  ;;  %v1521_v20 = vadd.f32 %v8949_v52, %v1520_v16 }
 0x1fe   : > { %v7078_v19 = vpop.f32.mrf.mxu1 }
 0x1ff   : > { %v1532_v60 = vadd.f32 %v7078_v19, %v8949_v52 }
 0x200   : > { %v1523_v13 = vpop.f32.mrf.mxu1 }
 0x201   : > { %v1664_v21 = vpack.c.bf16 %v1532_v60, %v1529_v18  ;;  %v1524_v23 = vadd.f32 %v8949_v52, %v1523_v13  ;;  %v9035_v24 = vpop.eup %7737 }
 0x202   : > { %v7081_v25 = vpop.f32.mrf.mxu1 }
 0x203   : > { %v9037_v27 = vpop.eup %7739  ;;  %v1663_v30 = vpack.c.bf16 %v1524_v23, %v1521_v20  ;;  %7745 = vtanh.bf16 %v1664_v21  ;;  %v1545_v33 = vadd.f32 %v7081_v25, %v8949_v52 }
 0x204   : > { %7133 = vmatprep.mubr.msk.bf16.mxu0 %vm1261_vm2, %v9037_v27  ;;  %v1536_v31 = vpop.f32.mrf.mxu1 }
 0x205   : > { %7134 = vmatmul.mubr.msk.bf16.gmra.mxu0 %vm1261_vm2, %v9035_v24  ;;  %7747 = vtanh.bf16 %v1663_v30  ;;  %v1537_v35 = vadd.f32 %v8949_v52, %v1536_v31 }
 0x206   : > { %v7082_v34 = vpop.f32.mrf.mxu1 }
 0x207   : > { %v1548_v55 = vadd.f32 %v7082_v34, %v8949_v52 }
 0x208   : > { %v1539_v36 = vpop.f32.mrf.mxu1 }
 0x209   : > { %v1666_v37 = vpack.c.bf16 %v1548_v55, %v1545_v33  ;;  %v1540_v39 = vadd.f32 %v8949_v52, %v1539_v36  ;;  %v9047_v42 = vpop.eup %7741 }
 0x20a   : > { %v7085_v43 = vpop.f32.mrf.mxu1 }
 0x20b   : > { %v9049_v44 = vpop.eup %7743  ;;  %v1665_v45 = vpack.c.bf16 %v1540_v39, %v1537_v35  ;;  %7749 = vtanh.bf16 %v1666_v37  ;;  %v1561_v38 = vadd.f32 %v7085_v43, %v8949_v52 }
 0x20c   : > { %7137 = vmatprep.mubr.msk.bf16.mxu0 %vm1261_vm2, %v9049_v44  ;;  %v1552_v46 = vpop.f32.mrf.mxu1 }
 0x20d   : > { %7138 = vmatmul.mubr.msk.bf16.gmra.mxu0 %vm1261_vm2, %v9047_v42  ;;  %7751 = vtanh.bf16 %v1665_v45  ;;  %v1553_v49 = vadd.f32 %v8949_v52, %v1552_v46 }
 0x20e   : > { %v7086_v48 = vpop.f32.mrf.mxu1 }
 0x20f   : > { %v1564_v50 = vadd.f32 %v7086_v48, %v8949_v52 }
 0x210   : > { %v1555_v54 = vpop.f32.mrf.mxu1 }
 0x211   : > { %v1668_v51 = vpack.c.bf16 %v1564_v50, %v1561_v38  ;;  %v1556_v61 = vadd.f32 %v8949_v52, %v1555_v54  ;;  %v9059_v14 = vpop.eup %7745 }
 0x212   : > { %v7089_v28 = vpop.f32.mrf.mxu1 }
 0x213   : > { %v9061_v58 = vpop.eup %7747  ;;  %v1667_v59 = vpack.c.bf16 %v1556_v61, %v1553_v49  ;;  %7753 = vtanh.bf16 %v1668_v51  ;;  %v1577_v63 = vadd.f32 %v7089_v28, %v8949_v52 }
 0x214   : > { %7141 = vmatprep.mubr.msk.bf16.mxu0 %vm1261_vm2, %v9061_v58  ;;  %v1568_v62 = vpop.f32.mrf.mxu1 }
 0x215   : > { %7142 = vmatmul.mubr.msk.bf16.gmra.mxu0 %vm1261_vm2, %v9059_v14  ;;  %7755 = vtanh.bf16 %v1667_v59  ;;  %v1569_v2 = vadd.f32 %v8949_v52, %v1568_v62 }
 0x216   : > { %v7090_v0 = vpop.f32.mrf.mxu1 }
 0x217   : > { %v1580_v22 = vadd.f32 %v7090_v0, %v8949_v52 }
 0x218   : > { %v1571_v41 = vpop.f32.mrf.mxu1 }
 0x219   : > { %v1670_v57 = vpack.c.bf16 %v1580_v22, %v1577_v63  ;;  %v1572_v4 = vadd.f32 %v8949_v52, %v1571_v41  ;;  %v9071_v5 = vpop.eup %7749 }
 0x21a   : > { %v7093_v8 = vpop.f32.mrf.mxu1 }
 0x21b   : > { %v9073_v9 = vpop.eup %7751  ;;  %v1669_v10 = vpack.c.bf16 %v1572_v4, %v1569_v2  ;;  %7757 = vtanh.bf16 %v1670_v57  ;;  %v1593_v47 = vadd.f32 %v7093_v8, %v8949_v52 }
 0x21c   : > { %7145 = vmatprep.mubr.msk.bf16.mxu0 %vm1261_vm2, %v9073_v9  ;;  %v1584_v11 = vpop.f32.mrf.mxu1 }
 0x21d   : > { %7146 = vmatmul.mubr.msk.bf16.gmra.mxu0 %vm1261_vm2, %v9071_v5  ;;  %7759 = vtanh.bf16 %v1669_v10  ;;  %v1585_v16 = vadd.f32 %v8949_v52, %v1584_v11 }
 0x21e   : > { %v7094_v12 = vpop.f32.mrf.mxu1 }
 0x21f   : > { %v1596_v18 = vadd.f32 %v7094_v12, %v8949_v52 }
 0x220   : > { %v1587_v19 = vpop.f32.mrf.mxu1 }
 0x221   : > { %v1672_v20 = vpack.c.bf16 %v1596_v18, %v1593_v47  ;;  %v1588_v60 = vadd.f32 %v8949_v52, %v1587_v19  ;;  %v9083_v13 = vpop.eup %7753 }
 0x222   : > { %v7097_v21 = vpop.f32.mrf.mxu1 }
 0x223   : > { %v9085_v23 = vpop.eup %7755  ;;  %v1671_v25 = vpack.c.bf16 %v1588_v60, %v1585_v16  ;;  %7761 = vtanh.bf16 %v1672_v20  ;;  %v1609_v31 = vadd.f32 %v7097_v21, %v8949_v52  ;;  %v7610_v60 = vld [vmem:[%s10254_s9 + $0x10] ss:$8 sps:$4 sm:$0xff]   ;;  %v7612_v21 = vld [vmem:[%s10254_s9 + $0x14] ss:$8 sps:$4 sm:$0xff]  }
 0x224   : > { %7149 = vmatprep.mubr.msk.bf16.mxu0 %vm1261_vm2, %v9085_v23  ;;  %v1600_v30 = vpop.f32.mrf.mxu1  ;;  %2784 = vmatprep.subr.bf16.mxu0 %v7612_v21 }
 0x225   : > { %7150 = vmatmul.mubr.msk.bf16.gmra.mxu0 %vm1261_vm2, %v9083_v13  ;;  %7763 = vtanh.bf16 %v1671_v25  ;;  %v1601_v34 = vadd.f32 %v8949_v52, %v1600_v30  ;;  %v7613_v25 = vld [vmem:[%s10254_s9] ss:$8 sps:$4 sm:$0xff]   ;;  %v7615_v30 = vld [vmem:[%s10254_s9 + $0x4] ss:$8 sps:$4 sm:$0xff]  }
 0x226   : > { %v7098_v33 = vpop.f32.mrf.mxu1  ;;  %2785 = vmatpush1.bf16.msra.mxu0 %v7610_v60 }
 0x227   : > { %v1612_v35 = vadd.f32 %v7098_v33, %v8949_v52  ;;  %2786 = vmatprep.subr.bf16.mxu0 %v7615_v30 }
 0x228   : > { %v1603_v55 = vpop.f32.mrf.mxu1 }
 0x229   : > { %v1674_v36 = vpack.c.bf16 %v1612_v35, %v1609_v31  ;;  %v1604_v37 = vadd.f32 %v8949_v52, %v1603_v55  ;;  %v9095_v39 = vpop.eup %7757 }
 0x22a   : > { %10293 = vst [vmem:[#allocation2_spill] sm:$0xff] %v9095_v39  ;;  %v7101_v43 = vpop.f32.mrf.mxu1  ;;  %2787 = vmatpush1.bf16.msra.mxu0 %v7613_v25 }
 0x22b   : > { %v9097_v45 = vpop.eup %7759  ;;  %v1673_v46 = vpack.c.bf16 %v1604_v37, %v1601_v34  ;;  %7765 = vtanh.bf16 %v1674_v36  ;;  %v1625_v48 = vadd.f32 %v7101_v43, %v8949_v52  ;;  %v9158_v34 = vld [vmem:[%s10302_s25] ss:$0 sm:$0xff] }
 0x22c   : > { %7153 = vmatprep.mubr.msk.bf16.mxu0 %vm1261_vm2, %v9097_v45  ;;  %v1616_v38 = vpop.f32.mrf.mxu1 }
 0x22d   : > { %7767 = vtanh.bf16 %v1673_v46  ;;  %7154 = vmatmul.mubr.msk.bf16.gmra.mxu0 %vm1261_vm2, %v9095_v39  ;;  %v1617_v50 = vadd.f32 %v8949_v52, %v1616_v38 }
 0x22e   : > { %v7102_v49 = vpop.f32.mrf.mxu1 }
 0x22f   : > { %v1628_v54 = vadd.f32 %v7102_v49, %v8949_v52 }
 0x230   : > { %v1619_v51 = vpop.f32.mrf.mxu1 }
 0x231   : > { %v1676_v61 = vpack.c.bf16 %v1628_v54, %v1625_v48  ;;  %v1620_v28 = vadd.f32 %v8949_v52, %v1619_v51  ;;  %v9107_v59 = vpop.eup %7761 }
 0x232   : > { %10294 = vst [vmem:[#allocation3_spill] sm:$0xff] %v9107_v59  ;;  %v7105_v62 = vpop.f32.mrf.mxu1 }
 0x233   : > { %v9109_v63 = vpop.eup %7763  ;;  %v1675_v0 = vpack.c.bf16 %v1620_v28, %v1617_v50  ;;  %7769 = vtanh.bf16 %v1676_v61  ;;  %v1641_v22 = vadd.f32 %v7105_v62, %v8949_v52 }
 0x234   : > { %10295 = vst [vmem:[#allocation4_spill] sm:$0xff] %v9109_v63  ;;  %v1632_v2 = vpop.f32.mrf.mxu1  ;;  %7157 = vmatprep.mubr.msk.bf16.mxu0 %vm1261_vm2, %v9109_v63 }
 0x235   : > { %7771 = vtanh.bf16 %v1675_v0  ;;  %7158 = vmatmul.mubr.msk.bf16.gmra.mxu0 %vm1261_vm2, %v9107_v59  ;;  %v1633_v57 = vadd.f32 %v8949_v52, %v1632_v2 }
 0x236   : > { %v7106_v41 = vpop.f32.mrf.mxu1 }
 0x237   : > { %v1644_v4 = vadd.f32 %v7106_v41, %v8949_v52 }
 0x238   : > { %v1635_v8 = vpop.f32.mrf.mxu1 }
 0x239   : > { %v1678_v10 = vpack.c.bf16 %v1644_v4, %v1641_v22  ;;  %v1636_v11 = vadd.f32 %v8949_v52, %v1635_v8  ;;  %v9119_v47 = vpop.eup %7765 }
 0x23a   : > { %10296 = vst [vmem:[#allocation5_spill] sm:$0xff] %v9119_v47 }
 0x23b   : > { %v9121_v12 = vpop.eup %7767  ;;  %v1677_v16 = vpack.c.bf16 %v1636_v11, %v1633_v57  ;;  %7773 = vtanh.bf16 %v1678_v10 }
 0x23c   : > { %10297 = vst [vmem:[#allocation6_spill] sm:$0xff] %v9121_v12  ;;  %7161 = vmatprep.mubr.msk.bf16.mxu0 %vm1261_vm2, %v9121_v12 }
 0x23d   : > { %7775 = vtanh.bf16 %v1677_v16  ;;  %7162 = vmatmul.mubr.msk.bf16.gmra.mxu0 %vm1261_vm2, %v9119_v47 }
 0x241   : > { %v9127_v18 = vpop.eup %7769 }
 0x242   : > { %10298 = vst [vmem:[#allocation7_spill] sm:$0xff] %v9127_v18 }
 0x243   : > { %v9129_v19 = vpop.eup %7771 }
 0x244   : > { %10299 = vst [vmem:[#allocation8_spill] sm:$0xff] %v9129_v19  ;;  %7165 = vmatprep.mubr.msk.bf16.mxu0 %vm1261_vm2, %v9129_v19 }
 0x245   : > { %7166 = vmatmul.mubr.msk.bf16.gmra.mxu0 %vm1261_vm2, %v9127_v18 }
 0x249   : > { %v9135_v52 = vpop.eup %7773 }
 0x24a   : > { %10300 = vst [vmem:[#allocation9_spill] sm:$0xff] %v9135_v52 }
 0x24b   : > { %v9137_v20 = vpop.eup %7775 }
 0x24c   : > { %10301 = vst [vmem:[#allocation10_spill] sm:$0xff] %v9137_v20  ;;  %7169 = vmatprep.mubr.msk.bf16.mxu0 %vm1261_vm2, %v9137_v20 }
 0x24d   : > { %7170 = vmatmul.mubr.msk.bf16.gmra.mxu0 %vm1261_vm2, %v9135_v52 }
 0x295   : > { %v7111_v31 = vpop.f32.mrf.mxu0 }
 0x296   : > { %v1865_v36 = vadd.f32 %v7111_v31, %v9158_v34 }
 0x297   : > { %v1856_v33 = vpop.f32.mrf.mxu0 }
 0x298   : > { %v1857_v43 = vadd.f32 %v9158_v34, %v1856_v33 }
 0x299   : > { %v7112_v35 = vpop.f32.mrf.mxu0 }
 0x29a   : > { %v1868_v55 = vadd.f32 %v7112_v35, %v9158_v34 }
 0x29b   : > { %v1859_v37 = vpop.f32.mrf.mxu0 }
 0x29c   : > { %v1860_v46 = vadd.f32 %v9158_v34, %v1859_v37  ;;  %v2112_v38 = vpack.c.bf16 %v1868_v55, %v1865_v36 }
 0x29d   : > { %v7115_v48 = vpop.f32.mrf.mxu0 }
 0x29e   : > { %v2111_v49 = vpack.c.bf16 %v1860_v46, %v1857_v43  ;;  %v1881_v61 = vadd.f32 %v7115_v48, %v9158_v34 }
 0x29f   : > { %v1872_v50 = vpop.f32.mrf.mxu0 }
 0x2a0   : > { %7777 = vtanh.bf16 %v2111_v49  ;;  %v1873_v62 = vadd.f32 %v9158_v34, %v1872_v50 }
 0x2a1   : > { %7779 = vtanh.bf16 %v2112_v38  ;;  %v7116_v54 = vpop.f32.mrf.mxu0 }
 0x2a2   : > { %v1884_v51 = vadd.f32 %v7116_v54, %v9158_v34 }
 0x2a3   : > { %v1875_v28 = vpop.f32.mrf.mxu0 }
 0x2a4   : > { %v1876_v0 = vadd.f32 %v9158_v34, %v1875_v28  ;;  %v2114_v2 = vpack.c.bf16 %v1884_v51, %v1881_v61 }
 0x2a5   : > { %v7119_v22 = vpop.f32.mrf.mxu0 }
 0x2a6   : > { %v2113_v41 = vpack.c.bf16 %v1876_v0, %v1873_v62  ;;  %v1897_v10 = vadd.f32 %v7119_v22, %v9158_v34 }
 0x2a7   : > { %v1888_v57 = vpop.f32.mrf.mxu0 }
 0x2a8   : > { %7781 = vtanh.bf16 %v2113_v41  ;;  %v1889_v16 = vadd.f32 %v9158_v34, %v1888_v57 }
 0x2a9   : > { %7783 = vtanh.bf16 %v2114_v2  ;;  %v7120_v4 = vpop.f32.mrf.mxu0 }
 0x2aa   : > { %v1900_v8 = vadd.f32 %v7120_v4, %v9158_v34 }
 0x2ab   : > { %v1891_v11 = vpop.f32.mrf.mxu0 }
 0x2ac   : > { %v1892_v60 = vadd.f32 %v9158_v34, %v1891_v11  ;;  %v2116_v21 = vpack.c.bf16 %v1900_v8, %v1897_v10 }
 0x2ad   : > { %v7123_v25 = vpop.f32.mrf.mxu0 }
 0x2ae   : > { %v7778_v30 = vpop.eup %7777  ;;  %v2115_v31 = vpack.c.bf16 %v1892_v60, %v1889_v16  ;;  %v1913_v55 = vadd.f32 %v7123_v25, %v9158_v34 }
 0x2af   : > { %v7780_v33 = vpop.eup %7779  ;;  %v1904_v35 = vpop.f32.mrf.mxu0  ;;  %7175 = vmatprep.mubr.msk.bf16.mxu1 %vm1261_vm2, %v7778_v30 }
 0x2b0   : > { %7785 = vtanh.bf16 %v2115_v31  ;;  %7176 = vmatmul.mubr.msk.bf16.vlgmr.msra.gmra.mxu1 %vm1261_vm2, %v7780_v33  ;;  %v1905_v37 = vadd.f32 %v9158_v34, %v1904_v35 }
 0x2b1   : > { %7787 = vtanh.bf16 %v2116_v21  ;;  %v7124_v36 = vpop.f32.mrf.mxu0 }
 0x2b2   : > { %v1916_v43 = vadd.f32 %v7124_v36, %v9158_v34 }
 0x2b3   : > { %v1907_v46 = vpop.f32.mrf.mxu0 }
 0x2b4   : > { %v2118_v38 = vpack.c.bf16 %v1916_v43, %v1913_v55  ;;  %v1908_v48 = vadd.f32 %v9158_v34, %v1907_v46 }
 0x2b5   : > { %v7127_v49 = vpop.f32.mrf.mxu0 }
 0x2b6   : > { %v7782_v50 = vpop.eup %7781  ;;  %v2117_v54 = vpack.c.bf16 %v1908_v48, %v1905_v37  ;;  %7789 = vtanh.bf16 %v2118_v38  ;;  %v1929_v28 = vadd.f32 %v7127_v49, %v9158_v34 }
 0x2b7   : > { %v7784_v51 = vpop.eup %7783  ;;  %7179 = vmatprep.mubr.msk.bf16.mxu1 %vm1261_vm2, %v7782_v50  ;;  %v1920_v61 = vpop.f32.mrf.mxu0 }
 0x2b8   : > { %7791 = vtanh.bf16 %v2117_v54  ;;  %7180 = vmatmul.mubr.msk.bf16.gmra.mxu1 %vm1261_vm2, %v7784_v51  ;;  %v1921_v0 = vadd.f32 %v9158_v34, %v1920_v61 }
 0x2b9   : > { %v7128_v62 = vpop.f32.mrf.mxu0 }
 0x2ba   : > { %v1932_v2 = vadd.f32 %v7128_v62, %v9158_v34 }
 0x2bb   : > { %v1923_v22 = vpop.f32.mrf.mxu0 }
 0x2bc   : > { %v2120_v41 = vpack.c.bf16 %v1932_v2, %v1929_v28  ;;  %v1924_v57 = vadd.f32 %v9158_v34, %v1923_v22 }
 0x2bd   : > { %v7131_v4 = vpop.f32.mrf.mxu0 }
 0x2be   : > { %v7786_v8 = vpop.eup %7785  ;;  %v2119_v10 = vpack.c.bf16 %v1924_v57, %v1921_v0  ;;  %7793 = vtanh.bf16 %v2120_v41  ;;  %v1945_v60 = vadd.f32 %v7131_v4, %v9158_v34 }
 0x2bf   : > { %v7788_v11 = vpop.eup %7787  ;;  %7183 = vmatprep.mubr.msk.bf16.mxu1 %vm1261_vm2, %v7786_v8  ;;  %v1936_v16 = vpop.f32.mrf.mxu0 }
 0x2c0   : > { %7795 = vtanh.bf16 %v2119_v10  ;;  %7184 = vmatmul.mubr.msk.bf16.gmra.mxu1 %vm1261_vm2, %v7788_v11  ;;  %v1937_v25 = vadd.f32 %v9158_v34, %v1936_v16 }
 0x2c1   : > { %v7132_v21 = vpop.f32.mrf.mxu0 }
 0x2c2   : > { %v1948_v30 = vadd.f32 %v7132_v21, %v9158_v34 }
 0x2c3   : > { %v1939_v31 = vpop.f32.mrf.mxu0 }
 0x2c4   : > { %v2122_v33 = vpack.c.bf16 %v1948_v30, %v1945_v60  ;;  %v1940_v35 = vadd.f32 %v9158_v34, %v1939_v31  ;;  %v7790_v55 = vpop.eup %7789 }
 0x2c5   : > { %v7135_v36 = vpop.f32.mrf.mxu0 }
 0x2c6   : > { %v7792_v37 = vpop.eup %7791  ;;  %v2121_v43 = vpack.c.bf16 %v1940_v35, %v1937_v25  ;;  %7797 = vtanh.bf16 %v2122_v33  ;;  %v1961_v38 = vadd.f32 %v7135_v36, %v9158_v34 }
 0x2c7   : > { %7187 = vmatprep.mubr.msk.bf16.mxu1 %vm1261_vm2, %v7792_v37  ;;  %v1952_v46 = vpop.f32.mrf.mxu0 }
 0x2c8   : > { %7188 = vmatmul.mubr.msk.bf16.gmra.mxu1 %vm1261_vm2, %v7790_v55  ;;  %7799 = vtanh.bf16 %v2121_v43  ;;  %v1953_v49 = vadd.f32 %v9158_v34, %v1952_v46 }
 0x2c9   : > { %v7136_v48 = vpop.f32.mrf.mxu0 }
 0x2ca   : > { %v1964_v50 = vadd.f32 %v7136_v48, %v9158_v34 }
 0x2cb   : > { %v1955_v54 = vpop.f32.mrf.mxu0 }
 0x2cc   : > { %v2124_v51 = vpack.c.bf16 %v1964_v50, %v1961_v38  ;;  %v1956_v61 = vadd.f32 %v9158_v34, %v1955_v54  ;;  %v7794_v28 = vpop.eup %7793 }
 0x2cd   : > { %v7139_v62 = vpop.f32.mrf.mxu0 }
 0x2ce   : > { %v7796_v0 = vpop.eup %7795  ;;  %v2123_v2 = vpack.c.bf16 %v1956_v61, %v1953_v49  ;;  %7801 = vtanh.bf16 %v2124_v51  ;;  %v1977_v41 = vadd.f32 %v7139_v62, %v9158_v34 }
 0x2cf   : > { %7191 = vmatprep.mubr.msk.bf16.mxu1 %vm1261_vm2, %v7796_v0  ;;  %v1968_v22 = vpop.f32.mrf.mxu0 }
 0x2d0   : > { %7192 = vmatmul.mubr.msk.bf16.gmra.mxu1 %vm1261_vm2, %v7794_v28  ;;  %7803 = vtanh.bf16 %v2123_v2  ;;  %v1969_v4 = vadd.f32 %v9158_v34, %v1968_v22 }
 0x2d1   : > { %v7140_v57 = vpop.f32.mrf.mxu0 }
 0x2d2   : > { %v1980_v8 = vadd.f32 %v7140_v57, %v9158_v34 }
 0x2d3   : > { %v1971_v10 = vpop.f32.mrf.mxu0 }
 0x2d4   : > { %v2126_v11 = vpack.c.bf16 %v1980_v8, %v1977_v41  ;;  %v1972_v16 = vadd.f32 %v9158_v34, %v1971_v10  ;;  %v7798_v60 = vpop.eup %7797 }
 0x2d5   : > { %v7143_v21 = vpop.f32.mrf.mxu0 }
 0x2d6   : > { %v7800_v25 = vpop.eup %7799  ;;  %v2125_v30 = vpack.c.bf16 %v1972_v16, %v1969_v4  ;;  %7805 = vtanh.bf16 %v2126_v11  ;;  %v1993_v33 = vadd.f32 %v7143_v21, %v9158_v34 }
 0x2d7   : > { %7195 = vmatprep.mubr.msk.bf16.mxu1 %vm1261_vm2, %v7800_v25  ;;  %v1984_v31 = vpop.f32.mrf.mxu0 }
 0x2d8   : > { %7196 = vmatmul.mubr.msk.bf16.gmra.mxu1 %vm1261_vm2, %v7798_v60  ;;  %7807 = vtanh.bf16 %v2125_v30  ;;  %v1985_v55 = vadd.f32 %v9158_v34, %v1984_v31 }
 0x2d9   : > { %v7144_v35 = vpop.f32.mrf.mxu0 }
 0x2da   : > { %v1996_v36 = vadd.f32 %v7144_v35, %v9158_v34 }
 0x2db   : > { %v1987_v37 = vpop.f32.mrf.mxu0 }
 0x2dc   : > { %v2128_v43 = vpack.c.bf16 %v1996_v36, %v1993_v33  ;;  %v1988_v46 = vadd.f32 %v9158_v34, %v1987_v37  ;;  %v7802_v38 = vpop.eup %7801 }
 0x2dd   : > { %v7147_v48 = vpop.f32.mrf.mxu0 }
 0x2de   : > { %v7804_v49 = vpop.eup %7803  ;;  %v2127_v50 = vpack.c.bf16 %v1988_v46, %v1985_v55  ;;  %7809 = vtanh.bf16 %v2128_v43  ;;  %v2009_v51 = vadd.f32 %v7147_v48, %v9158_v34 }
 0x2df   : > { %7199 = vmatprep.mubr.msk.bf16.mxu1 %vm1261_vm2, %v7804_v49  ;;  %v2000_v54 = vpop.f32.mrf.mxu0 }
 0x2e0   : > { %7200 = vmatmul.mubr.msk.bf16.gmra.mxu1 %vm1261_vm2, %v7802_v38  ;;  %7811 = vtanh.bf16 %v2127_v50  ;;  %v2001_v28 = vadd.f32 %v9158_v34, %v2000_v54 }
 0x2e1   : > { %v7148_v61 = vpop.f32.mrf.mxu0 }
 0x2e2   : > { %v2012_v62 = vadd.f32 %v7148_v61, %v9158_v34 }
 0x2e3   : > { %v2003_v0 = vpop.f32.mrf.mxu0 }
 0x2e4   : > { %v2130_v2 = vpack.c.bf16 %v2012_v62, %v2009_v51  ;;  %v2004_v22 = vadd.f32 %v9158_v34, %v2003_v0  ;;  %v7806_v41 = vpop.eup %7805 }
 0x2e5   : > { %v7151_v57 = vpop.f32.mrf.mxu0 }
 0x2e6   : > { %v7808_v4 = vpop.eup %7807  ;;  %v2129_v8 = vpack.c.bf16 %v2004_v22, %v2001_v28  ;;  %7813 = vtanh.bf16 %v2130_v2  ;;  %v2025_v11 = vadd.f32 %v7151_v57, %v9158_v34 }
 0x2e7   : > { %7203 = vmatprep.mubr.msk.bf16.mxu1 %vm1261_vm2, %v7808_v4  ;;  %v2016_v10 = vpop.f32.mrf.mxu0 }
 0x2e8   : > { %7204 = vmatmul.mubr.msk.bf16.gmra.mxu1 %vm1261_vm2, %v7806_v41  ;;  %7815 = vtanh.bf16 %v2129_v8  ;;  %v2017_v60 = vadd.f32 %v9158_v34, %v2016_v10 }
 0x2e9   : > { %v7152_v16 = vpop.f32.mrf.mxu0 }
 0x2ea   : > { %v2028_v21 = vadd.f32 %v7152_v16, %v9158_v34 }
 0x2eb   : > { %v2019_v25 = vpop.f32.mrf.mxu0 }
 0x2ec   : > { %v2132_v30 = vpack.c.bf16 %v2028_v21, %v2025_v11  ;;  %v2020_v31 = vadd.f32 %v9158_v34, %v2019_v25  ;;  %v7810_v33 = vpop.eup %7809 }
 0x2ed   : > { %v7155_v35 = vpop.f32.mrf.mxu0 }
 0x2ee   : > { %v7812_v55 = vpop.eup %7811  ;;  %v2131_v36 = vpack.c.bf16 %v2020_v31, %v2017_v60  ;;  %7817 = vtanh.bf16 %v2132_v30  ;;  %v2041_v43 = vadd.f32 %v7155_v35, %v9158_v34 }
 0x2ef   : > { %7207 = vmatprep.mubr.msk.bf16.mxu1 %vm1261_vm2, %v7812_v55  ;;  %v2032_v37 = vpop.f32.mrf.mxu0 }
 0x2f0   : > { %7208 = vmatmul.mubr.msk.bf16.gmra.mxu1 %vm1261_vm2, %v7810_v33  ;;  %7819 = vtanh.bf16 %v2131_v36  ;;  %v2033_v38 = vadd.f32 %v9158_v34, %v2032_v37 }
 0x2f1   : > { %v7156_v46 = vpop.f32.mrf.mxu0 }
 0x2f2   : > { %v2044_v48 = vadd.f32 %v7156_v46, %v9158_v34 }
 0x2f3   : > { %v2035_v49 = vpop.f32.mrf.mxu0 }
 0x2f4   : > { %v2134_v50 = vpack.c.bf16 %v2044_v48, %v2041_v43  ;;  %v2036_v54 = vadd.f32 %v9158_v34, %v2035_v49  ;;  %v7814_v51 = vpop.eup %7813 }
 0x2f5   : > { %v7159_v61 = vpop.f32.mrf.mxu0 }
 0x2f6   : > { %v7816_v28 = vpop.eup %7815  ;;  %v2133_v62 = vpack.c.bf16 %v2036_v54, %v2033_v38  ;;  %7821 = vtanh.bf16 %v2134_v50  ;;  %v2057_v2 = vadd.f32 %v7159_v61, %v9158_v34 }
 0x2f7   : > { %7211 = vmatprep.mubr.msk.bf16.mxu1 %vm1261_vm2, %v7816_v28  ;;  %v2048_v0 = vpop.f32.mrf.mxu0 }
 0x2f8   : > { %7212 = vmatmul.mubr.msk.bf16.gmra.mxu1 %vm1261_vm2, %v7814_v51  ;;  %7823 = vtanh.bf16 %v2133_v62  ;;  %v2049_v41 = vadd.f32 %v9158_v34, %v2048_v0  ;;  %v8554_v51 = vmov 0  }
 0x2f9   : > { %v7160_v22 = vpop.f32.mrf.mxu0  ;;  %2804 = vmatprep.mubr.bf16.mxu0 %v8554_v51 }
 0x2fa   : > { %v2060_v57 = vadd.f32 %v7160_v22, %v9158_v34 }
 0x2fb   : > { %v2051_v4 = vpop.f32.mrf.mxu0 }
 0x2fc   : > { %v2136_v8 = vpack.c.bf16 %v2060_v57, %v2057_v2  ;;  %v2052_v10 = vadd.f32 %v9158_v34, %v2051_v4  ;;  %v7818_v11 = vpop.eup %7817 }
 0x2fd   : > { %v7163_v16 = vpop.f32.mrf.mxu0 }
 0x2fe   : > { %v7820_v60 = vpop.eup %7819  ;;  %v2135_v21 = vpack.c.bf16 %v2052_v10, %v2049_v41  ;;  %7825 = vtanh.bf16 %v2136_v8  ;;  %v2073_v30 = vadd.f32 %v7163_v16, %v9158_v34 }
 0x2ff   : > { %7215 = vmatprep.mubr.msk.bf16.mxu1 %vm1261_vm2, %v7820_v60  ;;  %v2064_v25 = vpop.f32.mrf.mxu0 }
 0x300   : > { %7216 = vmatmul.mubr.msk.bf16.gmra.mxu1 %vm1261_vm2, %v7818_v11  ;;  %7827 = vtanh.bf16 %v2135_v21  ;;  %v2065_v33 = vadd.f32 %v9158_v34, %v2064_v25 }
 0x301   : > { %v7164_v31 = vpop.f32.mrf.mxu0 }
 0x302   : > { %v2076_v35 = vadd.f32 %v7164_v31, %v9158_v34 }
 0x303   : > { %v2067_v55 = vpop.f32.mrf.mxu0 }
 0x304   : > { %v2138_v36 = vpack.c.bf16 %v2076_v35, %v2073_v30  ;;  %v2068_v37 = vadd.f32 %v9158_v34, %v2067_v55  ;;  %v7822_v43 = vpop.eup %7821 }
 0x305   : > { %v7167_v46 = vpop.f32.mrf.mxu0 }
 0x306   : > { %v7824_v38 = vpop.eup %7823  ;;  %v2137_v48 = vpack.c.bf16 %v2068_v37, %v2065_v33  ;;  %7829 = vtanh.bf16 %v2138_v36  ;;  %v2089_v50 = vadd.f32 %v7167_v46, %v9158_v34 }
 0x307   : > { %7219 = vmatprep.mubr.msk.bf16.mxu1 %vm1261_vm2, %v7824_v38  ;;  %v2080_v49 = vpop.f32.mrf.mxu0 }
 0x308   : > { %7831 = vtanh.bf16 %v2137_v48  ;;  %7220 = vmatmul.mubr.msk.bf16.gmra.mxu1 %vm1261_vm2, %v7822_v43  ;;  %v2081_v61 = vadd.f32 %v9158_v34, %v2080_v49  ;;  %v9260_v48 = vld [vmem:[%s10253_s8] ss:$0 sm:$0xff] }
 0x309   : > { %v7168_v54 = vpop.f32.mrf.mxu0 }
 0x30a   : > { %v2092_v28 = vadd.f32 %v7168_v54, %v9158_v34 }
 0x30b   : > { %v2083_v62 = vpop.f32.mrf.mxu0 }
 0x30c   : > { %v2140_v0 = vpack.c.bf16 %v2092_v28, %v2089_v50  ;;  %v2084_v2 = vadd.f32 %v9158_v34, %v2083_v62  ;;  %v7826_v22 = vpop.eup %7825 }
 0x30d   : > { %v7171_v41 = vpop.f32.mrf.mxu0 }
 0x30e   : > { %v7828_v57 = vpop.eup %7827  ;;  %v2139_v4 = vpack.c.bf16 %v2084_v2, %v2081_v61  ;;  %7833 = vtanh.bf16 %v2140_v0  ;;  %v2105_v10 = vadd.f32 %v7171_v41, %v9158_v34 }
 0x30f   : > { %v2096_v8 = vpop.f32.mrf.mxu0  ;;  %7223 = vmatprep.mubr.msk.bf16.mxu1 %vm1261_vm2, %v7828_v57 }
 0x310   : > { %7835 = vtanh.bf16 %v2139_v4  ;;  %7224 = vmatmul.mubr.msk.bf16.gmra.mxu1 %vm1261_vm2, %v7826_v22  ;;  %v2097_v16 = vadd.f32 %v9158_v34, %v2096_v8 }
 0x311   : > { %v7172_v11 = vpop.f32.mrf.mxu0 }
 0x312   : > { %v2108_v60 = vadd.f32 %v7172_v11, %v9158_v34 }
 0x313   : > { %v2099_v21 = vpop.f32.mrf.mxu0 }
 0x314   : > { %v2142_v25 = vpack.c.bf16 %v2108_v60, %v2105_v10  ;;  %v2100_v30 = vadd.f32 %v9158_v34, %v2099_v21  ;;  %v7830_v31 = vpop.eup %7829 }
 0x316   : > { %v7832_v33 = vpop.eup %7831  ;;  %v2141_v35 = vpack.c.bf16 %v2100_v30, %v2097_v16  ;;  %7837 = vtanh.bf16 %v2142_v25 }
 0x317   : > { %7227 = vmatprep.mubr.msk.bf16.mxu1 %vm1261_vm2, %v7832_v33 }
 0x318   : > { %7839 = vtanh.bf16 %v2141_v35  ;;  %7228 = vmatmul.mubr.msk.bf16.gmra.mxu1 %vm1261_vm2, %v7830_v31 }
 0x31c   : > { %v7834_v55 = vpop.eup %7833 }
 0x31e   : > { %v7836_v36 = vpop.eup %7835 }
 0x31f   : > { %7231 = vmatprep.mubr.msk.bf16.mxu1 %vm1261_vm2, %v7836_v36 }
 0x320   : > { %7232 = vmatmul.mubr.msk.bf16.gmra.mxu1 %vm1261_vm2, %v7834_v55 }
 0x324   : > { %v7838_v37 = vpop.eup %7837 }
 0x326   : > { %v7840_v43 = vpop.eup %7839 }
 0x327   : > { %7235 = vmatprep.mubr.msk.bf16.mxu1 %vm1261_vm2, %v7840_v43 }
 0x328   : > { %7236 = vmatmul.mubr.msk.bf16.gmra.mxu1 %vm1261_vm2, %v7838_v37 }
 0x370   : > { %v7177_v34 = vpop.f32.mrf.mxu1 }
 0x371   : > { %v2329_v22 = vadd.f32 %v7177_v34, %v9260_v48 }
 0x372   : > { %v2320_v46 = vpop.f32.mrf.mxu1 }
 0x373   : > { %v2321_v50 = vadd.f32 %v9260_v48, %v2320_v46 }
 0x374   : > { %v7178_v38 = vpop.f32.mrf.mxu1 }
 0x375   : > { %v2332_v0 = vadd.f32 %v7178_v38, %v9260_v48 }
 0x376   : > { %v2323_v49 = vpop.f32.mrf.mxu1 }
 0x377   : > { %v2324_v54 = vadd.f32 %v9260_v48, %v2323_v49  ;;  %v2576_v41 = vpack.c.bf16 %v2332_v0, %v2329_v22 }
 0x378   : > { %v7181_v61 = vpop.f32.mrf.mxu1 }
 0x379   : > { %v2575_v28 = vpack.c.bf16 %v2324_v54, %v2321_v50  ;;  %v2345_v30 = vadd.f32 %v7181_v61, %v9260_v48 }
 0x37a   : > { %v2336_v62 = vpop.f32.mrf.mxu1 }
 0x37b   : > { %7841 = vtanh.bf16 %v2575_v28  ;;  %v2337_v10 = vadd.f32 %v9260_v48, %v2336_v62 }
 0x37c   : > { %v7182_v2 = vpop.f32.mrf.mxu1  ;;  %7843 = vtanh.bf16 %v2576_v41 }
 0x37d   : > { %v2348_v21 = vadd.f32 %v7182_v2, %v9260_v48 }
 0x37e   : > { %v2339_v57 = vpop.f32.mrf.mxu1 }
 0x37f   : > { %v2340_v4 = vadd.f32 %v9260_v48, %v2339_v57  ;;  %v2578_v31 = vpack.c.bf16 %v2348_v21, %v2345_v30 }
 0x380   : > { %v7185_v8 = vpop.f32.mrf.mxu1 }
 0x381   : > { %v2577_v11 = vpack.c.bf16 %v2340_v4, %v2337_v10  ;;  %v2361_v50 = vadd.f32 %v7185_v8, %v9260_v48 }
 0x382   : > { %v2352_v16 = vpop.f32.mrf.mxu1 }
 0x383   : > { %7845 = vtanh.bf16 %v2577_v11  ;;  %v2353_v37 = vadd.f32 %v9260_v48, %v2352_v16 }
 0x384   : > { %v7186_v25 = vpop.f32.mrf.mxu1  ;;  %7847 = vtanh.bf16 %v2578_v31 }
 0x385   : > { %v2364_v38 = vadd.f32 %v7186_v25, %v9260_v48 }
 0x386   : > { %v2355_v33 = vpop.f32.mrf.mxu1 }
 0x387   : > { %v2356_v55 = vadd.f32 %v9260_v48, %v2355_v33  ;;  %v2580_v54 = vpack.c.bf16 %v2364_v38, %v2361_v50 }
 0x388   : > { %v7189_v36 = vpop.f32.mrf.mxu1 }
 0x389   : > { %v7842_v60 = vpop.eup %7841  ;;  %v2579_v43 = vpack.c.bf16 %v2356_v55, %v2353_v37  ;;  %v2377_v4 = vadd.f32 %v7189_v36, %v9260_v48 }
 0x38a   : > { %6444 = vmatmul.mubr.msk.bf16.vlgmr.msra.gmra.mxu0 %vm2675_vm3, %v7842_v60  ;;  %v7844_v35 = vpop.eup %7843  ;;  %v2368_v34 = vpop.f32.mrf.mxu1 }
 0x38b   : > { %2814 = vmatprep.mubr.bf16.mxu0 %v8554_v51  ;;  %7849 = vtanh.bf16 %v2579_v43  ;;  %v2369_v2 = vadd.f32 %v9260_v48, %v2368_v34 }
 0x38c   : > { %v7190_v49 = vpop.f32.mrf.mxu1  ;;  %7851 = vtanh.bf16 %v2580_v54 }
 0x38d   : > { %v2380_v8 = vadd.f32 %v7190_v49, %v9260_v48 }
 0x38e   : > { %v2371_v61 = vpop.f32.mrf.mxu1 }
 0x38f   : > { %v2372_v62 = vadd.f32 %v9260_v48, %v2371_v61  ;;  %v2582_v11 = vpack.c.bf16 %v2380_v8, %v2377_v4 }
 0x390   : > { %v7193_v0 = vpop.f32.mrf.mxu1 }
 0x391   : > { %v7846_v46 = vpop.eup %7845  ;;  %v2581_v22 = vpack.c.bf16 %v2372_v62, %v2369_v2  ;;  %v2393_v55 = vadd.f32 %v7193_v0, %v9260_v48 }
 0x392   : > { %6445 = vmatmul.mubr.msk.bf16.gmra.mxu0 %vm2675_vm3, %v7844_v35  ;;  %v7848_v28 = vpop.eup %7847  ;;  %v2384_v41 = vpop.f32.mrf.mxu1 }
 0x393   : > { %2824 = vmatprep.mubr.bf16.mxu0 %v8554_v51  ;;  %7853 = vtanh.bf16 %v2581_v22  ;;  %v2385_v21 = vadd.f32 %v9260_v48, %v2384_v41 }
 0x394   : > { %v7194_v10 = vpop.f32.mrf.mxu1  ;;  %7855 = vtanh.bf16 %v2582_v11 }
 0x395   : > { %v2396_v36 = vadd.f32 %v7194_v10, %v9260_v48 }
 0x396   : > { %v2387_v16 = vpop.f32.mrf.mxu1 }
 0x397   : > { %v2388_v25 = vadd.f32 %v9260_v48, %v2387_v16  ;;  %v2584_v43 = vpack.c.bf16 %v2396_v36, %v2393_v55 }
 0x398   : > { %v7197_v30 = vpop.f32.mrf.mxu1 }
 0x399   : > { %v7850_v57 = vpop.eup %7849  ;;  %v2583_v31 = vpack.c.bf16 %v2388_v25, %v2385_v21  ;;  %v2409_v62 = vadd.f32 %v7197_v30, %v9260_v48 }
 0x39a   : > { %6446 = vmatmul.mubr.msk.bf16.gmra.mxu0 %vm2675_vm3, %v7846_v46  ;;  %v7852_v60 = vpop.eup %7851  ;;  %v2400_v33 = vpop.f32.mrf.mxu1 }
 0x39b   : > { %2834 = vmatprep.mubr.bf16.mxu0 %v8554_v51  ;;  %7857 = vtanh.bf16 %v2583_v31  ;;  %v2401_v38 = vadd.f32 %v9260_v48, %v2400_v33 }
 0x39c   : > { %v7198_v37 = vpop.f32.mrf.mxu1  ;;  %7859 = vtanh.bf16 %v2584_v43 }
 0x39d   : > { %v2412_v0 = vadd.f32 %v7198_v37, %v9260_v48 }
 0x39e   : > { %v2403_v34 = vpop.f32.mrf.mxu1 }
 0x39f   : > { %v2404_v49 = vadd.f32 %v9260_v48, %v2403_v34  ;;  %v2586_v22 = vpack.c.bf16 %v2412_v0, %v2409_v62 }
 0x3a0   : > { %v7201_v50 = vpop.f32.mrf.mxu1 }
 0x3a1   : > { %v7854_v35 = vpop.eup %7853  ;;  %v2585_v54 = vpack.c.bf16 %v2404_v49, %v2401_v38  ;;  %v2425_v21 = vadd.f32 %v7201_v50, %v9260_v48 }
 0x3a2   : > { %6447 = vmatmul.mubr.msk.bf16.gmra.mxu0 %vm2675_vm3, %v7848_v28  ;;  %v7856_v46 = vpop.eup %7855  ;;  %v2416_v61 = vpop.f32.mrf.mxu1 }
 0x3a3   : > { %2844 = vmatprep.mubr.bf16.mxu0 %v8554_v51  ;;  %7861 = vtanh.bf16 %v2585_v54  ;;  %v2417_v4 = vadd.f32 %v9260_v48, %v2416_v61 }
 0x3a4   : > { %v7202_v2 = vpop.f32.mrf.mxu1  ;;  %7863 = vtanh.bf16 %v2586_v22 }
 0x3a5   : > { %v2428_v25 = vadd.f32 %v7202_v2, %v9260_v48 }
 0x3a6   : > { %v2419_v41 = vpop.f32.mrf.mxu1 }
 0x3a7   : > { %v2420_v8 = vadd.f32 %v9260_v48, %v2419_v41  ;;  %v2588_v31 = vpack.c.bf16 %v2428_v25, %v2425_v21 }
 0x3a8   : > { %v7205_v10 = vpop.f32.mrf.mxu1 }
 0x3a9   : > { %v7858_v28 = vpop.eup %7857  ;;  %v2587_v11 = vpack.c.bf16 %v2420_v8, %v2417_v4  ;;  %v2441_v38 = vadd.f32 %v7205_v10, %v9260_v48 }
 0x3aa   : > { %6448 = vmatmul.mubr.msk.bf16.gmra.mxu0 %vm2675_vm3, %v7850_v57  ;;  %v7860_v57 = vpop.eup %7859  ;;  %v2432_v16 = vpop.f32.mrf.mxu1 }
 0x3ab   : > { %2854 = vmatprep.mubr.bf16.mxu0 %v8554_v51  ;;  %7865 = vtanh.bf16 %v2587_v11  ;;  %v2433_v55 = vadd.f32 %v9260_v48, %v2432_v16 }
 0x3ac   : > { %v7206_v30 = vpop.f32.mrf.mxu1  ;;  %7867 = vtanh.bf16 %v2588_v31 }
 0x3ad   : > { %v2444_v49 = vadd.f32 %v7206_v30, %v9260_v48 }
 0x3ae   : > { %v2435_v33 = vpop.f32.mrf.mxu1 }
 0x3af   : > { %v2436_v36 = vadd.f32 %v9260_v48, %v2435_v33  ;;  %v2590_v54 = vpack.c.bf16 %v2444_v49, %v2441_v38 }
 0x3b0   : > { %v7209_v37 = vpop.f32.mrf.mxu1 }
 0x3b1   : > { %v2589_v43 = vpack.c.bf16 %v2436_v36, %v2433_v55  ;;  %v2457_v4 = vadd.f32 %v7209_v37, %v9260_v48 }
 0x3b2   : > { %6449 = vmatmul.mubr.msk.bf16.gmra.mxu0 %vm2675_vm3, %v7852_v60  ;;  %v7862_v60 = vpop.eup %7861  ;;  %v2448_v34 = vpop.f32.mrf.mxu1 }
 0x3b3   : > { %2864 = vmatprep.mubr.bf16.mxu0 %v8554_v51  ;;  %7869 = vtanh.bf16 %v2589_v43  ;;  %v2449_v62 = vadd.f32 %v9260_v48, %v2448_v34 }
 0x3b4   : > { %v7210_v50 = vpop.f32.mrf.mxu1  ;;  %7871 = vtanh.bf16 %v2590_v54 }
 0x3b5   : > { %v2460_v8 = vadd.f32 %v7210_v50, %v9260_v48 }
 0x3b6   : > { %v2451_v61 = vpop.f32.mrf.mxu1 }
 0x3b7   : > { %v2452_v0 = vadd.f32 %v9260_v48, %v2451_v61  ;;  %v2592_v11 = vpack.c.bf16 %v2460_v8, %v2457_v4 }
 0x3b8   : > { %v7213_v2 = vpop.f32.mrf.mxu1 }
 0x3b9   : > { %v2591_v22 = vpack.c.bf16 %v2452_v0, %v2449_v62  ;;  %v2473_v55 = vadd.f32 %v7213_v2, %v9260_v48 }
 0x3ba   : > { %6450 = vmatmul.mubr.msk.bf16.gmra.mxu0 %vm2675_vm3, %v7854_v35  ;;  %v7864_v35 = vpop.eup %7863  ;;  %v2464_v41 = vpop.f32.mrf.mxu1 }
 0x3bb   : > { %2874 = vmatprep.mubr.bf16.mxu0 %v8554_v51  ;;  %7873 = vtanh.bf16 %v2591_v22  ;;  %v2465_v21 = vadd.f32 %v9260_v48, %v2464_v41 }
 0x3bc   : > { %v7214_v10 = vpop.f32.mrf.mxu1  ;;  %7875 = vtanh.bf16 %v2592_v11 }
 0x3bd   : > { %v2476_v36 = vadd.f32 %v7214_v10, %v9260_v48 }
 0x3be   : > { %v2467_v16 = vpop.f32.mrf.mxu1 }
 0x3bf   : > { %v2468_v25 = vadd.f32 %v9260_v48, %v2467_v16  ;;  %v2594_v43 = vpack.c.bf16 %v2476_v36, %v2473_v55 }
 0x3c0   : > { %v7217_v30 = vpop.f32.mrf.mxu1 }
 0x3c1   : > { %v2593_v31 = vpack.c.bf16 %v2468_v25, %v2465_v21  ;;  %v2489_v62 = vadd.f32 %v7217_v30, %v9260_v48 }
 0x3c2   : > { %6451 = vmatmul.mubr.msk.bf16.gmra.mxu0 %vm2675_vm3, %v7856_v46  ;;  %v7866_v46 = vpop.eup %7865  ;;  %v2480_v33 = vpop.f32.mrf.mxu1 }
 0x3c3   : > { %2884 = vmatprep.mubr.bf16.mxu0 %v8554_v51  ;;  %7877 = vtanh.bf16 %v2593_v31  ;;  %v2481_v38 = vadd.f32 %v9260_v48, %v2480_v33 }
 0x3c4   : > { %v7218_v37 = vpop.f32.mrf.mxu1  ;;  %7879 = vtanh.bf16 %v2594_v43 }
 0x3c5   : > { %v2492_v0 = vadd.f32 %v7218_v37, %v9260_v48 }
 0x3c6   : > { %v2483_v34 = vpop.f32.mrf.mxu1 }
 0x3c7   : > { %v2484_v49 = vadd.f32 %v9260_v48, %v2483_v34  ;;  %v2596_v22 = vpack.c.bf16 %v2492_v0, %v2489_v62 }
 0x3c8   : > { %v7221_v50 = vpop.f32.mrf.mxu1 }
 0x3c9   : > { %v2595_v54 = vpack.c.bf16 %v2484_v49, %v2481_v38  ;;  %v2505_v25 = vadd.f32 %v7221_v50, %v9260_v48 }
 0x3ca   : > { %6452 = vmatmul.mubr.msk.bf16.gmra.mxu0 %vm2675_vm3, %v7858_v28  ;;  %v7868_v28 = vpop.eup %7867  ;;  %v2496_v61 = vpop.f32.mrf.mxu1 }
 0x3cb   : > { %2894 = vmatprep.mubr.bf16.mxu0 %v8554_v51  ;;  %7881 = vtanh.bf16 %v2595_v54  ;;  %v2497_v8 = vadd.f32 %v9260_v48, %v2496_v61 }
 0x3cc   : > { %v7222_v2 = vpop.f32.mrf.mxu1  ;;  %7883 = vtanh.bf16 %v2596_v22 }
 0x3cd   : > { %v2508_v30 = vadd.f32 %v7222_v2, %v9260_v48 }
 0x3ce   : > { %v2499_v41 = vpop.f32.mrf.mxu1 }
 0x3cf   : > { %v2500_v10 = vadd.f32 %v9260_v48, %v2499_v41  ;;  %v2598_v33 = vpack.c.bf16 %v2508_v30, %v2505_v25 }
 0x3d0   : > { %v7225_v4 = vpop.f32.mrf.mxu1 }
 0x3d1   : > { %v2597_v16 = vpack.c.bf16 %v2500_v10, %v2497_v8  ;;  %v2521_v49 = vadd.f32 %v7225_v4, %v9260_v48  ;;  %v2643_v10 = vld [vmem:[%s10255_s10] sm:$0x3] }
 0x3d2   : > { %6453 = vmatmul.mubr.msk.bf16.gmra.mxu0 %vm2675_vm3, %v7860_v57  ;;  %v7870_v57 = vpop.eup %7869  ;;  %v2512_v11 = vpop.f32.mrf.mxu1 }
 0x3d3   : > { %2904 = vmatprep.mubr.bf16.mxu0 %v8554_v51  ;;  %7885 = vtanh.bf16 %v2597_v16  ;;  %v2513_v36 = vadd.f32 %v9260_v48, %v2512_v11 }
 0x3d4   : > { %v7226_v21 = vpop.f32.mrf.mxu1  ;;  %7887 = vtanh.bf16 %v2598_v33 }
 0x3d5   : > { %v2524_v50 = vadd.f32 %v7226_v21, %v9260_v48 }
 0x3d6   : > { %v2515_v31 = vpop.f32.mrf.mxu1 }
 0x3d7   : > { %v2516_v37 = vadd.f32 %v9260_v48, %v2515_v31  ;;  %v2600_v61 = vpack.c.bf16 %v2524_v50, %v2521_v49 }
 0x3d8   : > { %v7229_v55 = vpop.f32.mrf.mxu1 }
 0x3d9   : > { %v2599_v34 = vpack.c.bf16 %v2516_v37, %v2513_v36  ;;  %v2537_v25 = vadd.f32 %v7229_v55, %v9260_v48 }
 0x3da   : > { %6454 = vmatmul.mubr.msk.bf16.gmra.mxu0 %vm2675_vm3, %v7862_v60  ;;  %v7872_v60 = vpop.eup %7871  ;;  %v2528_v43 = vpop.f32.mrf.mxu1 }
 0x3db   : > { %2914 = vmatprep.mubr.bf16.mxu0 %v8554_v51  ;;  %7889 = vtanh.bf16 %v2599_v34  ;;  %v2529_v2 = vadd.f32 %v9260_v48, %v2528_v43 }
 0x3dc   : > { %v7230_v38 = vpop.f32.mrf.mxu1  ;;  %7891 = vtanh.bf16 %v2600_v61 }
 0x3dd   : > { %v2540_v30 = vadd.f32 %v7230_v38, %v9260_v48 }
 0x3de   : > { %v2531_v54 = vpop.f32.mrf.mxu1 }
 0x3df   : > { %v2532_v22 = vadd.f32 %v9260_v48, %v2531_v54  ;;  %v2602_v43 = vpack.c.bf16 %v2540_v30, %v2537_v25 }
 0x3e0   : > { %v7233_v0 = vpop.f32.mrf.mxu1 }
 0x3e1   : > { %v2601_v4 = vpack.c.bf16 %v2532_v22, %v2529_v2 }
 0x3e2   : > { %6455 = vmatmul.mubr.msk.bf16.gmra.mxu0 %vm2675_vm3, %v7864_v35  ;;  %v7874_v35 = vpop.eup %7873 }
 0x3e3   : > { %2924 = vmatprep.mubr.bf16.mxu0 %v8554_v51  ;;  %7893 = vtanh.bf16 %v2601_v4 }
 0x3e4   : > { %7895 = vtanh.bf16 %v2602_v43  ;;  %v2553_v43 = vadd.f32 %v7233_v0, %v9260_v48 }
 0x3ea   : > { %6456 = vmatmul.mubr.msk.bf16.gmra.mxu0 %vm2675_vm3, %v7866_v46  ;;  %v7876_v46 = vpop.eup %7875 }
 0x3eb   : > { %2934 = vmatprep.mubr.bf16.mxu0 %v8554_v51 }
 0x3f2   : > { %6457 = vmatmul.mubr.msk.bf16.gmra.mxu0 %vm2675_vm3, %v7868_v28  ;;  %v7878_v28 = vpop.eup %7877 }
 0x3f3   : > { %2944 = vmatprep.mubr.bf16.mxu0 %v8554_v51 }
 0x3fa   : > { %6458 = vmatmul.mubr.msk.bf16.gmra.mxu0 %vm2675_vm3, %v7870_v57  ;;  %v7880_v57 = vpop.eup %7879 }
 0x3fb   : > { %2954 = vmatprep.mubr.bf16.mxu0 %v8554_v51 }
 0x402   : > { %6459 = vmatmul.mubr.msk.bf16.gmra.mxu0 %vm2675_vm3, %v7872_v60  ;;  %v7882_v60 = vpop.eup %7881 }
 0x403   : > { %2964 = vmatprep.mubr.bf16.mxu0 %v8554_v51 }
 0x40a   : > { %6460 = vmatmul.mubr.msk.bf16.gmra.mxu0 %vm2675_vm3, %v7874_v35  ;;  %v7884_v35 = vpop.eup %7883 }
 0x40b   : > { %2974 = vmatprep.mubr.bf16.mxu0 %v8554_v51 }
 0x412   : > { %6461 = vmatmul.mubr.msk.bf16.gmra.mxu0 %vm2675_vm3, %v7876_v46  ;;  %v7886_v46 = vpop.eup %7885 }
 0x413   : > { %2984 = vmatprep.mubr.bf16.mxu0 %v8554_v51  ;;  %v7888_v62 = vpop.eup %7887 }
 0x414   : > { %v7890_v11 = vpop.eup %7889 }
 0x415   : > { %v7892_v38 = vpop.eup %7891 }
 0x416   : > { %v7894_v30 = vpop.eup %7893 }
 0x41a   : > { %6462 = vmatmul.mubr.msk.bf16.gmra.mxu0 %vm2675_vm3, %v7878_v28  ;;  %v2645_v28 = vlaneseq }
 0x41b   : > { %2994 = vmatprep.mubr.bf16.mxu0 %v8554_v51 }
 0x41c   : > { %v9364_v41 = vshrl.u32 %v2645_v28, 7 }
 0x41e   : > { %10303 = vst [vmem:[#allocation11_spill] sm:$0xff] %v9364_v41  ;;  %v9367_v8 = vsub.s32 0, %v9364_v41  ;;  %v2651_v16 = vsub.s32 1, %v9364_v41 }
 0x420   : > { %10304 = vst [vmem:[#allocation12_spill] sm:$0xff] %v9367_v8  ;;  %v9377_v31 = vrot.slane %v2643_v10, %v9367_v8 }
 0x422   : > { %6463 = vmatmul.mubr.msk.bf16.gmra.mxu0 %vm2675_vm3, %v7880_v57  ;;  %v2544_v57 = vpop.f32.mrf.mxu1 }
 0x423   : > { %3004 = vmatprep.mubr.bf16.mxu0 %v8554_v51  ;;  %v2545_v55 = vadd.f32 %v9260_v48, %v2544_v57 }
 0x42a   : > { %6464 = vmatmul.mubr.msk.bf16.gmra.mxu0 %vm2675_vm3, %v7882_v60  ;;  %v7234_v60 = vpop.f32.mrf.mxu1 }
 0x42b   : > { %3014 = vmatprep.mubr.bf16.mxu0 %v8554_v51 }
 0x42c   : > { %v2547_v36 = vpop.f32.mrf.mxu1 }
 0x42d   : > { %v2548_v50 = vadd.f32 %v9260_v48, %v2547_v36 }
 0x42e   : > { %v7237_v2 = vpop.f32.mrf.mxu1 }
 0x432   : > { %6465 = vmatmul.mubr.msk.bf16.gmra.mxu0 %vm2675_vm3, %v7884_v35  ;;  %v9380_v35 = vrot.slane %v2643_v10, %v2651_v16  ;;  %v2603_v10 = vpack.c.bf16 %v2548_v50, %v2545_v55 }
 0x433   : > { %3024 = vmatprep.mubr.bf16.mxu0 %v8554_v51 }
 0x434   : > { %7897 = vtanh.bf16 %v2603_v10 }
 0x43a   : > { %6466 = vmatmul.mubr.msk.bf16.gmra.mxu0 %vm2675_vm3, %v7886_v46 }
 0x43b   : > { %3034 = vmatprep.mubr.bf16.mxu0 %v8554_v51 }
 0x442   : > { %6467 = vmatmul.mubr.msk.bf16.gmra.mxu0 %vm2675_vm3, %v7888_v62 }
 0x443   : > { %3044 = vmatprep.mubr.bf16.mxu0 %v8554_v51 }
 0x44a   : > { %v2806_v21 = vpop.f32.mrf.mxu0  ;;  %6468 = vmatmul.mubr.msk.bf16.gmra.mxu0 %vm2675_vm3, %v7890_v11  ;;  %v2560_v11 = vpop.f32.mrf.mxu1 }
 0x44b   : > { %3054 = vmatprep.mubr.bf16.mxu0 %v8554_v51  ;;  %v2807_v34 = vadd.f32 %v2806_v21, %v9377_v31 }
 0x44c   : > { %v2808_v33 = vpop.f32.mrf.mxu0  ;;  %v7238_v55 = vpop.f32.mrf.mxu1 }
 0x44d   : > { %v2809_v54 = vadd.f32 %v2808_v33, %v9380_v35 }
 0x44e   : > { %v2810_v37 = vpop.f32.mrf.mxu0 }
 0x44f   : > { %v2811_v46 = vadd.f32 %v2810_v37, %v9377_v31 }
 0x450   : > { %v2812_v49 = vpop.f32.mrf.mxu0 }
 0x451   : > { %v3125_v61 = vpack.c.bf16 %v2811_v46, %v2807_v34  ;;  %v2813_v28 = vadd.f32 %v2812_v49, %v9380_v35  ;;  %v2556_v34 = vadd.f32 %v7234_v60, %v9260_v48 }
 0x452   : > { %v2816_v62 = vpop.f32.mrf.mxu0  ;;  %6469 = vmatmul.mubr.msk.bf16.gmra.mxu0 %vm2675_vm3, %v7892_v38 }
 0x453   : > { %v3126_v22 = vpack.c.bf16 %v2813_v28, %v2809_v54  ;;  %3064 = vmatprep.mubr.bf16.mxu0 %v8554_v51  ;;  %v2817_v16 = vadd.f32 %v2816_v62, %v9377_v31  ;;  %7899 = vtanh.bf16 %v3125_v61  ;;  %v2604_v50 = vpack.c.bf16 %v2556_v34, %v2553_v43  ;;  %v2563_v28 = vpop.f32.mrf.mxu1  ;;  %v7896_v61 = vpop.eup %7895 }
 0x454   : > { %v2818_v4 = vpop.f32.mrf.mxu0 }
 0x455   : > { %v2819_v33 = vadd.f32 %v2818_v4, %v9380_v35 }
 0x456   : > { %v2820_v57 = vpop.f32.mrf.mxu0 }
 0x457   : > { %v2821_v21 = vadd.f32 %v2820_v57, %v9377_v31 }
 0x458   : > { %v2822_v25 = vpop.f32.mrf.mxu0 }
 0x459   : > { %v3127_v36 = vpack.c.bf16 %v2821_v21, %v2817_v16  ;;  %v2823_v37 = vadd.f32 %v2822_v25, %v9380_v35  ;;  %v2561_v16 = vadd.f32 %v9260_v48, %v2560_v11 }
 0x45a   : > { %v2826_v46 = vpop.f32.mrf.mxu0  ;;  %6470 = vmatmul.mubr.msk.bf16.gmra.mxu0 %vm2675_vm3, %v7894_v30 }
 0x45b   : > { %7901 = vtanh.bf16 %v3127_v36  ;;  %v3128_v49 = vpack.c.bf16 %v2823_v37, %v2819_v33  ;;  %3074 = vmatprep.mubr.bf16.mxu0 %v8554_v51  ;;  %v2827_v62 = vadd.f32 %v2826_v46, %v9377_v31  ;;  %v7898_v37 = vpop.eup %7897 }
 0x45c   : > { %7903 = vtanh.bf16 %v3126_v22  ;;  %v2828_v38 = vpop.f32.mrf.mxu0  ;;  %v2564_v22 = vadd.f32 %v9260_v48, %v2563_v28 }
 0x45d   : > { %7905 = vtanh.bf16 %v3128_v49  ;;  %v2829_v4 = vadd.f32 %v2828_v38, %v9380_v35 }
 0x45e   : > { %v2830_v54 = vpop.f32.mrf.mxu0  ;;  %7907 = vtanh.bf16 %v2604_v50  ;;  %v2605_v33 = vpack.c.bf16 %v2564_v22, %v2561_v16 }
 0x45f   : > { %v2831_v0 = vadd.f32 %v2830_v54, %v9377_v31 }
 0x460   : > { %v2832_v60 = vpop.f32.mrf.mxu0 }
 0x461   : > { %v3129_v10 = vpack.c.bf16 %v2831_v0, %v2827_v62  ;;  %v2833_v57 = vadd.f32 %v2832_v60, %v9380_v35  ;;  %v7900_v46 = vpop.eup %7899  ;;  %v2569_v62 = vadd.f32 %v7237_v2, %v9260_v48  ;;  %v2572_v0 = vadd.f32 %v7238_v55, %v9260_v48 }
 0x462   : > { %v2836_v21 = vpop.f32.mrf.mxu0  ;;  %6471 = vmatmul.mubr.msk.bf16.gmra.mxu0 %vm2675_vm3, %v7896_v61 }
 0x463   : > { %7909 = vtanh.bf16 %v3129_v10  ;;  %v3130_v25 = vpack.c.bf16 %v2833_v57, %v2829_v4  ;;  %3084 = vmatprep.mubr.bf16.mxu0 %v8554_v51  ;;  %v2837_v43 = vadd.f32 %v2836_v21, %v9377_v31  ;;  %v2606_v22 = vpack.c.bf16 %v2572_v0, %v2569_v62 }
 0x464   : > { %v2838_v30 = vpop.f32.mrf.mxu0 }
 0x465   : > { %7911 = vtanh.bf16 %v3130_v25  ;;  %v2839_v38 = vadd.f32 %v2838_v30, %v9380_v35 }
 0x466   : > { %v2840_v36 = vpop.f32.mrf.mxu0  ;;  %7913 = vtanh.bf16 %v2605_v33 }
 0x467   : > { %v2841_v34 = vadd.f32 %v2840_v36, %v9377_v31 }
 0x468   : > { %v2842_v11 = vpop.f32.mrf.mxu0 }
 0x469   : > { %v7902_v49 = vpop.eup %7901  ;;  %v3131_v50 = vpack.c.bf16 %v2841_v34, %v2837_v43  ;;  %v2843_v54 = vadd.f32 %v2842_v11, %v9380_v35 }
 0x46a   : > { %v7904_v28 = vpop.eup %7903  ;;  %v3253_v60 = vmax.bf16 %v7902_v49, %v7900_v46  ;;  %v2846_v61 = vpop.f32.mrf.mxu0  ;;  %6472 = vmatmul.mubr.msk.bf16.gmra.mxu0 %vm2675_vm3, %v7898_v37 }
 0x46b   : > { %v7906_v4 = vpop.eup %7905  ;;  %7915 = vtanh.bf16 %v3131_v50  ;;  %v3132_v10 = vpack.c.bf16 %v2843_v54, %v2839_v38  ;;  %3094 = vmatprep.mubr.bf16.mxu0 %v8554_v51  ;;  %v2847_v25 = vadd.f32 %v2846_v61, %v9377_v31 }
 0x46c   : > { %v3270_v57 = vmax.bf16 %v7906_v4, %v7904_v28  ;;  %v2848_v16 = vpop.f32.mrf.mxu0  ;;  %v7908_v48 = vpop.eup %7907 }
 0x46d   : > { %7917 = vtanh.bf16 %v3132_v10  ;;  %v2849_v33 = vadd.f32 %v2848_v16, %v9380_v35 }
 0x46e   : > { %v2850_v21 = vpop.f32.mrf.mxu0  ;;  %7919 = vtanh.bf16 %v2606_v22 }
 0x46f   : > { %v2851_v2 = vadd.f32 %v2850_v21, %v9377_v31 }
 0x470   : > { %v2852_v55 = vpop.f32.mrf.mxu0 }
 0x471   : > { %v7910_v30 = vpop.eup %7909  ;;  %v3133_v36 = vpack.c.bf16 %v2851_v2, %v2847_v25  ;;  %v2853_v37 = vadd.f32 %v2852_v55, %v9380_v35 }
 0x472   : > { %v3254_v43 = vmax.bf16 %v7910_v30, %v3253_v60  ;;  %v2856_v34 = vpop.f32.mrf.mxu0  ;;  %6473 = vmatmul.mubr.msk.bf16.gmra.mxu0 %vm2675_vm3, %v7908_v48 }
 0x473   : > { %v7912_v46 = vpop.eup %7911  ;;  %7921 = vtanh.bf16 %v3133_v36  ;;  %v3134_v11 = vpack.c.bf16 %v2853_v37, %v2849_v33  ;;  %3104 = vmatprep.mubr.bf16.mxu0 %v8554_v51  ;;  %v2857_v54 = vadd.f32 %v2856_v34, %v9377_v31 }
 0x474   : > { %v3271_v49 = vmax.bf16 %v7912_v46, %v3270_v57  ;;  %v2858_v38 = vpop.f32.mrf.mxu0  ;;  %v7914_v62 = vpop.eup %7913 }
 0x475   : > { %7923 = vtanh.bf16 %v3134_v11  ;;  %v2859_v60 = vadd.f32 %v2858_v38, %v9380_v35 }
 0x476   : > { %v2860_v50 = vpop.f32.mrf.mxu0 }
 0x477   : > { %v2861_v28 = vadd.f32 %v2860_v50, %v9377_v31 }
 0x478   : > { %v2862_v0 = vpop.f32.mrf.mxu0 }
 0x479   : > { %v7916_v61 = vpop.eup %7915  ;;  %v3135_v4 = vpack.c.bf16 %v2861_v28, %v2857_v54  ;;  %v2863_v10 = vadd.f32 %v2862_v0, %v9380_v35  ;;  %v7616_v28 = vld [vmem:[%s10257_s12 + $0x78] sm:$0xff]  }
 0x47a   : > { %v3255_v16 = vmax.bf16 %v7916_v61, %v3254_v43  ;;  %v2866_v22 = vpop.f32.mrf.mxu0  ;;  %6474 = vmatmul.mubr.msk.bf16.gmra.mxu0 %vm2675_vm3, %v7914_v62  ;;  %6776 = vmatprep.subr.bf16.mxu1 %v7616_v28 }
 0x47b   : > { %v7918_v57 = vpop.eup %7917  ;;  %7925 = vtanh.bf16 %v3135_v4  ;;  %v3136_v21 = vpack.c.bf16 %v2863_v10, %v2859_v60  ;;  %3114 = vmatprep.mubr.bf16.mxu0 %v8554_v51  ;;  %v2867_v55 = vadd.f32 %v2866_v22, %v9377_v31 }
 0x47c   : > { %v3272_v25 = vmax.bf16 %v7918_v57, %v3271_v49  ;;  %v2868_v2 = vpop.f32.mrf.mxu0  ;;  %v7920_v33 = vpop.eup %7919 }
 0x47d   : > { %7927 = vtanh.bf16 %v3136_v21  ;;  %v2869_v43 = vadd.f32 %v2868_v2, %v9380_v35 }
 0x47e   : > { %v2870_v48 = vpop.f32.mrf.mxu0 }
 0x47f   : > { %v2871_v30 = vadd.f32 %v2870_v48, %v9377_v31 }
 0x480   : > { %v2872_v36 = vpop.f32.mrf.mxu0 }
 0x481   : > { %v7922_v37 = vpop.eup %7921  ;;  %v3137_v34 = vpack.c.bf16 %v2871_v30, %v2867_v55  ;;  %v2873_v46 = vadd.f32 %v2872_v36, %v9380_v35 }
 0x482   : > { %v3256_v11 = vmax.bf16 %v7922_v37, %v3255_v16  ;;  %v2876_v38 = vpop.f32.mrf.mxu0  ;;  %6475 = vmatmul.mubr.msk.bf16.gmra.mxu0 %vm2675_vm3, %v7920_v33 }
 0x483   : > { %v7924_v51 = vpop.eup %7923  ;;  %7929 = vtanh.bf16 %v3137_v34  ;;  %v3138_v49 = vpack.c.bf16 %v2873_v46, %v2869_v43  ;;  %v2877_v0 = vadd.f32 %v2876_v38, %v9377_v31 }
 0x484   : > { %v3273_v50 = vmax.bf16 %v7924_v51, %v3272_v25  ;;  %v2878_v54 = vpop.f32.mrf.mxu0  ;;  %v7617_v25 = vld [vmem:[%s10257_s12 + $0x38] sm:$0xff]  }
 0x485   : > { %7931 = vtanh.bf16 %v3138_v49  ;;  %v2879_v10 = vadd.f32 %v2878_v54, %v9380_v35  ;;  %6777 = vmatpush3.bf16.msra.mxu1 %v7617_v25 }
 0x486   : > { %v2880_v62 = vpop.f32.mrf.mxu0 }
 0x487   : > { %v2881_v61 = vadd.f32 %v2880_v62, %v9377_v31 }
 0x488   : > { %v2882_v60 = vpop.f32.mrf.mxu0 }
 0x489   : > { %v7926_v4 = vpop.eup %7925  ;;  %v3139_v16 = vpack.c.bf16 %v2881_v61, %v2877_v0  ;;  %v2883_v22 = vadd.f32 %v2882_v60, %v9380_v35 }
 0x48a   : > { %v3257_v57 = vmax.bf16 %v7926_v4, %v3256_v11  ;;  %v2886_v21 = vpop.f32.mrf.mxu0 }
 0x48b   : > { %v7928_v2 = vpop.eup %7927  ;;  %7933 = vtanh.bf16 %v3139_v16  ;;  %v3140_v48 = vpack.c.bf16 %v2883_v22, %v2879_v10  ;;  %v2887_v36 = vadd.f32 %v2886_v21, %v9377_v31 }
 0x48c   : > { %v3274_v55 = vmax.bf16 %v7928_v2, %v3273_v50  ;;  %v2888_v30 = vpop.f32.mrf.mxu0  ;;  %v7618_v50 = vld [vmem:[%s10257_s12 + $0x70] sm:$0xff]  }
 0x48d   : > { %7935 = vtanh.bf16 %v3140_v48  ;;  %v2889_v62 = vadd.f32 %v2888_v30, %v9380_v35  ;;  %6778 = vmatprep.subr.bf16.mxu1 %v7618_v50 }
 0x48e   : > { %v2890_v33 = vpop.f32.mrf.mxu0 }
 0x48f   : > { %v2891_v37 = vadd.f32 %v2890_v33, %v9377_v31 }
 0x490   : > { %v2892_v43 = vpop.f32.mrf.mxu0 }
 0x491   : > { %v7930_v34 = vpop.eup %7929  ;;  %v3141_v46 = vpack.c.bf16 %v2891_v37, %v2887_v36  ;;  %v2893_v54 = vadd.f32 %v2892_v43, %v9380_v35  ;;  %v7619_v37 = vld [vmem:[%s10257_s12 + $0x30] sm:$0xff]   ;;  %v7620_v43 = vld [vmem:[%s10257_s12 + $0x68] sm:$0xff]  }
 0x492   : > { %v3258_v11 = vmax.bf16 %v7930_v34, %v3257_v57  ;;  %v2896_v38 = vpop.f32.mrf.mxu0  ;;  %6779 = vmatpush3.bf16.msra.mxu1 %v7619_v37 }
 0x493   : > { %v7932_v51 = vpop.eup %7931  ;;  %v2897_v61 = vadd.f32 %v2896_v38, %v9377_v31  ;;  %v3142_v4 = vpack.c.bf16 %v2893_v54, %v2889_v62  ;;  %7937 = vtanh.bf16 %v3141_v46  ;;  %6780 = vmatprep.subr.bf16.mxu1 %v7620_v43 }
 0x494   : > { %v3275_v49 = vmax.bf16 %v7932_v51, %v3274_v55  ;;  %v2898_v28 = vpop.f32.mrf.mxu0 }
 0x495   : > { %v2899_v22 = vadd.f32 %v2898_v28, %v9380_v35 }
 0x496   : > { %v2900_v0 = vpop.f32.mrf.mxu0 }
 0x497   : > { %v2901_v60 = vadd.f32 %v2900_v0, %v9377_v31 }
 0x498   : > { %v2902_v10 = vpop.f32.mrf.mxu0 }
 0x499   : > { %v7934_v16 = vpop.eup %7933  ;;  %v3143_v57 = vpack.c.bf16 %v2901_v60, %v2897_v61  ;;  %v2903_v21 = vadd.f32 %v2902_v10, %v9380_v35 }
 0x49a   : > { %v9452_v25 = vmax.bf16 %v7934_v16, %v3258_v11  ;;  %v2906_v2 = vpop.f32.mrf.mxu0 }
 0x49b   : > { %v7936_v48 = vpop.eup %7935  ;;  %7939 = vtanh.bf16 %v3143_v57  ;;  %v3144_v55 = vpack.c.bf16 %v2903_v21, %v2899_v22  ;;  %v2907_v34 = vadd.f32 %v2906_v2, %v9377_v31 }
 0x49c   : > { %v9454_v30 = vmax.bf16 %v7936_v48, %v3275_v49  ;;  %7941 = vtanh.bf16 %v3142_v4  ;;  %v2908_v33 = vpop.f32.mrf.mxu0 }
 0x49d   : > { %7943 = vtanh.bf16 %v3144_v55  ;;  %v2909_v38 = vadd.f32 %v2908_v33, %v9380_v35  ;;  %v7621_v55 = vld [vmem:[%s10257_s12 + $0x28] sm:$0xff]  }
 0x49e   : > { %v2910_v36 = vpop.f32.mrf.mxu0  ;;  %6781 = vmatpush3.bf16.msra.mxu1 %v7621_v55 }
 0x49f   : > { %v2911_v46 = vadd.f32 %v2910_v36, %v9377_v31 }
 0x4a0   : > { %v2912_v11 = vpop.f32.mrf.mxu0 }
 0x4a1   : > { %v3145_v51 = vpack.c.bf16 %v2911_v46, %v2907_v34  ;;  %v2913_v49 = vadd.f32 %v2912_v11, %v9380_v35  ;;  %v7938_v60 = vpop.eup %7937 }
 0x4a2   : > { %v2916_v54 = vpop.f32.mrf.mxu0 }
 0x4a3   : > { %7945 = vtanh.bf16 %v3145_v51  ;;  %v3146_v28 = vpack.c.bf16 %v2913_v49, %v2909_v38  ;;  %v2917_v0 = vadd.f32 %v2916_v54, %v9377_v31 }
 0x4a4   : > { %v2918_v50 = vpop.f32.mrf.mxu0 }
 0x4a5   : > { %7947 = vtanh.bf16 %v3146_v28  ;;  %v2919_v16 = vadd.f32 %v2918_v50, %v9380_v35 }
 0x4a6   : > { %v2920_v62 = vpop.f32.mrf.mxu0 }
 0x4a7   : > { %v2921_v61 = vadd.f32 %v2920_v62, %v9377_v31 }
 0x4a8   : > { %v2922_v4 = vpop.f32.mrf.mxu0 }
 0x4a9   : > { %v7940_v10 = vpop.eup %7939  ;;  %v3147_v22 = vpack.c.bf16 %v2921_v61, %v2917_v0  ;;  %v2923_v57 = vadd.f32 %v2922_v4, %v9380_v35 }
 0x4aa   : > { %v7942_v21 = vpop.eup %7941  ;;  %v3287_v2 = vmax.bf16 %v7940_v10, %v7938_v60  ;;  %v2926_v48 = vpop.f32.mrf.mxu0  ;;  %v7622_v10 = vld [vmem:[%s10257_s12 + $0x60] sm:$0xff]  }
 0x4ab   : > { %v7944_v33 = vpop.eup %7943  ;;  %7949 = vtanh.bf16 %v3147_v22  ;;  %v3148_v36 = vpack.c.bf16 %v2923_v57, %v2919_v16  ;;  %v2927_v46 = vadd.f32 %v2926_v48, %v9377_v31  ;;  %6782 = vmatprep.subr.bf16.mxu1 %v7622_v10 }
 0x4ac   : > { %v3304_v37 = vmax.bf16 %v7944_v33, %v7942_v21  ;;  %v2928_v43 = vpop.f32.mrf.mxu0 }
 0x4ad   : > { %7951 = vtanh.bf16 %v3148_v36  ;;  %v2929_v49 = vadd.f32 %v2928_v43, %v9380_v35  ;;  %v7623_v43 = vld [vmem:[%s10257_s12 + $0x20] sm:$0xff]  }
 0x4ae   : > { %v2930_v34 = vpop.f32.mrf.mxu0  ;;  %6783 = vmatpush3.bf16.msra.mxu1 %v7623_v43 }
 0x4af   : > { %v2931_v11 = vadd.f32 %v2930_v34, %v9377_v31 }
 0x4b0   : > { %v2932_v38 = vpop.f32.mrf.mxu0 }
 0x4b1   : > { %v7946_v51 = vpop.eup %7945  ;;  %v3149_v54 = vpack.c.bf16 %v2931_v11, %v2927_v46  ;;  %v2933_v28 = vadd.f32 %v2932_v38, %v9380_v35 }
 0x4b2   : > { %v3288_v50 = vmax.bf16 %v7946_v51, %v3287_v2  ;;  %v2936_v62 = vpop.f32.mrf.mxu0 }
 0x4b3   : > { %v7948_v0 = vpop.eup %7947  ;;  %7953 = vtanh.bf16 %v3149_v54  ;;  %v3150_v61 = vpack.c.bf16 %v2933_v28, %v2929_v49  ;;  %v2937_v22 = vadd.f32 %v2936_v62, %v9377_v31 }
 0x4b4   : > { %v3305_v60 = vmax.bf16 %v7948_v0, %v3304_v37  ;;  %v2938_v4 = vpop.f32.mrf.mxu0 }
 0x4b5   : > { %7955 = vtanh.bf16 %v3150_v61  ;;  %v2939_v2 = vadd.f32 %v2938_v4, %v9380_v35 }
 0x4b6   : > { %v2940_v16 = vpop.f32.mrf.mxu0 }
 0x4b7   : > { %v2941_v57 = vadd.f32 %v2940_v16, %v9377_v31 }
 0x4b8   : > { %v2942_v21 = vpop.f32.mrf.mxu0 }
 0x4b9   : > { %v7950_v48 = vpop.eup %7949  ;;  %v3151_v55 = vpack.c.bf16 %v2941_v57, %v2937_v22  ;;  %v2943_v33 = vadd.f32 %v2942_v21, %v9380_v35  ;;  %v7624_v21 = vld [vmem:[%s10257_s12 + $0x58] sm:$0xff]  }
 0x4ba   : > { %v3289_v36 = vmax.bf16 %v7950_v48, %v3288_v50  ;;  %v2946_v37 = vpop.f32.mrf.mxu0  ;;  %6784 = vmatprep.subr.bf16.mxu1 %v7624_v21 }
 0x4bb   : > { %v7952_v34 = vpop.eup %7951  ;;  %7957 = vtanh.bf16 %v3151_v55  ;;  %v3152_v46 = vpack.c.bf16 %v2943_v33, %v2939_v2  ;;  %v2947_v49 = vadd.f32 %v2946_v37, %v9377_v31 }
 0x4bc   : > { %v3306_v11 = vmax.bf16 %v7952_v34, %v3305_v60  ;;  %v2948_v38 = vpop.f32.mrf.mxu0 }
 0x4bd   : > { %7959 = vtanh.bf16 %v3152_v46  ;;  %v2949_v50 = vadd.f32 %v2948_v38, %v9380_v35  ;;  %v3260_v46 = vunpack.i.l.bf16 %v9452_v25 }
 0x4be   : > { %v2950_v51 = vpop.f32.mrf.mxu0 }
 0x4bf   : > { %v2951_v54 = vadd.f32 %v2950_v51, %v9377_v31 }
 0x4c0   : > { %v2952_v28 = vpop.f32.mrf.mxu0 }
 0x4c1   : > { %v7954_v62 = vpop.eup %7953  ;;  %v3153_v0 = vpack.c.bf16 %v2951_v54, %v2947_v49  ;;  %v2953_v61 = vadd.f32 %v2952_v28, %v9380_v35  ;;  %v7625_v49 = vld [vmem:[%s10257_s12 + $0x18] sm:$0xff]   ;;  %v3277_v28 = vunpack.i.l.bf16 %v9454_v30 }
 0x4c2   : > { %v3290_v4 = vmax.bf16 %v7954_v62, %v3289_v36  ;;  %v2956_v10 = vpop.f32.mrf.mxu0  ;;  %v3278_v62 = vunpack.i.h.bf16 %v9454_v30  ;;  %6785 = vmatpush3.bf16.msra.mxu1 %v7625_v49 }
 0x4c3   : > { %v7956_v16 = vpop.eup %7955  ;;  %7961 = vtanh.bf16 %v3153_v0  ;;  %v3154_v60 = vpack.c.bf16 %v2953_v61, %v2949_v50  ;;  %v2957_v2 = vadd.f32 %v2956_v10, %v9377_v31 }
 0x4c4   : > { %v3307_v22 = vmax.bf16 %v7956_v16, %v3306_v11  ;;  %v2958_v57 = vpop.f32.mrf.mxu0  ;;  %v3261_v11 = vunpack.i.h.bf16 %v9452_v25 }
 0x4c5   : > { %7963 = vtanh.bf16 %v3154_v60  ;;  %v2959_v36 = vadd.f32 %v2958_v57, %v9380_v35  ;;  %v3279_v60 = vmax.f32 %v3277_v28, %v3278_v62 }
 0x4c6   : > { %v2960_v48 = vpop.f32.mrf.mxu0  ;;  %v3262_v10 = vmax.f32 %v3260_v46, %v3261_v11 }
 0x4c7   : > { %v2961_v55 = vadd.f32 %v2960_v48, %v9377_v31 }
 0x4c8   : > { %v2962_v33 = vpop.f32.mrf.mxu0 }
 0x4c9   : > { %v7958_v37 = vpop.eup %7957  ;;  %v3155_v43 = vpack.c.bf16 %v2961_v55, %v2957_v2  ;;  %v2963_v34 = vadd.f32 %v2962_v33, %v9380_v35  ;;  %v3263_v2 = vrot.slane %v3262_v10, 4 }
 0x4ca   : > { %v3291_v38 = vmax.bf16 %v7958_v37, %v3290_v4  ;;  %v2966_v51 = vpop.f32.mrf.mxu0  ;;  %v3280_v37 = vrot.slane %v3279_v60, 4 }
 0x4cb   : > { %v7960_v54 = vpop.eup %7959  ;;  %7965 = vtanh.bf16 %v3155_v43  ;;  %v3156_v50 = vpack.c.bf16 %v2963_v34, %v2959_v36  ;;  %v2967_v25 = vadd.f32 %v2966_v51, %v9377_v31  ;;  %v7626_v34 = vld [vmem:[%s10257_s12 + $0x50] sm:$0xff]   ;;  %v3264_v51 = vmax.f32 %v3262_v10, %v3263_v2 }
 0x4cc   : > { %v3308_v0 = vmax.bf16 %v7960_v54, %v3307_v22  ;;  %v2968_v61 = vpop.f32.mrf.mxu0  ;;  %6786 = vmatprep.subr.bf16.mxu1 %v7626_v34  ;;  %v3281_v54 = vmax.f32 %v3279_v60, %v3280_v37  ;;  %v7627_v37 = vld [vmem:[%s10257_s12 + $0x10] sm:$0xff]  }
 0x4cd   : > { %7967 = vtanh.bf16 %v3156_v50  ;;  %v2969_v46 = vadd.f32 %v2968_v61, %v9380_v35  ;;  %v3265_v61 = vrot.slane %v3264_v51, 2  ;;  %6787 = vmatpush3.bf16.msra.mxu1 %v7627_v37 }
 0x4ce   : > { %v2970_v16 = vpop.f32.mrf.mxu0  ;;  %v3282_v2 = vrot.slane %v3281_v54, 2 }
 0x4cf   : > { %v2971_v4 = vadd.f32 %v2970_v16, %v9377_v31 }
 0x4d0   : > { %v2972_v57 = vpop.f32.mrf.mxu0 }
 0x4d1   : > { %v7962_v21 = vpop.eup %7961  ;;  %v3157_v48 = vpack.c.bf16 %v2971_v4, %v2967_v25  ;;  %v2973_v22 = vadd.f32 %v2972_v57, %v9380_v35 }
 0x4d2   : > { %v3292_v55 = vmax.bf16 %v7962_v21, %v3291_v38  ;;  %v2976_v33 = vpop.f32.mrf.mxu0 }
 0x4d3   : > { %v7964_v30 = vpop.eup %7963  ;;  %v2977_v49 = vadd.f32 %v2976_v33, %v9377_v31  ;;  %v3158_v28 = vpack.c.bf16 %v2973_v22, %v2969_v46  ;;  %7969 = vtanh.bf16 %v3157_v48 }
 0x4d4   : > { %v3309_v36 = vmax.bf16 %v7964_v30, %v3308_v0  ;;  %v2978_v43 = vpop.f32.mrf.mxu0 }
 0x4d5   : > { %v2979_v0 = vadd.f32 %v2978_v43, %v9380_v35 }
 0x4d6   : > { %v2980_v11 = vpop.f32.mrf.mxu0 }
 0x4d7   : > { %v2981_v38 = vadd.f32 %v2980_v11, %v9377_v31  ;;  %v3266_v11 = vmax.f32 %v3264_v51, %v3265_v61  ;;  %v7631_v51 = vld [vmem:[%s10257_s12] sm:$0xff]  }
 0x4d8   : > { %v2982_v62 = vpop.f32.mrf.mxu0 }
 0x4d9   : > { %v7966_v50 = vpop.eup %7965  ;;  %v3159_v16 = vpack.c.bf16 %v2981_v38, %v2977_v49  ;;  %v2983_v25 = vadd.f32 %v2982_v62, %v9380_v35 }
 0x4da   : > { %v3293_v4 = vmax.bf16 %v7966_v50, %v3292_v55  ;;  %v2986_v57 = vpop.f32.mrf.mxu0  ;;  %v7628_v55 = vld [vmem:[%s10257_s12 + $0x48] sm:$0xff]  }
 0x4db   : > { %v7968_v21 = vpop.eup %7967  ;;  %7971 = vtanh.bf16 %v3159_v16  ;;  %v3160_v10 = vpack.c.bf16 %v2983_v25, %v2979_v0  ;;  %v2987_v49 = vadd.f32 %v2986_v57, %v9377_v31  ;;  %6788 = vmatprep.subr.bf16.mxu1 %v7628_v55  ;;  %v3283_v0 = vmax.f32 %v3281_v54, %v3282_v2 }
 0x4dc   : > { %v3294_v33 = vunpack.i.l.bf16 %v3293_v4  ;;  %v3295_v30 = vunpack.i.h.bf16 %v3293_v4  ;;  %v3310_v34 = vmax.bf16 %v7968_v21, %v3309_v36  ;;  %7973 = vtanh.bf16 %v3158_v28  ;;  %v2988_v60 = vpop.f32.mrf.mxu0  ;;  %v7629_v36 = vld [vmem:[%s10257_s12 + $0x8] sm:$0xff]   ;;  %v7630_v28 = vld [vmem:[%s10257_s12 + $0x40] sm:$0xff]  }
 0x4dd   : > { %7975 = vtanh.bf16 %v3160_v10  ;;  %v2989_v25 = vadd.f32 %v2988_v60, %v9380_v35  ;;  %6789 = vmatpush3.bf16.msra.mxu1 %v7629_v36  ;;  %v3267_v57 = vrot.slane %v3266_v11, 1  ;;  %v3284_v54 = vrot.slane %v3283_v0, 1 }
 0x4de   : > { %v3296_v48 = vmax.f32 %v3294_v33, %v3295_v30  ;;  %v3311_v22 = vunpack.i.l.bf16 %v3310_v34  ;;  %v3312_v43 = vunpack.i.h.bf16 %v3310_v34  ;;  %v2990_v46 = vpop.f32.mrf.mxu0  ;;  %6790 = vmatprep.subr.bf16.mxu1 %v7630_v28 }
 0x4df   : > { %v2991_v38 = vadd.f32 %v2990_v46, %v9377_v31  ;;  %v3268_v55 = vmax.f32 %v3266_v11, %v3267_v57 }
 0x4e0   : > { %v3297_v62 = vrot.slane %v3296_v48, 4  ;;  %v2992_v50 = vpop.f32.mrf.mxu0  ;;  %v3313_v16 = vmax.f32 %v3311_v22, %v3312_v43 }
 0x4e1   : > { %v3161_v4 = vpack.c.bf16 %v2991_v38, %v2987_v49  ;;  %v2993_v21 = vadd.f32 %v2992_v50, %v9380_v35  ;;  %6791 = vmatpush3.bf16.msra.mxu1 %v7631_v51  ;;  %v7970_v49 = vpop.eup %7969  ;;  %v3285_v38 = vmax.f32 %v3283_v0, %v3284_v54  ;;  %v3269_v57 = vpack.i.bf16 %v3268_v55, %v3268_v55 }
 0x4e2   : > { %v2996_v10 = vpop.f32.mrf.mxu0  ;;  %v3298_v61 = vmax.f32 %v3296_v48, %v3297_v62  ;;  %v3314_v33 = vrot.slane %v3313_v16, 4 }
 0x4e3   : > { %7977 = vtanh.bf16 %v3161_v4  ;;  %v3162_v30 = vpack.c.bf16 %v2993_v21, %v2989_v25  ;;  %v2997_v46 = vadd.f32 %v2996_v10, %v9377_v31  ;;  %v3286_v0 = vpack.i.bf16 %v3285_v38, %v3285_v38 }
 0x4e4   : > { %v2998_v34 = vpop.f32.mrf.mxu0  ;;  %v3299_v2 = vrot.slane %v3298_v61, 2  ;;  %v3315_v37 = vmax.f32 %v3313_v16, %v3314_v33 }
 0x4e5   : > { %7979 = vtanh.bf16 %v3162_v30  ;;  %v2999_v25 = vadd.f32 %v2998_v34, %v9380_v35 }
 0x4e6   : > { %v3000_v60 = vpop.f32.mrf.mxu0  ;;  %v3300_v22 = vmax.f32 %v3298_v61, %v3299_v2  ;;  %v3316_v43 = vrot.slane %v3315_v37, 2 }
 0x4e7   : > { %v3001_v36 = vadd.f32 %v3000_v60, %v9377_v31 }
 0x4e8   : > { %v3002_v48 = vpop.f32.mrf.mxu0  ;;  %v3301_v62 = vrot.slane %v3300_v22, 1  ;;  %v3317_v50 = vmax.f32 %v3315_v37, %v3316_v43 }
 0x4e9   : > { %v7972_v28 = vpop.eup %7971  ;;  %v3163_v4 = vpack.c.bf16 %v3001_v36, %v2997_v46  ;;  %v3003_v16 = vadd.f32 %v3002_v48, %v9380_v35  ;;  %v3436_v46 = vunpack.c.l.b16 %v3269_v57  ;;  %v3437_v48 = vunpack.c.l.b16 %v3286_v0 }
 0x4ea   : > { %v7974_v21 = vpop.eup %7973  ;;  %v3321_v51 = vmax.bf16 %v7972_v28, %v7970_v49  ;;  %v3006_v11 = vpop.f32.mrf.mxu0  ;;  %v3302_v61 = vmax.f32 %v3300_v22, %v3301_v62  ;;  %v3318_v33 = vrot.slane %v3317_v50, 1 }
 0x4eb   : > { %v7976_v10 = vpop.eup %7975  ;;  %7981 = vtanh.bf16 %v3163_v4  ;;  %v3164_v30 = vpack.c.bf16 %v3003_v16, %v2999_v25  ;;  %v3007_v49 = vadd.f32 %v3006_v11, %v9377_v31 }
 0x4ec   : > { %v3338_v2 = vmax.bf16 %v7976_v10, %v7974_v21  ;;  %v3008_v60 = vpop.f32.mrf.mxu0  ;;  %v3303_v54 = vpack.i.bf16 %v3302_v61, %v3302_v61  ;;  %v3319_v37 = vmax.f32 %v3317_v50, %v3318_v33 }
 0x4ed   : > { %7983 = vtanh.bf16 %v3164_v30  ;;  %v3009_v38 = vadd.f32 %v3008_v60, %v9380_v35  ;;  %v9552_v30 = vld [vmem:[%s10256_s11] sm:$0xff]  }
 0x4ee   : > { %v3010_v34 = vpop.f32.mrf.mxu0  ;;  %v3320_v43 = vpack.i.bf16 %v3319_v37, %v3319_v37  ;;  %v3438_v36 = vunpack.c.l.b16 %v3303_v54  ;;  %7239 = vmatprep.subr.bf16.mxu1 %v9552_v30 }
 0x4ef   : > { %v3011_v55 = vadd.f32 %v3010_v34, %v9377_v31 }
 0x4f0   : > { %v3012_v22 = vpop.f32.mrf.mxu0  ;;  %v3439_v62 = vunpack.c.l.b16 %v3320_v43  ;;  %v9542_v28 = vsel %vm3444_vm4, %v3438_v36, %v3436_v46 }
 0x4f1   : > { %v7978_v25 = vpop.eup %7977  ;;  %v3165_v50 = vpack.c.bf16 %v3011_v55, %v3007_v49  ;;  %v3013_v4 = vadd.f32 %v3012_v22, %v9380_v35 }
 0x4f2   : > { %v3322_v16 = vmax.bf16 %v7978_v25, %v3321_v51  ;;  %v3016_v21 = vpop.f32.mrf.mxu0  ;;  %v9547_v57 = vsel %vm3444_vm4, %v3439_v62, %v3437_v48 }
 0x4f3   : > { %v7980_v11 = vpop.eup %7979  ;;  %7985 = vtanh.bf16 %v3165_v50  ;;  %v3166_v61 = vpack.c.bf16 %v3013_v4, %v3009_v38  ;;  %v3017_v0 = vadd.f32 %v3016_v21, %v9377_v31 }
 0x4f4   : > { %v3339_v33 = vmax.bf16 %v7980_v11, %v3338_v2  ;;  %v3018_v10 = vpop.f32.mrf.mxu0 }
 0x4f5   : > { %7987 = vtanh.bf16 %v3166_v61  ;;  %v3019_v34 = vadd.f32 %v3018_v10, %v9380_v35 }
 0x4f6   : > { %v3020_v60 = vpop.f32.mrf.mxu0 }
 0x4f7   : > { %v3021_v51 = vadd.f32 %v3020_v60, %v9377_v31 }
 0x4f8   : > { %v3022_v54 = vpop.f32.mrf.mxu0 }
 0x4f9   : > { %v7982_v37 = vpop.eup %7981  ;;  %v3167_v43 = vpack.c.bf16 %v3021_v51, %v3017_v0  ;;  %v3023_v2 = vadd.f32 %v3022_v54, %v9380_v35 }
 0x4fa   : > { %v3323_v46 = vmax.bf16 %v7982_v37, %v3322_v16  ;;  %v3026_v36 = vpop.f32.mrf.mxu0 }
 0x4fb   : > { %v7984_v49 = vpop.eup %7983  ;;  %7989 = vtanh.bf16 %v3167_v43  ;;  %v3168_v55 = vpack.c.bf16 %v3023_v2, %v3019_v34  ;;  %v3027_v25 = vadd.f32 %v3026_v36, %v9377_v31 }
 0x4fc   : > { %v3340_v22 = vmax.bf16 %v7984_v49, %v3339_v33  ;;  %v3028_v48 = vpop.f32.mrf.mxu0 }
 0x4fd   : > { %7991 = vtanh.bf16 %v3168_v55  ;;  %v3029_v21 = vadd.f32 %v3028_v48, %v9380_v35 }
 0x4fe   : > { %v3030_v62 = vpop.f32.mrf.mxu0 }
 0x4ff   : > { %v3031_v38 = vadd.f32 %v3030_v62, %v9377_v31 }
 0x500   : > { %v3032_v50 = vpop.f32.mrf.mxu0 }
 0x501   : > { %v7986_v4 = vpop.eup %7985  ;;  %v3169_v11 = vpack.c.bf16 %v3031_v38, %v3027_v25  ;;  %v3033_v61 = vadd.f32 %v3032_v50, %v9380_v35 }
 0x502   : > { %v3324_v16 = vmax.bf16 %v7986_v4, %v3323_v46  ;;  %v3036_v10 = vpop.f32.mrf.mxu0 }
 0x503   : > { %v7988_v60 = vpop.eup %7987  ;;  %7993 = vtanh.bf16 %v3169_v11  ;;  %v3170_v0 = vpack.c.bf16 %v3033_v61, %v3029_v21  ;;  %v3037_v37 = vadd.f32 %v3036_v10, %v9377_v31 }
 0x504   : > { %v3341_v33 = vmax.bf16 %v7988_v60, %v3340_v22  ;;  %v3038_v51 = vpop.f32.mrf.mxu0 }
 0x505   : > { %7995 = vtanh.bf16 %v3170_v0  ;;  %v3039_v36 = vadd.f32 %v3038_v51, %v9380_v35 }
 0x506   : > { %v3040_v54 = vpop.f32.mrf.mxu0 }
 0x507   : > { %v3041_v34 = vadd.f32 %v3040_v54, %v9377_v31 }
 0x508   : > { %v3042_v43 = vpop.f32.mrf.mxu0 }
 0x509   : > { %v7990_v2 = vpop.eup %7989  ;;  %v3171_v49 = vpack.c.bf16 %v3041_v34, %v3037_v37  ;;  %v3043_v55 = vadd.f32 %v3042_v43, %v9380_v35 }
 0x50a   : > { %v3325_v46 = vmax.bf16 %v7990_v2, %v3324_v16  ;;  %v3046_v48 = vpop.f32.mrf.mxu0 }
 0x50b   : > { %v7992_v62 = vpop.eup %7991  ;;  %7997 = vtanh.bf16 %v3171_v49  ;;  %v3172_v25 = vpack.c.bf16 %v3043_v55, %v3039_v36 }
 0x50c   : > { %v3342_v22 = vmax.bf16 %v7992_v62, %v3341_v33  ;;  %v3048_v38 = vpop.f32.mrf.mxu0 }
 0x50d   : > { %7999 = vtanh.bf16 %v3172_v25 }
 0x50e   : > { %v3050_v50 = vpop.f32.mrf.mxu0 }
 0x510   : > { %v3052_v4 = vpop.f32.mrf.mxu0 }
 0x511   : > { %v7994_v21 = vpop.eup %7993 }
 0x512   : > { %v3326_v11 = vmax.bf16 %v7994_v21, %v3325_v46  ;;  %v3056_v61 = vpop.f32.mrf.mxu0 }
 0x513   : > { %v7996_v10 = vpop.eup %7995 }
 0x514   : > { %v3343_v60 = vmax.bf16 %v7996_v10, %v3342_v22  ;;  %v3058_v0 = vpop.f32.mrf.mxu0 }
 0x516   : > { %v3060_v51 = vpop.f32.mrf.mxu0 }
 0x518   : > { %v3062_v54 = vpop.f32.mrf.mxu0 }
 0x519   : > { %v7998_v37 = vpop.eup %7997 }
 0x51a   : > { %v3327_v34 = vmax.bf16 %v7998_v37, %v3326_v11  ;;  %v3066_v16 = vpop.f32.mrf.mxu0 }
 0x51b   : > { %v8000_v43 = vpop.eup %7999 }
 0x51c   : > { %v3328_v2 = vunpack.i.l.bf16 %v3327_v34  ;;  %v3329_v49 = vunpack.i.h.bf16 %v3327_v34  ;;  %v3344_v36 = vmax.bf16 %v8000_v43, %v3343_v60  ;;  %v3068_v33 = vpop.f32.mrf.mxu0 }
 0x51e   : > { %v3330_v55 = vmax.f32 %v3328_v2, %v3329_v49  ;;  %v3070_v62 = vpop.f32.mrf.mxu0  ;;  %v3345_v25 = vunpack.i.l.bf16 %v3344_v36  ;;  %v3346_v8 = vunpack.i.h.bf16 %v3344_v36 }
 0x520   : > { %v3072_v41 = vpop.f32.mrf.mxu0  ;;  %v3331_v46 = vrot.slane %v3330_v55, 4  ;;  %v3347_v21 = vmax.f32 %v3345_v25, %v3346_v8 }
 0x522   : > { %v3076_v52 = vpop.f32.mrf.mxu0  ;;  %v3332_v22 = vmax.f32 %v3330_v55, %v3331_v46  ;;  %v3348_v10 = vrot.slane %v3347_v21, 4 }
 0x524   : > { %v3078_v20 = vpop.f32.mrf.mxu0  ;;  %v3333_v18 = vrot.slane %v3332_v22, 2  ;;  %v3349_v19 = vmax.f32 %v3347_v21, %v3348_v10 }
 0x526   : > { %v3080_v11 = vpop.f32.mrf.mxu0  ;;  %v3334_v37 = vmax.f32 %v3332_v22, %v3333_v18  ;;  %v3350_v47 = vrot.slane %v3349_v19, 2 }
 0x528   : > { %v3082_v12 = vpop.f32.mrf.mxu0  ;;  %v3335_v34 = vrot.slane %v3334_v37, 1  ;;  %v3351_v60 = vmax.f32 %v3349_v19, %v3350_v47  ;;  %v3051_v47 = vadd.f32 %v3050_v50, %v9377_v31  ;;  %v3053_v19 = vadd.f32 %v3052_v4, %v9380_v35 }
 0x529   : > { %v3059_v50 = vadd.f32 %v3058_v0, %v9380_v35  ;;  %v3073_v4 = vadd.f32 %v3072_v41, %v9380_v35 }
 0x52a   : > { %v3086_v43 = vpop.f32.mrf.mxu0  ;;  %v3336_v2 = vmax.f32 %v3334_v37, %v3335_v34  ;;  %v3352_v49 = vrot.slane %v3351_v60, 1  ;;  %v3047_v37 = vadd.f32 %v3046_v48, %v9377_v31  ;;  %v3061_v34 = vadd.f32 %v3060_v51, %v9377_v31 }
 0x52b   : > { %v3067_v48 = vadd.f32 %v3066_v16, %v9377_v31  ;;  %v3081_v51 = vadd.f32 %v3080_v11, %v9377_v31 }
 0x52c   : > { %v3088_v59 = vpop.f32.mrf.mxu0  ;;  %v3337_v36 = vpack.i.bf16 %v3336_v2, %v3336_v2  ;;  %v3353_v63 = vmax.f32 %v3351_v60, %v3352_v49  ;;  %v3063_v60 = vadd.f32 %v3062_v54, %v9380_v35  ;;  %v3057_v49 = vadd.f32 %v3056_v61, %v9377_v31 }
 0x52d   : > { %v3069_v54 = vadd.f32 %v3068_v33, %v9380_v35  ;;  %v3087_v33 = vadd.f32 %v3086_v43, %v9377_v31 }
 0x52e   : > { %v3090_v8 = vpop.f32.mrf.mxu0  ;;  %v3354_v25 = vpack.i.bf16 %v3353_v63, %v3353_v63  ;;  %v3440_v55 = vunpack.c.l.b16 %v3337_v36  ;;  %v3049_v63 = vadd.f32 %v3048_v38, %v9380_v35  ;;  %v3176_v38 = vpack.c.bf16 %v3063_v60, %v3059_v50 }
 0x52f   : > { %v3091_v0 = vadd.f32 %v3090_v8, %v9377_v31  ;;  %v3178_v41 = vpack.c.bf16 %v3073_v4, %v3069_v54 }
 0x530   : > { %v3092_v46 = vpop.f32.mrf.mxu0  ;;  %v3441_v39 = vunpack.c.l.b16 %v3354_v25  ;;  %v9568_v21 = vsel %vm3446_vm5, %v3440_v55, %v9542_v28  ;;  %v3173_v28 = vpack.c.bf16 %v3051_v47, %v3047_v37  ;;  %v3175_v25 = vpack.c.bf16 %v3061_v34, %v3057_v49 }
 0x531   : > { %v3083_v55 = vadd.f32 %v3082_v12, %v9380_v35  ;;  %v3093_v16 = vadd.f32 %v3092_v46, %v9380_v35  ;;  %v3181_v60 = vpack.c.bf16 %v3091_v0, %v3087_v33 }
 0x532   : > { %v3096_v18 = vpop.f32.mrf.mxu0  ;;  %v9571_v22 = vsel %vm3446_vm5, %v3441_v39, %v9547_v57  ;;  %v3071_v39 = vadd.f32 %v3070_v62, %v9377_v31  ;;  %v3174_v57 = vpack.c.bf16 %v3053_v19, %v3049_v63  ;;  %8001 = vtanh.bf16 %v3173_v28 }
 0x533   : > { %v3077_v62 = vadd.f32 %v3076_v52, %v9377_v31  ;;  %v3079_v19 = vadd.f32 %v3078_v20, %v9380_v35  ;;  %v3089_v63 = vadd.f32 %v3088_v59, %v9380_v35  ;;  %v3097_v20 = vadd.f32 %v3096_v18, %v9377_v31 }
 0x534   : > { %v3098_v10 = vpop.f32.mrf.mxu0  ;;  %v3177_v61 = vpack.c.bf16 %v3071_v39, %v3067_v48  ;;  %8003 = vtanh.bf16 %v3174_v57 }
 0x535   : > { %8005 = vtanh.bf16 %v3175_v25  ;;  %v3179_v11 = vpack.c.bf16 %v3081_v51, %v3077_v62  ;;  %v3180_v34 = vpack.c.bf16 %v3083_v55, %v3079_v19  ;;  %v3182_v28 = vpack.c.bf16 %v3093_v16, %v3089_v63 }
 0x536   : > { %v3100_v2 = vpop.f32.mrf.mxu0  ;;  %8007 = vtanh.bf16 %v3176_v38  ;;  %v3099_v49 = vadd.f32 %v3098_v10, %v9380_v35 }
 0x537   : > { %v3101_v12 = vadd.f32 %v3100_v2, %v9377_v31  ;;  %8009 = vtanh.bf16 %v3177_v61 }
 0x538   : > { %v3102_v36 = vpop.f32.mrf.mxu0  ;;  %8011 = vtanh.bf16 %v3178_v41 }
 0x539   : > { %v3103_v52 = vadd.f32 %v3102_v36, %v9380_v35  ;;  %8013 = vtanh.bf16 %v3179_v11  ;;  %v3183_v2 = vpack.c.bf16 %v3101_v12, %v3097_v20 }
 0x53a   : > { %v3106_v47 = vpop.f32.mrf.mxu0  ;;  %8015 = vtanh.bf16 %v3180_v34 }
 0x53b   : > { %v3107_v39 = vadd.f32 %v3106_v47, %v9377_v31  ;;  %v3184_v57 = vpack.c.bf16 %v3103_v52, %v3099_v49  ;;  %8017 = vtanh.bf16 %v3181_v60 }
 0x53c   : > { %v3108_v37 = vpop.f32.mrf.mxu0  ;;  %8019 = vtanh.bf16 %v3182_v28 }
 0x53d   : > { %v3109_v4 = vadd.f32 %v3108_v37, %v9380_v35  ;;  %8021 = vtanh.bf16 %v3183_v2 }
 0x53e   : > { %v3110_v8 = vpop.f32.mrf.mxu0  ;;  %8023 = vtanh.bf16 %v3184_v57 }
 0x53f   : > { %v3111_v46 = vadd.f32 %v3110_v8, %v9377_v31 }
 0x540   : > { %v3112_v43 = vpop.f32.mrf.mxu0  ;;  %v8002_v54 = vpop.eup %8001 }
 0x541   : > { %v3113_v59 = vadd.f32 %v3112_v43, %v9380_v35  ;;  %v3185_v18 = vpack.c.bf16 %v3111_v46, %v3107_v39 }
 0x542   : > { %v3116_v50 = vpop.f32.mrf.mxu0  ;;  %v8004_v62 = vpop.eup %8003 }
 0x543   : > { %v3186_v25 = vpack.c.bf16 %v3113_v59, %v3109_v4  ;;  %8025 = vtanh.bf16 %v3185_v18  ;;  %v3117_v48 = vadd.f32 %v3116_v50, %v9377_v31  ;;  %v8006_v0 = vpop.eup %8005 }
 0x544   : > { %v3118_v36 = vpop.f32.mrf.mxu0  ;;  %v8008_v19 = vpop.eup %8007  ;;  %v3355_v11 = vmax.bf16 %v8006_v0, %v8002_v54 }
 0x545   : > { %8027 = vtanh.bf16 %v3186_v25  ;;  %v3119_v55 = vadd.f32 %v3118_v36, %v9380_v35  ;;  %v8010_v16 = vpop.eup %8009 }
 0x546   : > { %v3120_v10 = vpop.f32.mrf.mxu0  ;;  %v8012_v37 = vpop.eup %8011  ;;  %v3356_v34 = vmax.bf16 %v8010_v16, %v3355_v11 }
 0x547   : > { %v3121_v51 = vadd.f32 %v3120_v10, %v9377_v31  ;;  %v8014_v33 = vpop.eup %8013  ;;  %v3372_v31 = vmax.bf16 %v8008_v19, %v8004_v62 }
 0x548   : > { %v3122_v38 = vpop.f32.mrf.mxu0  ;;  %v8016_v12 = vpop.eup %8015  ;;  %v3357_v60 = vmax.bf16 %v8014_v33, %v3356_v34 }
 0x549   : > { %v3187_v47 = vpack.c.bf16 %v3121_v51, %v3117_v48  ;;  %v3123_v61 = vadd.f32 %v3122_v38, %v9380_v35  ;;  %v8018_v63 = vpop.eup %8017  ;;  %v3373_v8 = vmax.bf16 %v8012_v37, %v3372_v31 }
 0x54a   : > { %v8020_v52 = vpop.eup %8019  ;;  %v3358_v28 = vmax.bf16 %v8018_v63, %v3357_v60 }
 0x54b   : > { %8029 = vtanh.bf16 %v3187_v47  ;;  %v3188_v41 = vpack.c.bf16 %v3123_v61, %v3119_v55  ;;  %v8022_v20 = vpop.eup %8021  ;;  %v3374_v35 = vmax.bf16 %v8016_v12, %v3373_v8 }
 0x54c   : > { %v8024_v46 = vpop.eup %8023  ;;  %v3359_v2 = vmax.bf16 %v8022_v20, %v3358_v28  ;;  %v7633_v28 = vld [vmem:[%s10259_s14 + $0x38] sm:$0xff]  }
 0x54d   : > { %8031 = vtanh.bf16 %v3188_v41  ;;  %v3375_v43 = vmax.bf16 %v8020_v52, %v3374_v35 }
 0x54f   : > { %v3376_v59 = vmax.bf16 %v8024_v46, %v3375_v43 }
 0x551   : > { %v8026_v49 = vpop.eup %8025 }
 0x552   : > { %v3360_v57 = vmax.bf16 %v8026_v49, %v3359_v2  ;;  %v7639_v49 = vld [vmem:[%s10261_s16 + $0x18] sm:$0xff]  }
 0x553   : > { %v8028_v39 = vpop.eup %8027  ;;  %7385 = vmatprep.subr.bf16.mxu0 %v7639_v49 }
 0x554   : > { %v3377_v4 = vmax.bf16 %v8028_v39, %v3376_v59  ;;  %7386 = vmatpush3.bf16.msra.mxu0 %v7639_v49 }
 0x559   : > { %v8030_v50 = vpop.eup %8029 }
 0x55a   : > { %v3361_v18 = vmax.bf16 %v8030_v50, %v3360_v57 }
 0x55b   : > { %v8032_v36 = vpop.eup %8031 }
 0x55c   : > { %v3362_v25 = vunpack.i.l.bf16 %v3361_v18  ;;  %v3363_v10 = vunpack.i.h.bf16 %v3361_v18  ;;  %v3378_v48 = vmax.bf16 %v8032_v36, %v3377_v4  ;;  %v10315_v36 = vld [vmem:[#allocation12_spill] sm:$0xff] }
 0x55e   : > { %v3364_v51 = vmax.f32 %v3362_v25, %v3363_v10  ;;  %v3379_v38 = vunpack.i.l.bf16 %v3378_v48  ;;  %v3380_v54 = vunpack.i.h.bf16 %v3378_v48 }
 0x560   : > { %v3365_v55 = vrot.slane %v3364_v51, 4  ;;  %v3381_v47 = vmax.f32 %v3379_v38, %v3380_v54 }
 0x562   : > { %v3366_v61 = vmax.f32 %v3364_v51, %v3365_v55  ;;  %v3382_v62 = vrot.slane %v3381_v47, 4 }
 0x564   : > { %v3367_v0 = vrot.slane %v3366_v61, 2  ;;  %v3383_v41 = vmax.f32 %v3381_v47, %v3382_v62 }
 0x566   : > { %v3368_v19 = vmax.f32 %v3366_v61, %v3367_v0  ;;  %v3384_v16 = vrot.slane %v3383_v41, 2 }
 0x568   : > { %v3369_v37 = vrot.slane %v3368_v19, 1  ;;  %v3385_v11 = vmax.f32 %v3383_v41, %v3384_v16 }
 0x56a   : > { %v3370_v33 = vmax.f32 %v3368_v19, %v3369_v37  ;;  %v3386_v12 = vrot.slane %v3385_v11, 1 }
 0x56c   : > { %v3371_v31 = vpack.i.bf16 %v3370_v33, %v3370_v33  ;;  %v3387_v34 = vmax.f32 %v3385_v11, %v3386_v12 }
 0x56e   : > { %v3388_v63 = vpack.i.bf16 %v3387_v34, %v3387_v34  ;;  %v3442_v52 = vunpack.c.l.b16 %v3371_v31 }
 0x570   : > { %v3443_v8 = vunpack.c.l.b16 %v3388_v63  ;;  %v3449_v60 = vsel %vm3448_vm6, %v3442_v52, %v9568_v21  ;;  %v7634_v21 = vld [vmem:[%s10259_s14 + $0x30] sm:$0xff]   ;;  %v7644_v52 = vld [vmem:[%s10261_s16] sm:$0xff]  }
 0x571   : > { %v3453_v35 = vpack.c.b16 %v3449_v60, %v3449_v60 }
 0x572   : > { %v3452_v20 = vsel %vm3448_vm6, %v3443_v8, %v9571_v22  ;;  %v10314_v22 = vld [vmem:[#allocation11_spill] sm:$0xff] }
 0x573   : > { %v3454_v46 = vpack.c.b16 %v3452_v20, %v3452_v20 }
 0x575   : > { %3585 = vmatprep.mubr.bf16.mxu1 %v3454_v46 }
 0x576   : > { %3586 = vmatmul.mubr.bf16.vlgmr.msra.gmra.mxu1 %v3453_v35 }
 0x577   : > { %7240 = vmatpush3.bf16.msra.mxu1 %v9552_v30  ;;  %7241 = vmatprep.mubr.msk.bf16.mxu1 %vm1261_vm2, %v8963_v15  ;;  %v7635_v15 = vld [vmem:[%s10259_s14 + $0x28] sm:$0xff]   ;;  %v7636_v30 = vld [vmem:[%s10259_s14 + $0x20] sm:$0xff]  }
 0x578   : > { %7305 = vmatprep.subr.bf16.mxu1 %v7633_v28 }
 0x57e   : > { %7242 = vmatmul.mubr.msk.bf16.vlgmr.msra.gmra.mxu1 %vm1261_vm2, %v8965_v17  ;;  %v7637_v17 = vld [vmem:[%s10259_s14 + $0x18] sm:$0xff]  }
 0x57f   : > { %7245 = vmatprep.mubr.msk.bf16.mxu1 %vm1261_vm2, %v8975_v26  ;;  %7306 = vmatpush3.bf16.msra.mxu1 %v7633_v28  ;;  %v7638_v26 = vld [vmem:[%s10259_s14 + $0x10] sm:$0xff]  }
 0x580   : > { %7307 = vmatprep.subr.bf16.mxu1 %v7634_v21 }
 0x583   : > { %7308 = vmatpush3.bf16.msra.mxu1 %v7634_v21 }
 0x584   : > { %7309 = vmatprep.subr.bf16.mxu1 %v7635_v15 }
 0x586   : > { %7246 = vmatmul.mubr.msk.bf16.gmra.mxu1 %vm1261_vm2, %v8977_v29  ;;  %v7640_v29 = vld [vmem:[%s10259_s14 + $0x8] sm:$0xff]  }
 0x587   : > { %7249 = vmatprep.mubr.msk.bf16.mxu1 %vm1261_vm2, %v8989_v40  ;;  %7310 = vmatpush3.bf16.msra.mxu1 %v7635_v15  ;;  %v10305_v40 = vld [vmem:[#allocation2_spill] sm:$0xff] }
 0x588   : > { %7311 = vmatprep.subr.bf16.mxu1 %v7636_v30 }
 0x58b   : > { %7312 = vmatpush3.bf16.msra.mxu1 %v7636_v30 }
 0x58c   : > { %7313 = vmatprep.subr.bf16.mxu1 %v7637_v17 }
 0x58e   : > { %7250 = vmatmul.mubr.msk.bf16.gmra.mxu1 %vm1261_vm2, %v8987_v3  ;;  %v7641_v3 = vld [vmem:[%s10259_s14] sm:$0xff]  }
 0x58f   : > { %7253 = vmatprep.mubr.msk.bf16.mxu1 %vm1261_vm2, %v9001_v56  ;;  %7314 = vmatpush3.bf16.msra.mxu1 %v7637_v17  ;;  %v10307_v56 = vld [vmem:[#allocation3_spill] sm:$0xff] }
 0x590   : > { %7315 = vmatprep.subr.bf16.mxu1 %v7638_v26 }
 0x593   : > { %7316 = vmatpush3.bf16.msra.mxu1 %v7638_v26 }
 0x594   : > { %7317 = vmatprep.subr.bf16.mxu1 %v7640_v29 }
 0x596   : > { %7254 = vmatmul.mubr.msk.bf16.gmra.mxu1 %vm1261_vm2, %v8999_v53  ;;  %v10306_v53 = vld [vmem:[#allocation4_spill] sm:$0xff] }
 0x597   : > { %7257 = vmatprep.mubr.msk.bf16.mxu1 %vm1261_vm2, %v9013_v7  ;;  %7318 = vmatpush3.bf16.msra.mxu1 %v7640_v29  ;;  %v10309_v7 = vld [vmem:[#allocation5_spill] sm:$0xff] }
 0x598   : > { %7319 = vmatprep.subr.bf16.mxu1 %v7641_v3 }
 0x59b   : > { %7320 = vmatpush3.bf16.msra.mxu1 %v7641_v3 }
 0x59e   : > { %7258 = vmatmul.mubr.msk.bf16.gmra.mxu1 %vm1261_vm2, %v9011_v1  ;;  %v10308_v1 = vld [vmem:[#allocation6_spill] sm:$0xff] }
 0x59f   : > { %7261 = vmatprep.mubr.msk.bf16.mxu1 %vm1261_vm2, %v9025_v6  ;;  %v10311_v6 = vld [vmem:[#allocation7_spill] sm:$0xff] }
 0x5a6   : > { %7262 = vmatmul.mubr.msk.bf16.gmra.mxu1 %vm1261_vm2, %v9023_v32  ;;  %v10310_v32 = vld [vmem:[#allocation8_spill] sm:$0xff] }
 0x5a7   : > { %7265 = vmatprep.mubr.msk.bf16.mxu1 %vm1261_vm2, %v9037_v27  ;;  %v10313_v27 = vld [vmem:[#allocation9_spill] sm:$0xff] }
 0x5ae   : > { %7266 = vmatmul.mubr.msk.bf16.gmra.mxu1 %vm1261_vm2, %v9035_v24  ;;  %v10312_v24 = vld [vmem:[#allocation10_spill] sm:$0xff] }
 0x5af   : > { %7269 = vmatprep.mubr.msk.bf16.mxu1 %vm1261_vm2, %v9049_v44  ;;  %v8555_v44 = vmov 1966171168  }
 0x5b6   : > { %7270 = vmatmul.mubr.msk.bf16.gmra.mxu1 %vm1261_vm2, %v9047_v42  ;;  %v7642_v42 = vld [vmem:[%s10261_s16 + $0x10] sm:$0xff]  }
 0x5b7   : > { %7273 = vmatprep.mubr.msk.bf16.mxu1 %vm1261_vm2, %v9061_v58  ;;  %7387 = vmatprep.subr.bf16.mxu0 %v7642_v42 }
 0x5b8   : > { %7388 = vmatpush3.bf16.msra.mxu0 %v7642_v42 }
 0x5be   : > { %7274 = vmatmul.mubr.msk.bf16.gmra.mxu1 %vm1261_vm2, %v9059_v14  ;;  %v3892_v14 = vunpack.c.l.s4 %v8555_v44 }
 0x5bf   : > { %7277 = vmatprep.mubr.msk.bf16.mxu1 %vm1261_vm2, %v9073_v9  ;;  %v7643_v9 = vld [vmem:[%s10261_s16 + $0x8] sm:$0xff]  }
 0x5c0   : > { %v3893_v58 = vunpack.c.0.s8 %v3892_v14  ;;  %7389 = vmatprep.subr.bf16.mxu0 %v7643_v9 }
 0x5c1   : > { %7390 = vmatpush3.bf16.msra.mxu0 %v7643_v9 }
 0x5c2   : > { %v3896_v43 = vsub.s32 %v3893_v58, %v10314_v22  ;;  %7391 = vmatprep.subr.bf16.mxu0 %v7644_v52 }
 0x5c5   : > { %7392 = vmatpush3.bf16.msra.mxu0 %v7644_v52 }
 0x5c6   : > { %7278 = vmatmul.mubr.msk.bf16.gmra.mxu1 %vm1261_vm2, %v9071_v5 }
 0x5c7   : > { %7281 = vmatprep.mubr.msk.bf16.mxu1 %vm1261_vm2, %v9085_v23 }
 0x5ce   : > { %7282 = vmatmul.mubr.msk.bf16.gmra.mxu1 %vm1261_vm2, %v9083_v13  ;;  %v6476_v13 = vld [vmem:[%s10258_s13] ss:$0 sm:$0xff] }
 0x5cf   : > { %7285 = vmatprep.mubr.msk.bf16.mxu1 %vm1261_vm2, %v9097_v45 }
 0x5d6   : > { %7286 = vmatmul.mubr.msk.bf16.gmra.mxu1 %vm1261_vm2, %v10305_v40 }
 0x5d7   : > { %7289 = vmatprep.mubr.msk.bf16.mxu1 %vm1261_vm2, %v10306_v53 }
 0x5de   : > { %7290 = vmatmul.mubr.msk.bf16.gmra.mxu1 %vm1261_vm2, %v10307_v56 }
 0x5df   : > { %7293 = vmatprep.mubr.msk.bf16.mxu1 %vm1261_vm2, %v10308_v1 }
 0x5e6   : > { %7294 = vmatmul.mubr.msk.bf16.gmra.mxu1 %vm1261_vm2, %v10309_v7 }
 0x5e7   : > { %7297 = vmatprep.mubr.msk.bf16.mxu1 %vm1261_vm2, %v10310_v32 }
 0x5ee   : > { %7298 = vmatmul.mubr.msk.bf16.gmra.mxu1 %vm1261_vm2, %v10311_v6 }
 0x5ef   : > { %7301 = vmatprep.mubr.msk.bf16.mxu1 %vm1261_vm2, %v10312_v24 }
 0x5f6   : > { %7302 = vmatmul.mubr.msk.bf16.gmra.mxu1 %vm1261_vm2, %v10313_v27 }
 0x636   : > { %v6792_v5 = vpop.f32.mrf.mxu1 }
 0x638   : > { %v6793_v23 = vpop.f32.mrf.mxu1 }
 0x639   : > { %v6794_v45 = vadd.f32 %v6793_v23, %v6792_v5 }
 0x63a   : > { %v6795_v2 = vpop.f32.mrf.mxu1 }
 0x63b   : > { %v3588_v39 = vadd.f32 %v6794_v45, %v6476_v13 }
 0x63c   : > { %v6796_v59 = vpop.f32.mrf.mxu1 }
 0x63d   : > { %v3897_v57 = vrot.slane %v3588_v39, %v3896_v43 }
 0x63e   : > { %v7243_v50 = vpop.f32.mrf.mxu1 }
 0x63f   : > { %v9709_v4 = vrot.slane %v3897_v57, %v3896_v43  ;;  %v3898_v29 = vcombine.high %v3897_v57, %v3897_v57 }
 0x640   : > { %v3635_v18 = vpop.f32.mrf.mxu1 }
 0x641   : > { %v3918_v25 = vrot.slane %v9709_v4, %v10315_v36  ;;  %v9716_v1 = vrot.slane %v3898_v29, %v3896_v43 }
 0x642   : > { %v7244_v10 = vpop.f32.mrf.mxu1 }
 0x643   : > { %v3937_v48 = vadd.f32 %v7243_v50, %v3918_v25  ;;  %v3938_v51 = vadd.f32 %v7244_v10, %v3918_v25  ;;  %v3935_v54 = vadd.f32 %v3918_v25, %v3635_v18  ;;  %v3922_v58 = vrot.slane %v9716_v1, %v10315_v36 }
 0x644   : > { %v3638_v38 = vpop.f32.mrf.mxu1 }
 0x645   : > { %v3936_v55 = vadd.f32 %v3918_v25, %v3638_v38  ;;  %v4000_v47 = vpack.c.bf16 %v3938_v51, %v3937_v48 }
 0x646   : > { %v7247_v61 = vpop.f32.mrf.mxu1 }
 0x647   : > { %v3999_v62 = vpack.c.bf16 %v3936_v55, %v3935_v54  ;;  %v3941_v16 = vadd.f32 %v7247_v61, %v3918_v25 }
 0x648   : > { %v3651_v0 = vpop.f32.mrf.mxu1 }
 0x649   : > { %8033 = vtanh.bf16 %v3999_v62  ;;  %v3939_v11 = vadd.f32 %v3918_v25, %v3651_v0 }
 0x64a   : > { %8035 = vtanh.bf16 %v4000_v47  ;;  %v7248_v41 = vpop.f32.mrf.mxu1 }
 0x64b   : > { %v3942_v19 = vadd.f32 %v7248_v41, %v3918_v25 }
 0x64c   : > { %v3654_v37 = vpop.f32.mrf.mxu1 }
 0x64d   : > { %v3940_v33 = vadd.f32 %v3918_v25, %v3654_v37  ;;  %v4002_v12 = vpack.c.bf16 %v3942_v19, %v3941_v16 }
 0x64e   : > { %v7251_v31 = vpop.f32.mrf.mxu1 }
 0x64f   : > { %v4001_v34 = vpack.c.bf16 %v3940_v33, %v3939_v11  ;;  %v3945_v20 = vadd.f32 %v7251_v31, %v3918_v25 }
 0x650   : > { %v3667_v63 = vpop.f32.mrf.mxu1 }
 0x651   : > { %8037 = vtanh.bf16 %v4001_v34  ;;  %v3943_v35 = vadd.f32 %v3918_v25, %v3667_v63 }
 0x652   : > { %8039 = vtanh.bf16 %v4002_v12  ;;  %v7252_v8 = vpop.f32.mrf.mxu1 }
 0x653   : > { %v3946_v60 = vadd.f32 %v7252_v8, %v3918_v25 }
 0x654   : > { %v3670_v46 = vpop.f32.mrf.mxu1 }
 0x655   : > { %v3944_v28 = vadd.f32 %v3918_v25, %v3670_v46  ;;  %v4004_v49 = vpack.c.bf16 %v3946_v60, %v3945_v20 }
 0x656   : > { %v7255_v21 = vpop.f32.mrf.mxu1 }
 0x657   : > { %v8034_v15 = vpop.eup %8033  ;;  %v4003_v30 = vpack.c.bf16 %v3944_v28, %v3943_v35  ;;  %v3949_v53 = vadd.f32 %v7255_v21, %v3918_v25  ;;  %v3913_v28 = vcombine.high %v9709_v4, %v9709_v4 }
 0x658   : > { %v8036_v17 = vpop.eup %8035  ;;  %v3683_v26 = vpop.f32.mrf.mxu1  ;;  %7321 = vmatprep.mubr.bf16.mxu1 %v8034_v15 }
 0x659   : > { %8041 = vtanh.bf16 %v4003_v30  ;;  %7322 = vmatmul.mubr.bf16.vlgmr.msra.gmra.mxu1 %v8036_v17  ;;  %v3947_v7 = vadd.f32 %v3918_v25, %v3683_v26 }
 0x65a   : > { %8043 = vtanh.bf16 %v4004_v49  ;;  %v7256_v3 = vpop.f32.mrf.mxu1 }
 0x65b   : > { %v3950_v40 = vadd.f32 %v7256_v3, %v3918_v25 }
 0x65c   : > { %v3686_v56 = vpop.f32.mrf.mxu1 }
 0x65d   : > { %v3948_v32 = vadd.f32 %v3918_v25, %v3686_v56  ;;  %v4006_v6 = vpack.c.bf16 %v3950_v40, %v3949_v53  ;;  %v3926_v40 = vrot.slane %v3913_v28, %v10315_v36 }
 0x65e   : > { %v7259_v24 = vpop.f32.mrf.mxu1 }
 0x65f   : > { %v8038_v27 = vpop.eup %8037  ;;  %v4005_v42 = vpack.c.bf16 %v3948_v32, %v3947_v7  ;;  %v3953_v13 = vadd.f32 %v7259_v24, %v3922_v58 }
 0x660   : > { %v8040_v44 = vpop.eup %8039  ;;  %v3699_v14 = vpop.f32.mrf.mxu1  ;;  %7325 = vmatprep.mubr.bf16.mxu1 %v8038_v27 }
 0x661   : > { %8045 = vtanh.bf16 %v4005_v42  ;;  %7326 = vmatmul.mubr.bf16.gmra.mxu1 %v8040_v44  ;;  %v3951_v45 = vadd.f32 %v3922_v58, %v3699_v14 }
 0x662   : > { %8047 = vtanh.bf16 %v4006_v6  ;;  %v7260_v5 = vpop.f32.mrf.mxu1 }
 0x663   : > { %v3954_v9 = vadd.f32 %v7260_v5, %v3922_v58 }
 0x664   : > { %v3702_v23 = vpop.f32.mrf.mxu1 }
 0x665   : > { %v3952_v22 = vadd.f32 %v3922_v58, %v3702_v23  ;;  %v4008_v43 = vpack.c.bf16 %v3954_v9, %v3953_v13 }
 0x666   : > { %v7263_v2 = vpop.f32.mrf.mxu1 }
 0x667   : > { %v8042_v39 = vpop.eup %8041  ;;  %v4007_v59 = vpack.c.bf16 %v3952_v22, %v3951_v45  ;;  %v3957_v10 = vadd.f32 %v7263_v2, %v3922_v58 }
 0x668   : > { %v8044_v57 = vpop.eup %8043  ;;  %v3715_v50 = vpop.f32.mrf.mxu1  ;;  %7329 = vmatprep.mubr.bf16.mxu1 %v8042_v39 }
 0x669   : > { %8049 = vtanh.bf16 %v4007_v59  ;;  %7330 = vmatmul.mubr.bf16.gmra.mxu1 %v8044_v57  ;;  %v3955_v51 = vadd.f32 %v3922_v58, %v3715_v50 }
 0x66a   : > { %8051 = vtanh.bf16 %v4008_v43  ;;  %v7264_v18 = vpop.f32.mrf.mxu1 }
 0x66b   : > { %v3958_v25 = vadd.f32 %v7264_v18, %v3922_v58 }
 0x66c   : > { %v3718_v48 = vpop.f32.mrf.mxu1 }
 0x66d   : > { %v3956_v38 = vadd.f32 %v3922_v58, %v3718_v48  ;;  %v4010_v54 = vpack.c.bf16 %v3958_v25, %v3957_v10 }
 0x66e   : > { %v7267_v55 = vpop.f32.mrf.mxu1 }
 0x66f   : > { %v8046_v47 = vpop.eup %8045  ;;  %v4009_v61 = vpack.c.bf16 %v3956_v38, %v3955_v51  ;;  %v3961_v16 = vadd.f32 %v7267_v55, %v3922_v58 }
 0x670   : > { %v8048_v62 = vpop.eup %8047  ;;  %v3731_v0 = vpop.f32.mrf.mxu1  ;;  %7333 = vmatprep.mubr.bf16.mxu1 %v8046_v47 }
 0x671   : > { %8053 = vtanh.bf16 %v4009_v61  ;;  %7334 = vmatmul.mubr.bf16.gmra.mxu1 %v8048_v62  ;;  %v3959_v11 = vadd.f32 %v3922_v58, %v3731_v0 }
 0x672   : > { %8055 = vtanh.bf16 %v4010_v54  ;;  %v7268_v41 = vpop.f32.mrf.mxu1 }
 0x673   : > { %v3962_v19 = vadd.f32 %v7268_v41, %v3922_v58 }
 0x674   : > { %v3734_v37 = vpop.f32.mrf.mxu1 }
 0x675   : > { %v3960_v33 = vadd.f32 %v3922_v58, %v3734_v37  ;;  %v4012_v12 = vpack.c.bf16 %v3962_v19, %v3961_v16 }
 0x676   : > { %v7271_v31 = vpop.f32.mrf.mxu1 }
 0x677   : > { %v8050_v34 = vpop.eup %8049  ;;  %v4011_v63 = vpack.c.bf16 %v3960_v33, %v3959_v11  ;;  %v3965_v46 = vadd.f32 %v7271_v31, %v3922_v58  ;;  %v3914_v11 = vcombine.high %v9716_v1, %v9716_v1 }
 0x678   : > { %v8052_v52 = vpop.eup %8051  ;;  %v3747_v8 = vpop.f32.mrf.mxu1  ;;  %7337 = vmatprep.mubr.bf16.mxu1 %v8050_v34 }
 0x679   : > { %8057 = vtanh.bf16 %v4011_v63  ;;  %7338 = vmatmul.mubr.bf16.gmra.mxu1 %v8052_v52  ;;  %v3963_v49 = vadd.f32 %v3922_v58, %v3747_v8 }
 0x67a   : > { %8059 = vtanh.bf16 %v4012_v12  ;;  %v7272_v60 = vpop.f32.mrf.mxu1 }
 0x67b   : > { %v3966_v20 = vadd.f32 %v7272_v60, %v3922_v58 }
 0x67c   : > { %v3750_v35 = vpop.f32.mrf.mxu1 }
 0x67d   : > { %v3964_v21 = vadd.f32 %v3922_v58, %v3750_v35  ;;  %v4014_v15 = vpack.c.bf16 %v3966_v20, %v3965_v46  ;;  %v3930_v20 = vrot.slane %v3914_v11, %v10315_v36 }
 0x67e   : > { %v7275_v30 = vpop.f32.mrf.mxu1 }
 0x67f   : > { %v8054_v17 = vpop.eup %8053  ;;  %v4013_v26 = vpack.c.bf16 %v3964_v21, %v3963_v49  ;;  %v3969_v7 = vadd.f32 %v7275_v30, %v3926_v40 }
 0x680   : > { %v8056_v29 = vpop.eup %8055  ;;  %v3763_v3 = vpop.f32.mrf.mxu1  ;;  %7341 = vmatprep.mubr.bf16.mxu1 %v8054_v17 }
 0x681   : > { %8061 = vtanh.bf16 %v4013_v26  ;;  %7342 = vmatmul.mubr.bf16.gmra.mxu1 %v8056_v29  ;;  %v3967_v6 = vadd.f32 %v3926_v40, %v3763_v3 }
 0x682   : > { %8063 = vtanh.bf16 %v4014_v15  ;;  %v7276_v53 = vpop.f32.mrf.mxu1 }
 0x683   : > { %v3970_v56 = vadd.f32 %v7276_v53, %v3926_v40 }
 0x684   : > { %v3766_v32 = vpop.f32.mrf.mxu1 }
 0x685   : > { %v3968_v4 = vadd.f32 %v3926_v40, %v3766_v32  ;;  %v4016_v24 = vpack.c.bf16 %v3970_v56, %v3969_v7 }
 0x686   : > { %v7279_v27 = vpop.f32.mrf.mxu1 }
 0x687   : > { %v8058_v42 = vpop.eup %8057  ;;  %v4015_v44 = vpack.c.bf16 %v3968_v4, %v3967_v6  ;;  %v3973_v13 = vadd.f32 %v7279_v27, %v3926_v40 }
 0x688   : > { %v8060_v14 = vpop.eup %8059  ;;  %v3779_v58 = vpop.f32.mrf.mxu1  ;;  %7345 = vmatprep.mubr.bf16.mxu1 %v8058_v42 }
 0x689   : > { %8065 = vtanh.bf16 %v4015_v44  ;;  %7346 = vmatmul.mubr.bf16.gmra.mxu1 %v8060_v14  ;;  %v3971_v45 = vadd.f32 %v3926_v40, %v3779_v58 }
 0x68a   : > { %8067 = vtanh.bf16 %v4016_v24  ;;  %v7280_v5 = vpop.f32.mrf.mxu1 }
 0x68b   : > { %v3974_v9 = vadd.f32 %v7280_v5, %v3926_v40 }
 0x68c   : > { %v3782_v23 = vpop.f32.mrf.mxu1 }
 0x68d   : > { %v3972_v22 = vadd.f32 %v3926_v40, %v3782_v23  ;;  %v4018_v43 = vpack.c.bf16 %v3974_v9, %v3973_v13 }
 0x68e   : > { %v7283_v2 = vpop.f32.mrf.mxu1 }
 0x68f   : > { %v8062_v39 = vpop.eup %8061  ;;  %v4017_v59 = vpack.c.bf16 %v3972_v22, %v3971_v45  ;;  %v3977_v10 = vadd.f32 %v7283_v2, %v3926_v40 }
 0x690   : > { %v8064_v57 = vpop.eup %8063  ;;  %v3795_v50 = vpop.f32.mrf.mxu1  ;;  %7349 = vmatprep.mubr.bf16.mxu1 %v8062_v39 }
 0x691   : > { %8069 = vtanh.bf16 %v4017_v59  ;;  %7350 = vmatmul.mubr.bf16.gmra.mxu1 %v8064_v57  ;;  %v3975_v51 = vadd.f32 %v3926_v40, %v3795_v50 }
 0x692   : > { %8071 = vtanh.bf16 %v4018_v43  ;;  %v7284_v18 = vpop.f32.mrf.mxu1 }
 0x693   : > { %v3978_v25 = vadd.f32 %v7284_v18, %v3926_v40 }
 0x694   : > { %v3798_v48 = vpop.f32.mrf.mxu1 }
 0x695   : > { %v3976_v38 = vadd.f32 %v3926_v40, %v3798_v48  ;;  %v4020_v54 = vpack.c.bf16 %v3978_v25, %v3977_v10 }
 0x696   : > { %v7287_v55 = vpop.f32.mrf.mxu1 }
 0x697   : > { %v8066_v47 = vpop.eup %8065  ;;  %v4019_v61 = vpack.c.bf16 %v3976_v38, %v3975_v51  ;;  %v3981_v16 = vadd.f32 %v7287_v55, %v3926_v40 }
 0x698   : > { %v8068_v62 = vpop.eup %8067  ;;  %v3811_v0 = vpop.f32.mrf.mxu1  ;;  %7353 = vmatprep.mubr.bf16.mxu1 %v8066_v47 }
 0x699   : > { %8073 = vtanh.bf16 %v4019_v61  ;;  %7354 = vmatmul.mubr.bf16.gmra.mxu1 %v8068_v62  ;;  %v3979_v33 = vadd.f32 %v3926_v40, %v3811_v0 }
 0x69a   : > { %8075 = vtanh.bf16 %v4020_v54  ;;  %v7288_v41 = vpop.f32.mrf.mxu1 }
 0x69b   : > { %v3982_v19 = vadd.f32 %v7288_v41, %v3926_v40  ;;  %v7645_v41 = vld [vmem:[%s10263_s18 + $0x8] sm:$0xff]  }
 0x69c   : > { %v3814_v37 = vpop.f32.mrf.mxu1  ;;  %7457 = vmatprep.subr.bf16.mxu1 %v7645_v41 }
 0x69d   : > { %v3980_v12 = vadd.f32 %v3926_v40, %v3814_v37  ;;  %v4022_v31 = vpack.c.bf16 %v3982_v19, %v3981_v16  ;;  %7458 = vmatpush3.bf16.msra.mxu1 %v7645_v41  ;;  %v9732_v37 = vld [vmem:[%s10260_s15] ss:$0 sm:$0xff] }
 0x69e   : > { %v7291_v34 = vpop.f32.mrf.mxu1 }
 0x69f   : > { %v8070_v63 = vpop.eup %8069  ;;  %v4021_v52 = vpack.c.bf16 %v3980_v12, %v3979_v33  ;;  %v3985_v28 = vadd.f32 %v7291_v34, %v3930_v20 }
 0x6a0   : > { %v8072_v8 = vpop.eup %8071  ;;  %v3827_v60 = vpop.f32.mrf.mxu1  ;;  %7357 = vmatprep.mubr.bf16.mxu1 %v8070_v63 }
 0x6a1   : > { %8077 = vtanh.bf16 %v4021_v52  ;;  %7358 = vmatmul.mubr.bf16.gmra.mxu1 %v8072_v8  ;;  %v3983_v21 = vadd.f32 %v3930_v20, %v3827_v60 }
 0x6a2   : > { %8079 = vtanh.bf16 %v4022_v31  ;;  %v7292_v46 = vpop.f32.mrf.mxu1 }
 0x6a3   : > { %v3986_v35 = vadd.f32 %v7292_v46, %v3930_v20 }
 0x6a4   : > { %v3830_v49 = vpop.f32.mrf.mxu1 }
 0x6a5   : > { %v3984_v1 = vadd.f32 %v3930_v20, %v3830_v49  ;;  %v4024_v15 = vpack.c.bf16 %v3986_v35, %v3985_v28 }
 0x6a6   : > { %v7295_v30 = vpop.f32.mrf.mxu1 }
 0x6a7   : > { %v8074_v17 = vpop.eup %8073  ;;  %v4023_v26 = vpack.c.bf16 %v3984_v1, %v3983_v21  ;;  %v3989_v53 = vadd.f32 %v7295_v30, %v3930_v20 }
 0x6a8   : > { %v8076_v29 = vpop.eup %8075  ;;  %v3843_v3 = vpop.f32.mrf.mxu1  ;;  %7361 = vmatprep.mubr.bf16.mxu1 %v8074_v17 }
 0x6a9   : > { %8081 = vtanh.bf16 %v4023_v26  ;;  %7362 = vmatmul.mubr.bf16.gmra.mxu1 %v8076_v29  ;;  %v3987_v7 = vadd.f32 %v3930_v20, %v3843_v3  ;;  %v7646_v29 = vld [vmem:[%s10263_s18] sm:$0xff]  }
 0x6aa   : > { %8083 = vtanh.bf16 %v4024_v15  ;;  %v7296_v36 = vpop.f32.mrf.mxu1  ;;  %7459 = vmatprep.subr.bf16.mxu1 %v7646_v29 }
 0x6ab   : > { %v3990_v40 = vadd.f32 %v7296_v36, %v3930_v20  ;;  %7460 = vmatpush3.bf16.msra.mxu1 %v7646_v29 }
 0x6ac   : > { %v3846_v56 = vpop.f32.mrf.mxu1 }
 0x6ad   : > { %v3988_v32 = vadd.f32 %v3930_v20, %v3846_v56  ;;  %v4026_v6 = vpack.c.bf16 %v3990_v40, %v3989_v53 }
 0x6ae   : > { %v7299_v4 = vpop.f32.mrf.mxu1 }
 0x6af   : > { %v8078_v24 = vpop.eup %8077  ;;  %v4025_v27 = vpack.c.bf16 %v3988_v32, %v3987_v7  ;;  %v3993_v5 = vadd.f32 %v7299_v4, %v3930_v20 }
 0x6b0   : > { %v8080_v42 = vpop.eup %8079  ;;  %v3859_v44 = vpop.f32.mrf.mxu1  ;;  %7365 = vmatprep.mubr.bf16.mxu1 %v8078_v24 }
 0x6b1   : > { %8085 = vtanh.bf16 %v4025_v27  ;;  %7366 = vmatmul.mubr.bf16.gmra.mxu1 %v8080_v42  ;;  %v3991_v13 = vadd.f32 %v3930_v20, %v3859_v44 }
 0x6b2   : > { %8087 = vtanh.bf16 %v4026_v6  ;;  %v7300_v14 = vpop.f32.mrf.mxu1 }
 0x6b3   : > { %v3994_v58 = vadd.f32 %v7300_v14, %v3930_v20 }
 0x6b4   : > { %v3862_v9 = vpop.f32.mrf.mxu1 }
 0x6b5   : > { %v3992_v23 = vadd.f32 %v3930_v20, %v3862_v9  ;;  %v4028_v45 = vpack.c.bf16 %v3994_v58, %v3993_v5 }
 0x6b6   : > { %v7303_v22 = vpop.f32.mrf.mxu1 }
 0x6b7   : > { %v8082_v43 = vpop.eup %8081  ;;  %v4027_v2 = vpack.c.bf16 %v3992_v23, %v3991_v13  ;;  %v3997_v18 = vadd.f32 %v7303_v22, %v3930_v20 }
 0x6b8   : > { %v8084_v39 = vpop.eup %8083  ;;  %v3875_v59 = vpop.f32.mrf.mxu1  ;;  %7369 = vmatprep.mubr.bf16.mxu1 %v8082_v43 }
 0x6b9   : > { %8089 = vtanh.bf16 %v4027_v2  ;;  %7370 = vmatmul.mubr.bf16.gmra.mxu1 %v8084_v39  ;;  %v3995_v10 = vadd.f32 %v3930_v20, %v3875_v59 }
 0x6ba   : > { %8091 = vtanh.bf16 %v4028_v45  ;;  %v7304_v57 = vpop.f32.mrf.mxu1 }
 0x6bb   : > { %v3998_v50 = vadd.f32 %v7304_v57, %v3930_v20 }
 0x6bc   : > { %v3878_v25 = vpop.f32.mrf.mxu1 }
 0x6bd   : > { %v3996_v48 = vadd.f32 %v3930_v20, %v3878_v25  ;;  %v4030_v51 = vpack.c.bf16 %v3998_v50, %v3997_v18 }
 0x6bf   : > { %v8086_v38 = vpop.eup %8085  ;;  %v4029_v54 = vpack.c.bf16 %v3996_v48, %v3995_v10 }
 0x6c0   : > { %v8088_v55 = vpop.eup %8087  ;;  %7373 = vmatprep.mubr.bf16.mxu1 %v8086_v38 }
 0x6c1   : > { %8093 = vtanh.bf16 %v4029_v54  ;;  %7374 = vmatmul.mubr.bf16.gmra.mxu1 %v8088_v55 }
 0x6c2   : > { %8095 = vtanh.bf16 %v4030_v51 }
 0x6c7   : > { %v8090_v47 = vpop.eup %8089 }
 0x6c8   : > { %v8092_v61 = vpop.eup %8091  ;;  %7377 = vmatprep.mubr.bf16.mxu1 %v8090_v47 }
 0x6c9   : > { %7378 = vmatmul.mubr.bf16.gmra.mxu1 %v8092_v61 }
 0x6cf   : > { %v8094_v62 = vpop.eup %8093 }
 0x6d0   : > { %v8096_v0 = vpop.eup %8095  ;;  %7381 = vmatprep.mubr.bf16.mxu1 %v8094_v62 }
 0x6d1   : > { %7382 = vmatmul.mubr.bf16.gmra.mxu1 %v8096_v0 }
 0x719   : > { %v7323_v19 = vpop.f32.mrf.mxu1 }
 0x71a   : > { %v4177_v12 = vadd.f32 %v7323_v19, %v9732_v37 }
 0x71b   : > { %v4168_v16 = vpop.f32.mrf.mxu1 }
 0x71c   : > { %v4169_v34 = vadd.f32 %v9732_v37, %v4168_v16 }
 0x71d   : > { %v7324_v11 = vpop.f32.mrf.mxu1 }
 0x71e   : > { %v4180_v33 = vadd.f32 %v7324_v11, %v9732_v37 }
 0x71f   : > { %v4171_v31 = vpop.f32.mrf.mxu1 }
 0x720   : > { %v4172_v63 = vadd.f32 %v9732_v37, %v4171_v31  ;;  %v4424_v52 = vpack.c.bf16 %v4180_v33, %v4177_v12 }
 0x721   : > { %v7327_v8 = vpop.f32.mrf.mxu1 }
 0x722   : > { %v4423_v60 = vpack.c.bf16 %v4172_v63, %v4169_v34  ;;  %v4193_v28 = vadd.f32 %v7327_v8, %v9732_v37 }
 0x723   : > { %v4184_v20 = vpop.f32.mrf.mxu1 }
 0x724   : > { %8097 = vtanh.bf16 %v4423_v60  ;;  %v4185_v21 = vadd.f32 %v9732_v37, %v4184_v20 }
 0x725   : > { %8099 = vtanh.bf16 %v4424_v52  ;;  %v7328_v46 = vpop.f32.mrf.mxu1 }
 0x726   : > { %v4196_v35 = vadd.f32 %v7328_v46, %v9732_v37 }
 0x727   : > { %v4187_v49 = vpop.f32.mrf.mxu1 }
 0x728   : > { %v4188_v1 = vadd.f32 %v9732_v37, %v4187_v49  ;;  %v4426_v15 = vpack.c.bf16 %v4196_v35, %v4193_v28 }
 0x729   : > { %v7331_v30 = vpop.f32.mrf.mxu1 }
 0x72a   : > { %v4425_v17 = vpack.c.bf16 %v4188_v1, %v4185_v21  ;;  %v4209_v40 = vadd.f32 %v7331_v30, %v9732_v37 }
 0x72b   : > { %v4200_v26 = vpop.f32.mrf.mxu1 }
 0x72c   : > { %8101 = vtanh.bf16 %v4425_v17  ;;  %v4201_v56 = vadd.f32 %v9732_v37, %v4200_v26 }
 0x72d   : > { %8103 = vtanh.bf16 %v4426_v15  ;;  %v7332_v3 = vpop.f32.mrf.mxu1 }
 0x72e   : > { %v4212_v36 = vadd.f32 %v7332_v3, %v9732_v37 }
 0x72f   : > { %v4203_v53 = vpop.f32.mrf.mxu1 }
 0x730   : > { %v4204_v7 = vadd.f32 %v9732_v37, %v4203_v53  ;;  %v4428_v32 = vpack.c.bf16 %v4212_v36, %v4209_v40 }
 0x731   : > { %v7335_v6 = vpop.f32.mrf.mxu1 }
 0x732   : > { %v8098_v4 = vpop.eup %8097  ;;  %v4427_v24 = vpack.c.bf16 %v4204_v7, %v4201_v56  ;;  %v4225_v58 = vadd.f32 %v7335_v6, %v9732_v37 }
 0x733   : > { %v8100_v27 = vpop.eup %8099  ;;  %v4216_v42 = vpop.f32.mrf.mxu1  ;;  %7393 = vmatprep.mubr.msk.bf16.mxu0 %vm4526_vm7, %v8098_v4 }
 0x734   : > { %8105 = vtanh.bf16 %v4427_v24  ;;  %7394 = vmatmul.mubr.msk.bf16.vlgmr.msra.gmra.mxu0 %vm4526_vm7, %v8100_v27  ;;  %v4217_v9 = vadd.f32 %v9732_v37, %v4216_v42 }
 0x735   : > { %8107 = vtanh.bf16 %v4428_v32  ;;  %v7336_v44 = vpop.f32.mrf.mxu1 }
 0x736   : > { %v4228_v14 = vadd.f32 %v7336_v44, %v9732_v37 }
 0x737   : > { %v4219_v5 = vpop.f32.mrf.mxu1 }
 0x738   : > { %v4220_v13 = vadd.f32 %v9732_v37, %v4219_v5  ;;  %v4430_v23 = vpack.c.bf16 %v4228_v14, %v4225_v58 }
 0x739   : > { %v7339_v45 = vpop.f32.mrf.mxu1 }
 0x73a   : > { %v8102_v22 = vpop.eup %8101  ;;  %v4429_v43 = vpack.c.bf16 %v4220_v13, %v4217_v9  ;;  %v4241_v50 = vadd.f32 %v7339_v45, %v9732_v37 }
 0x73b   : > { %v8104_v2 = vpop.eup %8103  ;;  %v4232_v39 = vpop.f32.mrf.mxu1  ;;  %7397 = vmatprep.mubr.msk.bf16.mxu0 %vm4526_vm7, %v8102_v22 }
 0x73c   : > { %8109 = vtanh.bf16 %v4429_v43  ;;  %7398 = vmatmul.mubr.msk.bf16.gmra.mxu0 %vm4526_vm7, %v8104_v2  ;;  %v4233_v25 = vadd.f32 %v9732_v37, %v4232_v39 }
 0x73d   : > { %8111 = vtanh.bf16 %v4430_v23  ;;  %v7340_v59 = vpop.f32.mrf.mxu1 }
 0x73e   : > { %v4244_v57 = vadd.f32 %v7340_v59, %v9732_v37 }
 0x73f   : > { %v4235_v18 = vpop.f32.mrf.mxu1 }
 0x740   : > { %v4236_v10 = vadd.f32 %v9732_v37, %v4235_v18  ;;  %v4432_v48 = vpack.c.bf16 %v4244_v57, %v4241_v50 }
 0x741   : > { %v7343_v51 = vpop.f32.mrf.mxu1 }
 0x742   : > { %v8106_v38 = vpop.eup %8105  ;;  %v4431_v54 = vpack.c.bf16 %v4236_v10, %v4233_v25  ;;  %v4257_v0 = vadd.f32 %v7343_v51, %v9732_v37 }
 0x743   : > { %v8108_v55 = vpop.eup %8107  ;;  %v4248_v47 = vpop.f32.mrf.mxu1  ;;  %7401 = vmatprep.mubr.msk.bf16.mxu0 %vm4526_vm7, %v8106_v38 }
 0x744   : > { %8113 = vtanh.bf16 %v4431_v54  ;;  %7402 = vmatmul.mubr.msk.bf16.gmra.mxu0 %vm4526_vm7, %v8108_v55  ;;  %v4249_v19 = vadd.f32 %v9732_v37, %v4248_v47 }
 0x745   : > { %8115 = vtanh.bf16 %v4432_v48  ;;  %v7344_v61 = vpop.f32.mrf.mxu1 }
 0x746   : > { %v4260_v62 = vadd.f32 %v7344_v61, %v9732_v37 }
 0x747   : > { %v4251_v41 = vpop.f32.mrf.mxu1 }
 0x748   : > { %v4252_v16 = vadd.f32 %v9732_v37, %v4251_v41  ;;  %v4434_v11 = vpack.c.bf16 %v4260_v62, %v4257_v0 }
 0x749   : > { %v7347_v33 = vpop.f32.mrf.mxu1 }
 0x74a   : > { %v8110_v12 = vpop.eup %8109  ;;  %v4433_v31 = vpack.c.bf16 %v4252_v16, %v4249_v19  ;;  %v4273_v60 = vadd.f32 %v7347_v33, %v9732_v37 }
 0x74b   : > { %v8112_v34 = vpop.eup %8111  ;;  %v4264_v63 = vpop.f32.mrf.mxu1  ;;  %7405 = vmatprep.mubr.msk.bf16.mxu0 %vm4526_vm7, %v8110_v12 }
 0x74c   : > { %8117 = vtanh.bf16 %v4433_v31  ;;  %7406 = vmatmul.mubr.msk.bf16.gmra.mxu0 %vm4526_vm7, %v8112_v34  ;;  %v4265_v46 = vadd.f32 %v9732_v37, %v4264_v63 }
 0x74d   : > { %8119 = vtanh.bf16 %v4434_v11  ;;  %v7348_v52 = vpop.f32.mrf.mxu1 }
 0x74e   : > { %v4276_v8 = vadd.f32 %v7348_v52, %v9732_v37 }
 0x74f   : > { %v4267_v20 = vpop.f32.mrf.mxu1 }
 0x750   : > { %v4268_v35 = vadd.f32 %v9732_v37, %v4267_v20  ;;  %v4436_v28 = vpack.c.bf16 %v4276_v8, %v4273_v60 }
 0x751   : > { %v7351_v49 = vpop.f32.mrf.mxu1 }
 0x752   : > { %v8114_v21 = vpop.eup %8113  ;;  %v4435_v1 = vpack.c.bf16 %v4268_v35, %v4265_v46  ;;  %v4289_v29 = vadd.f32 %v7351_v49, %v9732_v37 }
 0x753   : > { %v8116_v15 = vpop.eup %8115  ;;  %v4280_v30 = vpop.f32.mrf.mxu1  ;;  %7409 = vmatprep.mubr.msk.bf16.mxu0 %vm4526_vm7, %v8114_v21 }
 0x754   : > { %8121 = vtanh.bf16 %v4435_v1  ;;  %7410 = vmatmul.mubr.msk.bf16.gmra.mxu0 %vm4526_vm7, %v8116_v15  ;;  %v4281_v36 = vadd.f32 %v9732_v37, %v4280_v30 }
 0x755   : > { %8123 = vtanh.bf16 %v4436_v28  ;;  %v7352_v17 = vpop.f32.mrf.mxu1 }
 0x756   : > { %v4292_v26 = vadd.f32 %v7352_v17, %v9732_v37 }
 0x757   : > { %v4283_v3 = vpop.f32.mrf.mxu1 }
 0x758   : > { %v4284_v40 = vadd.f32 %v9732_v37, %v4283_v3  ;;  %v4438_v53 = vpack.c.bf16 %v4292_v26, %v4289_v29 }
 0x759   : > { %v7355_v56 = vpop.f32.mrf.mxu1 }
 0x75a   : > { %v8118_v7 = vpop.eup %8117  ;;  %v4437_v32 = vpack.c.bf16 %v4284_v40, %v4281_v36  ;;  %v4305_v42 = vadd.f32 %v7355_v56, %v9732_v37 }
 0x75b   : > { %v8120_v6 = vpop.eup %8119  ;;  %v4296_v4 = vpop.f32.mrf.mxu1  ;;  %7413 = vmatprep.mubr.msk.bf16.mxu0 %vm4526_vm7, %v8118_v7 }
 0x75c   : > { %8125 = vtanh.bf16 %v4437_v32  ;;  %7414 = vmatmul.mubr.msk.bf16.gmra.mxu0 %vm4526_vm7, %v8120_v6  ;;  %v4297_v14 = vadd.f32 %v9732_v37, %v4296_v4 }
 0x75d   : > { %8127 = vtanh.bf16 %v4438_v53  ;;  %v7356_v24 = vpop.f32.mrf.mxu1 }
 0x75e   : > { %v4308_v27 = vadd.f32 %v7356_v24, %v9732_v37 }
 0x75f   : > { %v4299_v44 = vpop.f32.mrf.mxu1 }
 0x760   : > { %v4300_v58 = vadd.f32 %v9732_v37, %v4299_v44  ;;  %v4440_v5 = vpack.c.bf16 %v4308_v27, %v4305_v42 }
 0x761   : > { %v7359_v9 = vpop.f32.mrf.mxu1 }
 0x762   : > { %v8122_v13 = vpop.eup %8121  ;;  %v4439_v23 = vpack.c.bf16 %v4300_v58, %v4297_v14  ;;  %v4321_v39 = vadd.f32 %v7359_v9, %v9732_v37 }
 0x763   : > { %v8124_v45 = vpop.eup %8123  ;;  %v4312_v22 = vpop.f32.mrf.mxu1  ;;  %7417 = vmatprep.mubr.msk.bf16.mxu0 %vm4526_vm7, %v8122_v13 }
 0x764   : > { %8129 = vtanh.bf16 %v4439_v23  ;;  %7418 = vmatmul.mubr.msk.bf16.gmra.mxu0 %vm4526_vm7, %v8124_v45  ;;  %v4313_v57 = vadd.f32 %v9732_v37, %v4312_v22 }
 0x765   : > { %8131 = vtanh.bf16 %v4440_v5  ;;  %v7360_v43 = vpop.f32.mrf.mxu1 }
 0x766   : > { %v4324_v2 = vadd.f32 %v7360_v43, %v9732_v37 }
 0x767   : > { %v4315_v59 = vpop.f32.mrf.mxu1 }
 0x768   : > { %v4316_v50 = vadd.f32 %v9732_v37, %v4315_v59  ;;  %v4442_v18 = vpack.c.bf16 %v4324_v2, %v4321_v39 }
 0x769   : > { %v7363_v25 = vpop.f32.mrf.mxu1 }
 0x76a   : > { %v8126_v10 = vpop.eup %8125  ;;  %v4441_v48 = vpack.c.bf16 %v4316_v50, %v4313_v57  ;;  %v4337_v47 = vadd.f32 %v7363_v25, %v9732_v37 }
 0x76b   : > { %v8128_v51 = vpop.eup %8127  ;;  %v4328_v38 = vpop.f32.mrf.mxu1  ;;  %7421 = vmatprep.mubr.msk.bf16.mxu0 %vm4526_vm7, %v8126_v10 }
 0x76c   : > { %8133 = vtanh.bf16 %v4441_v48  ;;  %7422 = vmatmul.mubr.msk.bf16.gmra.mxu0 %vm4526_vm7, %v8128_v51  ;;  %v4329_v62 = vadd.f32 %v9732_v37, %v4328_v38 }
 0x76d   : > { %8135 = vtanh.bf16 %v4442_v18  ;;  %v7364_v54 = vpop.f32.mrf.mxu1 }
 0x76e   : > { %v4340_v55 = vadd.f32 %v7364_v54, %v9732_v37 }
 0x76f   : > { %v4331_v61 = vpop.f32.mrf.mxu1 }
 0x770   : > { %v4332_v0 = vadd.f32 %v9732_v37, %v4331_v61  ;;  %v4444_v41 = vpack.c.bf16 %v4340_v55, %v4337_v47 }
 0x771   : > { %v7367_v19 = vpop.f32.mrf.mxu1 }
 0x772   : > { %v8130_v16 = vpop.eup %8129  ;;  %v4443_v11 = vpack.c.bf16 %v4332_v0, %v4329_v62  ;;  %v4353_v63 = vadd.f32 %v7367_v19, %v9732_v37 }
 0x773   : > { %v8132_v33 = vpop.eup %8131  ;;  %v4344_v12 = vpop.f32.mrf.mxu1  ;;  %7425 = vmatprep.mubr.msk.bf16.mxu0 %vm4526_vm7, %v8130_v16 }
 0x774   : > { %8137 = vtanh.bf16 %v4443_v11  ;;  %7426 = vmatmul.mubr.msk.bf16.gmra.mxu0 %vm4526_vm7, %v8132_v33  ;;  %v4345_v8 = vadd.f32 %v9732_v37, %v4344_v12 }
 0x775   : > { %8139 = vtanh.bf16 %v4444_v41  ;;  %v7368_v31 = vpop.f32.mrf.mxu1 }
 0x776   : > { %v4356_v34 = vadd.f32 %v7368_v31, %v9732_v37 }
 0x777   : > { %v4347_v52 = vpop.f32.mrf.mxu1 }
 0x778   : > { %v4348_v60 = vadd.f32 %v9732_v37, %v4347_v52  ;;  %v4446_v20 = vpack.c.bf16 %v4356_v34, %v4353_v63  ;;  %v9839_v34 = vld [vmem:[%s10262_s17] ss:$0 sm:$0xff] }
 0x779   : > { %v7371_v46 = vpop.f32.mrf.mxu1 }
 0x77a   : > { %v8134_v35 = vpop.eup %8133  ;;  %v4445_v28 = vpack.c.bf16 %v4348_v60, %v4345_v8  ;;  %v4369_v30 = vadd.f32 %v7371_v46, %v9732_v37 }
 0x77b   : > { %v8136_v49 = vpop.eup %8135  ;;  %v4360_v21 = vpop.f32.mrf.mxu1  ;;  %7429 = vmatprep.mubr.msk.bf16.mxu0 %vm4526_vm7, %v8134_v35 }
 0x77c   : > { %8141 = vtanh.bf16 %v4445_v28  ;;  %7430 = vmatmul.mubr.msk.bf16.gmra.mxu0 %vm4526_vm7, %v8136_v49  ;;  %v4361_v26 = vadd.f32 %v9732_v37, %v4360_v21 }
 0x77d   : > { %8143 = vtanh.bf16 %v4446_v20  ;;  %v7372_v1 = vpop.f32.mrf.mxu1 }
 0x77e   : > { %v4372_v15 = vadd.f32 %v7372_v1, %v9732_v37 }
 0x77f   : > { %v4363_v17 = vpop.f32.mrf.mxu1 }
 0x780   : > { %v4364_v29 = vadd.f32 %v9732_v37, %v4363_v17  ;;  %v4448_v3 = vpack.c.bf16 %v4372_v15, %v4369_v30 }
 0x781   : > { %v7375_v36 = vpop.f32.mrf.mxu1 }
 0x782   : > { %v8138_v40 = vpop.eup %8137  ;;  %v4447_v53 = vpack.c.bf16 %v4364_v29, %v4361_v26  ;;  %v4385_v4 = vadd.f32 %v7375_v36, %v9732_v37 }
 0x783   : > { %v8140_v56 = vpop.eup %8139  ;;  %v4376_v7 = vpop.f32.mrf.mxu1  ;;  %7433 = vmatprep.mubr.msk.bf16.mxu0 %vm4526_vm7, %v8138_v40 }
 0x784   : > { %8145 = vtanh.bf16 %v4447_v53  ;;  %7434 = vmatmul.mubr.msk.bf16.gmra.mxu0 %vm4526_vm7, %v8140_v56  ;;  %v4377_v27 = vadd.f32 %v9732_v37, %v4376_v7  ;;  %v7648_v56 = vld [vmem:[%s10265_s20] sm:$0xff]  }
 0x785   : > { %8147 = vtanh.bf16 %v4448_v3  ;;  %v7376_v32 = vpop.f32.mrf.mxu1 }
 0x786   : > { %v4388_v6 = vadd.f32 %v7376_v32, %v9732_v37 }
 0x787   : > { %v4379_v24 = vpop.f32.mrf.mxu1 }
 0x788   : > { %v4380_v42 = vadd.f32 %v9732_v37, %v4379_v24  ;;  %v4450_v44 = vpack.c.bf16 %v4388_v6, %v4385_v4 }
 0x789   : > { %v7379_v14 = vpop.f32.mrf.mxu1 }
 0x78a   : > { %v8142_v58 = vpop.eup %8141  ;;  %v4449_v5 = vpack.c.bf16 %v4380_v42, %v4377_v27  ;;  %v4401_v22 = vadd.f32 %v7379_v14, %v9732_v37 }
 0x78b   : > { %v8144_v9 = vpop.eup %8143  ;;  %v4392_v13 = vpop.f32.mrf.mxu1  ;;  %7437 = vmatprep.mubr.msk.bf16.mxu0 %vm4526_vm7, %v8142_v58 }
 0x78c   : > { %8149 = vtanh.bf16 %v4449_v5  ;;  %7438 = vmatmul.mubr.msk.bf16.gmra.mxu0 %vm4526_vm7, %v8144_v9  ;;  %v4393_v2 = vadd.f32 %v9732_v37, %v4392_v13 }
 0x78d   : > { %8151 = vtanh.bf16 %v4450_v44  ;;  %v7380_v23 = vpop.f32.mrf.mxu1 }
 0x78e   : > { %v4404_v45 = vadd.f32 %v7380_v23, %v9732_v37 }
 0x78f   : > { %v4395_v43 = vpop.f32.mrf.mxu1 }
 0x790   : > { %v4396_v39 = vadd.f32 %v9732_v37, %v4395_v43  ;;  %v4452_v59 = vpack.c.bf16 %v4404_v45, %v4401_v22 }
 0x791   : > { %v7383_v57 = vpop.f32.mrf.mxu1 }
 0x792   : > { %v8146_v50 = vpop.eup %8145  ;;  %v4451_v18 = vpack.c.bf16 %v4396_v39, %v4393_v2  ;;  %v4417_v38 = vadd.f32 %v7383_v57, %v9732_v37 }
 0x793   : > { %v8148_v25 = vpop.eup %8147  ;;  %v4408_v10 = vpop.f32.mrf.mxu1  ;;  %7441 = vmatprep.mubr.msk.bf16.mxu0 %vm4526_vm7, %v8146_v50 }
 0x794   : > { %8153 = vtanh.bf16 %v4451_v18  ;;  %7442 = vmatmul.mubr.msk.bf16.gmra.mxu0 %vm4526_vm7, %v8148_v25  ;;  %v4409_v55 = vadd.f32 %v9732_v37, %v4408_v10 }
 0x795   : > { %8155 = vtanh.bf16 %v4452_v59  ;;  %v7384_v48 = vpop.f32.mrf.mxu1 }
 0x796   : > { %v4420_v51 = vadd.f32 %v7384_v48, %v9732_v37 }
 0x797   : > { %v4411_v54 = vpop.f32.mrf.mxu1 }
 0x798   : > { %v4412_v47 = vadd.f32 %v9732_v37, %v4411_v54  ;;  %v4454_v61 = vpack.c.bf16 %v4420_v51, %v4417_v38  ;;  %v7647_v37 = vld [vmem:[%s10265_s20 + $0x8] sm:$0xff]  }
 0x799   : > { %7525 = vmatprep.subr.bf16.mxu0 %v7647_v37 }
 0x79a   : > { %v8150_v62 = vpop.eup %8149  ;;  %v4453_v0 = vpack.c.bf16 %v4412_v47, %v4409_v55  ;;  %7526 = vmatpush3.bf16.msra.mxu0 %v7647_v37 }
 0x79b   : > { %v8152_v41 = vpop.eup %8151  ;;  %7445 = vmatprep.mubr.msk.bf16.mxu0 %vm4526_vm7, %v8150_v62  ;;  %7527 = vmatprep.subr.bf16.mxu0 %v7648_v56 }
 0x79c   : > { %8157 = vtanh.bf16 %v4453_v0  ;;  %7446 = vmatmul.mubr.msk.bf16.gmra.mxu0 %vm4526_vm7, %v8152_v41 }
 0x79d   : > { %8159 = vtanh.bf16 %v4454_v61 }
 0x79e   : > { %7528 = vmatpush3.bf16.msra.mxu0 %v7648_v56 }
 0x7a2   : > { %v8154_v19 = vpop.eup %8153 }
 0x7a3   : > { %v8156_v16 = vpop.eup %8155  ;;  %7449 = vmatprep.mubr.msk.bf16.mxu0 %vm4526_vm7, %v8154_v19 }
 0x7a4   : > { %7450 = vmatmul.mubr.msk.bf16.gmra.mxu0 %vm4526_vm7, %v8156_v16 }
 0x7aa   : > { %v8158_v11 = vpop.eup %8157 }
 0x7ab   : > { %v8160_v33 = vpop.eup %8159  ;;  %7453 = vmatprep.mubr.msk.bf16.mxu0 %vm4526_vm7, %v8158_v11 }
 0x7ac   : > { %7454 = vmatmul.mubr.msk.bf16.gmra.mxu0 %vm4526_vm7, %v8160_v33 }
 0x7f4   : > { %v7395_v12 = vpop.f32.mrf.mxu0 }
 0x7f5   : > { %v4666_v8 = vadd.f32 %v7395_v12, %v9839_v34 }
 0x7f6   : > { %v4657_v31 = vpop.f32.mrf.mxu0 }
 0x7f7   : > { %v4658_v20 = vadd.f32 %v9839_v34, %v4657_v31 }
 0x7f8   : > { %v7396_v63 = vpop.f32.mrf.mxu0 }
 0x7f9   : > { %v4669_v52 = vadd.f32 %v7396_v63, %v9839_v34 }
 0x7fa   : > { %v4660_v60 = vpop.f32.mrf.mxu0 }
 0x7fb   : > { %v4661_v46 = vadd.f32 %v9839_v34, %v4660_v60  ;;  %v4913_v35 = vpack.c.bf16 %v4669_v52, %v4666_v8 }
 0x7fc   : > { %v7399_v28 = vpop.f32.mrf.mxu0 }
 0x7fd   : > { %v4912_v49 = vpack.c.bf16 %v4661_v46, %v4658_v20  ;;  %v4682_v30 = vadd.f32 %v7399_v28, %v9839_v34 }
 0x7fe   : > { %v4673_v21 = vpop.f32.mrf.mxu0 }
 0x7ff   : > { %8161 = vtanh.bf16 %v4912_v49  ;;  %v4674_v26 = vadd.f32 %v9839_v34, %v4673_v21 }
 0x800   : > { %8163 = vtanh.bf16 %v4913_v35  ;;  %v7400_v1 = vpop.f32.mrf.mxu0 }
 0x801   : > { %v4685_v15 = vadd.f32 %v7400_v1, %v9839_v34 }
 0x802   : > { %v4676_v17 = vpop.f32.mrf.mxu0 }
 0x803   : > { %v4677_v29 = vadd.f32 %v9839_v34, %v4676_v17  ;;  %v4915_v3 = vpack.c.bf16 %v4685_v15, %v4682_v30 }
 0x804   : > { %v7403_v36 = vpop.f32.mrf.mxu0 }
 0x805   : > { %v4914_v40 = vpack.c.bf16 %v4677_v29, %v4674_v26  ;;  %v4698_v6 = vadd.f32 %v7403_v36, %v9839_v34 }
 0x806   : > { %v4689_v53 = vpop.f32.mrf.mxu0 }
 0x807   : > { %8165 = vtanh.bf16 %v4914_v40  ;;  %v4690_v24 = vadd.f32 %v9839_v34, %v4689_v53 }
 0x808   : > { %8167 = vtanh.bf16 %v4915_v3  ;;  %v7404_v7 = vpop.f32.mrf.mxu0 }
 0x809   : > { %v4701_v32 = vadd.f32 %v7404_v7, %v9839_v34 }
 0x80a   : > { %v4692_v4 = vpop.f32.mrf.mxu0 }
 0x80b   : > { %v4693_v27 = vadd.f32 %v9839_v34, %v4692_v4  ;;  %v4917_v42 = vpack.c.bf16 %v4701_v32, %v4698_v6 }
 0x80c   : > { %v7407_v44 = vpop.f32.mrf.mxu0 }
 0x80d   : > { %v8162_v14 = vpop.eup %8161  ;;  %v4916_v58 = vpack.c.bf16 %v4693_v27, %v4690_v24  ;;  %v4714_v45 = vadd.f32 %v7407_v44, %v9839_v34 }
 0x80e   : > { %v8164_v5 = vpop.eup %8163  ;;  %v4705_v9 = vpop.f32.mrf.mxu0  ;;  %7461 = vmatprep.mubr.msk.bf16.mxu1 %vm2675_vm3, %v8162_v14 }
 0x80f   : > { %8169 = vtanh.bf16 %v4916_v58  ;;  %7462 = vmatmul.mubr.msk.bf16.vlgmr.msra.gmra.mxu1 %vm2675_vm3, %v8164_v5  ;;  %v4706_v43 = vadd.f32 %v9839_v34, %v4705_v9 }
 0x810   : > { %8171 = vtanh.bf16 %v4917_v42  ;;  %v7408_v13 = vpop.f32.mrf.mxu0 }
 0x811   : > { %v4717_v23 = vadd.f32 %v7408_v13, %v9839_v34 }
 0x812   : > { %v4708_v22 = vpop.f32.mrf.mxu0 }
 0x813   : > { %v4709_v2 = vadd.f32 %v9839_v34, %v4708_v22  ;;  %v4919_v39 = vpack.c.bf16 %v4717_v23, %v4714_v45 }
 0x814   : > { %v7411_v59 = vpop.f32.mrf.mxu0 }
 0x815   : > { %v8166_v57 = vpop.eup %8165  ;;  %v4918_v50 = vpack.c.bf16 %v4709_v2, %v4706_v43  ;;  %v4730_v51 = vadd.f32 %v7411_v59, %v9839_v34 }
 0x816   : > { %v8168_v18 = vpop.eup %8167  ;;  %v4721_v25 = vpop.f32.mrf.mxu0  ;;  %7465 = vmatprep.mubr.msk.bf16.mxu1 %vm2675_vm3, %v8166_v57 }
 0x817   : > { %8173 = vtanh.bf16 %v4918_v50  ;;  %7466 = vmatmul.mubr.msk.bf16.gmra.mxu1 %vm2675_vm3, %v8168_v18  ;;  %v4722_v54 = vadd.f32 %v9839_v34, %v4721_v25 }
 0x818   : > { %8175 = vtanh.bf16 %v4919_v39  ;;  %v7412_v10 = vpop.f32.mrf.mxu0 }
 0x819   : > { %v4733_v48 = vadd.f32 %v7412_v10, %v9839_v34 }
 0x81a   : > { %v4724_v38 = vpop.f32.mrf.mxu0 }
 0x81b   : > { %v4725_v55 = vadd.f32 %v9839_v34, %v4724_v38  ;;  %v4921_v47 = vpack.c.bf16 %v4733_v48, %v4730_v51 }
 0x81c   : > { %v7415_v61 = vpop.f32.mrf.mxu0 }
 0x81d   : > { %v8170_v62 = vpop.eup %8169  ;;  %v4920_v0 = vpack.c.bf16 %v4725_v55, %v4722_v54  ;;  %v4746_v33 = vadd.f32 %v7415_v61, %v9839_v34 }
 0x81e   : > { %v8172_v41 = vpop.eup %8171  ;;  %v4737_v19 = vpop.f32.mrf.mxu0  ;;  %7469 = vmatprep.mubr.msk.bf16.mxu1 %vm2675_vm3, %v8170_v62 }
 0x81f   : > { %8177 = vtanh.bf16 %v4920_v0  ;;  %7470 = vmatmul.mubr.msk.bf16.gmra.mxu1 %vm2675_vm3, %v8172_v41  ;;  %v4738_v12 = vadd.f32 %v9839_v34, %v4737_v19 }
 0x820   : > { %8179 = vtanh.bf16 %v4921_v47  ;;  %v7416_v16 = vpop.f32.mrf.mxu0 }
 0x821   : > { %v4749_v11 = vadd.f32 %v7416_v16, %v9839_v34 }
 0x822   : > { %v4740_v37 = vpop.f32.mrf.mxu0 }
 0x823   : > { %v4741_v31 = vadd.f32 %v9839_v34, %v4740_v37  ;;  %v4923_v63 = vpack.c.bf16 %v4749_v11, %v4746_v33 }
 0x824   : > { %v7419_v52 = vpop.f32.mrf.mxu0 }
 0x825   : > { %v8174_v8 = vpop.eup %8173  ;;  %v4922_v60 = vpack.c.bf16 %v4741_v31, %v4738_v12  ;;  %v4762_v49 = vadd.f32 %v7419_v52, %v9839_v34 }
 0x826   : > { %v8176_v20 = vpop.eup %8175  ;;  %v4753_v46 = vpop.f32.mrf.mxu0  ;;  %7473 = vmatprep.mubr.msk.bf16.mxu1 %vm2675_vm3, %v8174_v8 }
 0x827   : > { %8181 = vtanh.bf16 %v4922_v60  ;;  %7474 = vmatmul.mubr.msk.bf16.gmra.mxu1 %vm2675_vm3, %v8176_v20  ;;  %v4754_v1 = vadd.f32 %v9839_v34, %v4753_v46 }
 0x828   : > { %8183 = vtanh.bf16 %v4923_v63  ;;  %v7420_v35 = vpop.f32.mrf.mxu0 }
 0x829   : > { %v4765_v28 = vadd.f32 %v7420_v35, %v9839_v34 }
 0x82a   : > { %v4756_v21 = vpop.f32.mrf.mxu0 }
 0x82b   : > { %v4757_v15 = vadd.f32 %v9839_v34, %v4756_v21  ;;  %v4925_v30 = vpack.c.bf16 %v4765_v28, %v4762_v49 }
 0x82c   : > { %v7423_v17 = vpop.f32.mrf.mxu0 }
 0x82d   : > { %v8178_v26 = vpop.eup %8177  ;;  %v4924_v29 = vpack.c.bf16 %v4757_v15, %v4754_v1  ;;  %v4778_v56 = vadd.f32 %v7423_v17, %v9839_v34 }
 0x82e   : > { %v8180_v3 = vpop.eup %8179  ;;  %v4769_v36 = vpop.f32.mrf.mxu0  ;;  %7477 = vmatprep.mubr.msk.bf16.mxu1 %vm2675_vm3, %v8178_v26 }
 0x82f   : > { %8185 = vtanh.bf16 %v4924_v29  ;;  %7478 = vmatmul.mubr.msk.bf16.gmra.mxu1 %vm2675_vm3, %v8180_v3  ;;  %v4770_v32 = vadd.f32 %v9839_v34, %v4769_v36 }
 0x830   : > { %8187 = vtanh.bf16 %v4925_v30  ;;  %v7424_v40 = vpop.f32.mrf.mxu0 }
 0x831   : > { %v4781_v53 = vadd.f32 %v7424_v40, %v9839_v34 }
 0x832   : > { %v4772_v7 = vpop.f32.mrf.mxu0 }
 0x833   : > { %v4773_v6 = vadd.f32 %v9839_v34, %v4772_v7  ;;  %v4927_v4 = vpack.c.bf16 %v4781_v53, %v4778_v56 }
 0x834   : > { %v7427_v24 = vpop.f32.mrf.mxu0 }
 0x835   : > { %v8182_v27 = vpop.eup %8181  ;;  %v4926_v42 = vpack.c.bf16 %v4773_v6, %v4770_v32  ;;  %v4794_v9 = vadd.f32 %v7427_v24, %v9839_v34 }
 0x836   : > { %v8184_v44 = vpop.eup %8183  ;;  %v4785_v14 = vpop.f32.mrf.mxu0  ;;  %7481 = vmatprep.mubr.msk.bf16.mxu1 %vm2675_vm3, %v8182_v27 }
 0x837   : > { %8189 = vtanh.bf16 %v4926_v42  ;;  %7482 = vmatmul.mubr.msk.bf16.gmra.mxu1 %vm2675_vm3, %v8184_v44  ;;  %v4786_v23 = vadd.f32 %v9839_v34, %v4785_v14 }
 0x838   : > { %8191 = vtanh.bf16 %v4927_v4  ;;  %v7428_v58 = vpop.f32.mrf.mxu0 }
 0x839   : > { %v4797_v5 = vadd.f32 %v7428_v58, %v9839_v34 }
 0x83a   : > { %v4788_v13 = vpop.f32.mrf.mxu0 }
 0x83b   : > { %v4789_v45 = vadd.f32 %v9839_v34, %v4788_v13  ;;  %v4929_v22 = vpack.c.bf16 %v4797_v5, %v4794_v9 }
 0x83c   : > { %v7431_v43 = vpop.f32.mrf.mxu0 }
 0x83d   : > { %v8186_v2 = vpop.eup %8185  ;;  %v4928_v39 = vpack.c.bf16 %v4789_v45, %v4786_v23  ;;  %v4810_v25 = vadd.f32 %v7431_v43, %v9839_v34 }
 0x83e   : > { %v8188_v59 = vpop.eup %8187  ;;  %v4801_v57 = vpop.f32.mrf.mxu0  ;;  %7485 = vmatprep.mubr.msk.bf16.mxu1 %vm2675_vm3, %v8186_v2 }
 0x83f   : > { %8193 = vtanh.bf16 %v4928_v39  ;;  %7486 = vmatmul.mubr.msk.bf16.gmra.mxu1 %vm2675_vm3, %v8188_v59  ;;  %v4802_v48 = vadd.f32 %v9839_v34, %v4801_v57 }
 0x840   : > { %8195 = vtanh.bf16 %v4929_v22  ;;  %v7432_v50 = vpop.f32.mrf.mxu0 }
 0x841   : > { %v4813_v18 = vadd.f32 %v7432_v50, %v9839_v34 }
 0x842   : > { %v4804_v10 = vpop.f32.mrf.mxu0 }
 0x843   : > { %v4805_v51 = vadd.f32 %v9839_v34, %v4804_v10  ;;  %v4931_v38 = vpack.c.bf16 %v4813_v18, %v4810_v25 }
 0x844   : > { %v7435_v54 = vpop.f32.mrf.mxu0 }
 0x845   : > { %v8190_v55 = vpop.eup %8189  ;;  %v4930_v47 = vpack.c.bf16 %v4805_v51, %v4802_v48  ;;  %v4826_v19 = vadd.f32 %v7435_v54, %v9839_v34 }
 0x846   : > { %v8192_v61 = vpop.eup %8191  ;;  %v4817_v62 = vpop.f32.mrf.mxu0  ;;  %7489 = vmatprep.mubr.msk.bf16.mxu1 %vm2675_vm3, %v8190_v55 }
 0x847   : > { %8197 = vtanh.bf16 %v4930_v47  ;;  %7490 = vmatmul.mubr.msk.bf16.gmra.mxu1 %vm2675_vm3, %v8192_v61  ;;  %v4818_v11 = vadd.f32 %v9839_v34, %v4817_v62 }
 0x848   : > { %8199 = vtanh.bf16 %v4931_v38  ;;  %v7436_v0 = vpop.f32.mrf.mxu0 }
 0x849   : > { %v4829_v41 = vadd.f32 %v7436_v0, %v9839_v34 }
 0x84a   : > { %v4820_v16 = vpop.f32.mrf.mxu0 }
 0x84b   : > { %v4821_v33 = vadd.f32 %v9839_v34, %v4820_v16  ;;  %v4933_v37 = vpack.c.bf16 %v4829_v41, %v4826_v19 }
 0x84c   : > { %v7439_v12 = vpop.f32.mrf.mxu0 }
 0x84d   : > { %v8194_v31 = vpop.eup %8193  ;;  %v4932_v63 = vpack.c.bf16 %v4821_v33, %v4818_v11  ;;  %v4842_v46 = vadd.f32 %v7439_v12, %v9839_v34 }
 0x84e   : > { %v8196_v52 = vpop.eup %8195  ;;  %v4833_v8 = vpop.f32.mrf.mxu0  ;;  %7493 = vmatprep.mubr.msk.bf16.mxu1 %vm2675_vm3, %v8194_v31 }
 0x84f   : > { %8201 = vtanh.bf16 %v4932_v63  ;;  %7494 = vmatmul.mubr.msk.bf16.gmra.mxu1 %vm2675_vm3, %v8196_v52  ;;  %v4834_v28 = vadd.f32 %v9839_v34, %v4833_v8 }
 0x850   : > { %8203 = vtanh.bf16 %v4933_v37  ;;  %v7440_v60 = vpop.f32.mrf.mxu0 }
 0x851   : > { %v4845_v20 = vadd.f32 %v7440_v60, %v9839_v34  ;;  %v9943_v60 = vld [vmem:[%s10264_s19] ss:$0 sm:$0xff] }
 0x852   : > { %v4836_v35 = vpop.f32.mrf.mxu0 }
 0x853   : > { %v4837_v49 = vadd.f32 %v9839_v34, %v4836_v35  ;;  %v4935_v21 = vpack.c.bf16 %v4845_v20, %v4842_v46 }
 0x854   : > { %v7443_v1 = vpop.f32.mrf.mxu0 }
 0x855   : > { %v8198_v15 = vpop.eup %8197  ;;  %v4934_v30 = vpack.c.bf16 %v4837_v49, %v4834_v28  ;;  %v4858_v36 = vadd.f32 %v7443_v1, %v9839_v34 }
 0x856   : > { %v8200_v17 = vpop.eup %8199  ;;  %v4849_v26 = vpop.f32.mrf.mxu0  ;;  %7497 = vmatprep.mubr.msk.bf16.mxu1 %vm2675_vm3, %v8198_v15 }
 0x857   : > { %8205 = vtanh.bf16 %v4934_v30  ;;  %7498 = vmatmul.mubr.msk.bf16.gmra.mxu1 %vm2675_vm3, %v8200_v17  ;;  %v4850_v53 = vadd.f32 %v9839_v34, %v4849_v26 }
 0x858   : > { %8207 = vtanh.bf16 %v4935_v21  ;;  %v7444_v29 = vpop.f32.mrf.mxu0 }
 0x859   : > { %v4861_v3 = vadd.f32 %v7444_v29, %v9839_v34 }
 0x85a   : > { %v4852_v40 = vpop.f32.mrf.mxu0 }
 0x85b   : > { %v4853_v56 = vadd.f32 %v9839_v34, %v4852_v40  ;;  %v4937_v7 = vpack.c.bf16 %v4861_v3, %v4858_v36 }
 0x85c   : > { %v7447_v32 = vpop.f32.mrf.mxu0 }
 0x85d   : > { %v8202_v6 = vpop.eup %8201  ;;  %v4936_v4 = vpack.c.bf16 %v4853_v56, %v4850_v53  ;;  %v4874_v14 = vadd.f32 %v7447_v32, %v9839_v34 }
 0x85e   : > { %v8204_v24 = vpop.eup %8203  ;;  %v4865_v27 = vpop.f32.mrf.mxu0  ;;  %7501 = vmatprep.mubr.msk.bf16.mxu1 %vm2675_vm3, %v8202_v6 }
 0x85f   : > { %8209 = vtanh.bf16 %v4936_v4  ;;  %7502 = vmatmul.mubr.msk.bf16.gmra.mxu1 %vm2675_vm3, %v8204_v24  ;;  %v4866_v5 = vadd.f32 %v9839_v34, %v4865_v27 }
 0x860   : > { %8211 = vtanh.bf16 %v4937_v7  ;;  %v7448_v42 = vpop.f32.mrf.mxu0 }
 0x861   : > { %v4877_v44 = vadd.f32 %v7448_v42, %v9839_v34 }
 0x862   : > { %v4868_v58 = vpop.f32.mrf.mxu0 }
 0x863   : > { %v4869_v9 = vadd.f32 %v9839_v34, %v4868_v58  ;;  %v4939_v13 = vpack.c.bf16 %v4877_v44, %v4874_v14 }
 0x864   : > { %v7451_v23 = vpop.f32.mrf.mxu0 }
 0x865   : > { %v8206_v45 = vpop.eup %8205  ;;  %v4938_v22 = vpack.c.bf16 %v4869_v9, %v4866_v5  ;;  %v4890_v57 = vadd.f32 %v7451_v23, %v9839_v34 }
 0x866   : > { %v8208_v43 = vpop.eup %8207  ;;  %v4881_v2 = vpop.f32.mrf.mxu0  ;;  %7505 = vmatprep.mubr.msk.bf16.mxu1 %vm2675_vm3, %v8206_v45 }
 0x867   : > { %8213 = vtanh.bf16 %v4938_v22  ;;  %7506 = vmatmul.mubr.msk.bf16.gmra.mxu1 %vm2675_vm3, %v8208_v43  ;;  %v4882_v18 = vadd.f32 %v9839_v34, %v4881_v2 }
 0x868   : > { %8215 = vtanh.bf16 %v4939_v13  ;;  %v7452_v39 = vpop.f32.mrf.mxu0 }
 0x869   : > { %v4893_v59 = vadd.f32 %v7452_v39, %v9839_v34 }
 0x86a   : > { %v4884_v50 = vpop.f32.mrf.mxu0 }
 0x86b   : > { %v4885_v25 = vadd.f32 %v9839_v34, %v4884_v50  ;;  %v4941_v10 = vpack.c.bf16 %v4893_v59, %v4890_v57 }
 0x86c   : > { %v7455_v48 = vpop.f32.mrf.mxu0 }
 0x86d   : > { %v8210_v51 = vpop.eup %8209  ;;  %v4940_v38 = vpack.c.bf16 %v4885_v25, %v4882_v18  ;;  %v4906_v62 = vadd.f32 %v7455_v48, %v9839_v34 }
 0x86e   : > { %v8212_v54 = vpop.eup %8211  ;;  %v4897_v55 = vpop.f32.mrf.mxu0  ;;  %7509 = vmatprep.mubr.msk.bf16.mxu1 %vm2675_vm3, %v8210_v51 }
 0x86f   : > { %8217 = vtanh.bf16 %v4940_v38  ;;  %7510 = vmatmul.mubr.msk.bf16.gmra.mxu1 %vm2675_vm3, %v8212_v54  ;;  %v4898_v41 = vadd.f32 %v9839_v34, %v4897_v55 }
 0x870   : > { %8219 = vtanh.bf16 %v4941_v10  ;;  %v7456_v47 = vpop.f32.mrf.mxu0 }
 0x871   : > { %v4909_v61 = vadd.f32 %v7456_v47, %v9839_v34 }
 0x872   : > { %v4900_v0 = vpop.f32.mrf.mxu0 }
 0x873   : > { %v4901_v19 = vadd.f32 %v9839_v34, %v4900_v0  ;;  %v4943_v16 = vpack.c.bf16 %v4909_v61, %v4906_v62 }
 0x875   : > { %v8214_v11 = vpop.eup %8213  ;;  %v4942_v33 = vpack.c.bf16 %v4901_v19, %v4898_v41 }
 0x876   : > { %v8216_v37 = vpop.eup %8215  ;;  %7513 = vmatprep.mubr.msk.bf16.mxu1 %vm2675_vm3, %v8214_v11 }
 0x877   : > { %8221 = vtanh.bf16 %v4942_v33  ;;  %7514 = vmatmul.mubr.msk.bf16.gmra.mxu1 %vm2675_vm3, %v8216_v37 }
 0x878   : > { %8223 = vtanh.bf16 %v4943_v16 }
 0x87d   : > { %v8218_v12 = vpop.eup %8217 }
 0x87e   : > { %v8220_v31 = vpop.eup %8219  ;;  %7517 = vmatprep.mubr.msk.bf16.mxu1 %vm2675_vm3, %v8218_v12 }
 0x87f   : > { %7518 = vmatmul.mubr.msk.bf16.gmra.mxu1 %vm2675_vm3, %v8220_v31 }
 0x885   : > { %v8222_v63 = vpop.eup %8221 }
 0x886   : > { %v8224_v52 = vpop.eup %8223  ;;  %7521 = vmatprep.mubr.msk.bf16.mxu1 %vm2675_vm3, %v8222_v63 }
 0x887   : > { %7522 = vmatmul.mubr.msk.bf16.gmra.mxu1 %vm2675_vm3, %v8224_v52 }
 0x8cf   : > { %v7463_v34 = vpop.f32.mrf.mxu1 }
 0x8d0   : > { %v5138_v35 = vadd.f32 %v7463_v34, %v9943_v60 }
 0x8d1   : > { %v5129_v8 = vpop.f32.mrf.mxu1 }
 0x8d2   : > { %v5130_v49 = vadd.f32 %v9943_v60, %v5129_v8 }
 0x8d3   : > { %v7464_v20 = vpop.f32.mrf.mxu1 }
 0x8d4   : > { %v5141_v46 = vadd.f32 %v7464_v20, %v9943_v60 }
 0x8d5   : > { %v5132_v28 = vpop.f32.mrf.mxu1 }
 0x8d6   : > { %v5133_v21 = vadd.f32 %v9943_v60, %v5132_v28  ;;  %v5385_v1 = vpack.c.bf16 %v5141_v46, %v5138_v35 }
 0x8d7   : > { %v7467_v15 = vpop.f32.mrf.mxu1 }
 0x8d8   : > { %v5384_v30 = vpack.c.bf16 %v5133_v21, %v5130_v49  ;;  %v5154_v3 = vadd.f32 %v7467_v15, %v9943_v60 }
 0x8d9   : > { %v5145_v17 = vpop.f32.mrf.mxu1 }
 0x8da   : > { %8225 = vtanh.bf16 %v5384_v30  ;;  %v5146_v40 = vadd.f32 %v9943_v60, %v5145_v17 }
 0x8db   : > { %8227 = vtanh.bf16 %v5385_v1  ;;  %v7468_v26 = vpop.f32.mrf.mxu1 }
 0x8dc   : > { %v5157_v29 = vadd.f32 %v7468_v26, %v9943_v60 }
 0x8dd   : > { %v5148_v36 = vpop.f32.mrf.mxu1 }
 0x8de   : > { %v5149_v53 = vadd.f32 %v9943_v60, %v5148_v36  ;;  %v5387_v56 = vpack.c.bf16 %v5157_v29, %v5154_v3 }
 0x8df   : > { %v7471_v7 = vpop.f32.mrf.mxu1 }
 0x8e0   : > { %v5386_v32 = vpack.c.bf16 %v5149_v53, %v5146_v40  ;;  %v5170_v27 = vadd.f32 %v7471_v7, %v9943_v60 }
 0x8e1   : > { %v5161_v6 = vpop.f32.mrf.mxu1 }
 0x8e2   : > { %8229 = vtanh.bf16 %v5386_v32  ;;  %v5162_v44 = vadd.f32 %v9943_v60, %v5161_v6 }
 0x8e3   : > { %8231 = vtanh.bf16 %v5387_v56  ;;  %v7472_v4 = vpop.f32.mrf.mxu1 }
 0x8e4   : > { %v5173_v24 = vadd.f32 %v7472_v4, %v9943_v60 }
 0x8e5   : > { %v5164_v42 = vpop.f32.mrf.mxu1 }
 0x8e6   : > { %v5165_v14 = vadd.f32 %v9943_v60, %v5164_v42  ;;  %v5389_v58 = vpack.c.bf16 %v5173_v24, %v5170_v27 }
 0x8e7   : > { %v7475_v5 = vpop.f32.mrf.mxu1 }
 0x8e8   : > { %v8226_v9 = vpop.eup %8225  ;;  %v5388_v13 = vpack.c.bf16 %v5165_v14, %v5162_v44  ;;  %v5186_v2 = vadd.f32 %v7475_v5, %v9943_v60 }
 0x8e9   : > { %v8228_v23 = vpop.eup %8227  ;;  %v5177_v45 = vpop.f32.mrf.mxu1  ;;  %7529 = vmatprep.mubr.msk.bf16.mxu0 %vm2675_vm3, %v8226_v9 }
 0x8ea   : > { %8233 = vtanh.bf16 %v5388_v13  ;;  %7530 = vmatmul.mubr.msk.bf16.vlgmr.msra.gmra.mxu0 %vm2675_vm3, %v8228_v23  ;;  %v5178_v59 = vadd.f32 %v9943_v60, %v5177_v45 }
 0x8eb   : > { %8235 = vtanh.bf16 %v5389_v58  ;;  %v7476_v22 = vpop.f32.mrf.mxu1 }
 0x8ec   : > { %v5189_v43 = vadd.f32 %v7476_v22, %v9943_v60 }
 0x8ed   : > { %v5180_v39 = vpop.f32.mrf.mxu1 }
 0x8ee   : > { %v5181_v57 = vadd.f32 %v9943_v60, %v5180_v39  ;;  %v5391_v50 = vpack.c.bf16 %v5189_v43, %v5186_v2 }
 0x8ef   : > { %v7479_v18 = vpop.f32.mrf.mxu1 }
 0x8f0   : > { %v8230_v25 = vpop.eup %8229  ;;  %v5390_v10 = vpack.c.bf16 %v5181_v57, %v5178_v59  ;;  %v5202_v55 = vadd.f32 %v7479_v18, %v9943_v60 }
 0x8f1   : > { %v8232_v48 = vpop.eup %8231  ;;  %v5193_v51 = vpop.f32.mrf.mxu1  ;;  %7533 = vmatprep.mubr.msk.bf16.mxu0 %vm2675_vm3, %v8230_v25 }
 0x8f2   : > { %8237 = vtanh.bf16 %v5390_v10  ;;  %7534 = vmatmul.mubr.msk.bf16.gmra.mxu0 %vm2675_vm3, %v8232_v48  ;;  %v5194_v61 = vadd.f32 %v9943_v60, %v5193_v51 }
 0x8f3   : > { %8239 = vtanh.bf16 %v5391_v50  ;;  %v7480_v38 = vpop.f32.mrf.mxu1 }
 0x8f4   : > { %v5205_v54 = vadd.f32 %v7480_v38, %v9943_v60 }
 0x8f5   : > { %v5196_v47 = vpop.f32.mrf.mxu1 }
 0x8f6   : > { %v5197_v62 = vadd.f32 %v9943_v60, %v5196_v47  ;;  %v5393_v0 = vpack.c.bf16 %v5205_v54, %v5202_v55 }
 0x8f7   : > { %v7483_v41 = vpop.f32.mrf.mxu1 }
 0x8f8   : > { %v8234_v19 = vpop.eup %8233  ;;  %v5392_v16 = vpack.c.bf16 %v5197_v62, %v5194_v61  ;;  %v5218_v31 = vadd.f32 %v7483_v41, %v9943_v60 }
 0x8f9   : > { %v8236_v11 = vpop.eup %8235  ;;  %v5209_v33 = vpop.f32.mrf.mxu1  ;;  %7537 = vmatprep.mubr.msk.bf16.mxu0 %vm2675_vm3, %v8234_v19 }
 0x8fa   : > { %8241 = vtanh.bf16 %v5392_v16  ;;  %7538 = vmatmul.mubr.msk.bf16.gmra.mxu0 %vm2675_vm3, %v8236_v11  ;;  %v5210_v52 = vadd.f32 %v9943_v60, %v5209_v33 }
 0x8fb   : > { %8243 = vtanh.bf16 %v5393_v0  ;;  %v7484_v37 = vpop.f32.mrf.mxu1 }
 0x8fc   : > { %v5221_v12 = vadd.f32 %v7484_v37, %v9943_v60 }
 0x8fd   : > { %v5212_v63 = vpop.f32.mrf.mxu1 }
 0x8fe   : > { %v5213_v34 = vadd.f32 %v9943_v60, %v5212_v63  ;;  %v5395_v8 = vpack.c.bf16 %v5221_v12, %v5218_v31 }
 0x8ff   : > { %v7487_v20 = vpop.f32.mrf.mxu1 }
 0x900   : > { %v8238_v46 = vpop.eup %8237  ;;  %v5394_v35 = vpack.c.bf16 %v5213_v34, %v5210_v52  ;;  %v5234_v15 = vadd.f32 %v7487_v20, %v9943_v60 }
 0x901   : > { %v8240_v28 = vpop.eup %8239  ;;  %v5225_v49 = vpop.f32.mrf.mxu1  ;;  %7541 = vmatprep.mubr.msk.bf16.mxu0 %vm2675_vm3, %v8238_v46 }
 0x902   : > { %8245 = vtanh.bf16 %v5394_v35  ;;  %7542 = vmatmul.mubr.msk.bf16.gmra.mxu0 %vm2675_vm3, %v8240_v28  ;;  %v5226_v17 = vadd.f32 %v9943_v60, %v5225_v49 }
 0x903   : > { %8247 = vtanh.bf16 %v5395_v8  ;;  %v7488_v21 = vpop.f32.mrf.mxu1 }
 0x904   : > { %v5237_v1 = vadd.f32 %v7488_v21, %v9943_v60 }
 0x905   : > { %v5228_v30 = vpop.f32.mrf.mxu1 }
 0x906   : > { %v5229_v26 = vadd.f32 %v9943_v60, %v5228_v30  ;;  %v5397_v29 = vpack.c.bf16 %v5237_v1, %v5234_v15 }
 0x907   : > { %v7491_v3 = vpop.f32.mrf.mxu1 }
 0x908   : > { %v8242_v36 = vpop.eup %8241  ;;  %v5396_v40 = vpack.c.bf16 %v5229_v26, %v5226_v17  ;;  %v5250_v6 = vadd.f32 %v7491_v3, %v9943_v60 }
 0x909   : > { %v8244_v53 = vpop.eup %8243  ;;  %v5241_v56 = vpop.f32.mrf.mxu1  ;;  %7545 = vmatprep.mubr.msk.bf16.mxu0 %vm2675_vm3, %v8242_v36 }
 0x90a   : > { %8249 = vtanh.bf16 %v5396_v40  ;;  %7546 = vmatmul.mubr.msk.bf16.gmra.mxu0 %vm2675_vm3, %v8244_v53  ;;  %v5242_v24 = vadd.f32 %v9943_v60, %v5241_v56 }
 0x90b   : > { %8251 = vtanh.bf16 %v5397_v29  ;;  %v7492_v7 = vpop.f32.mrf.mxu1 }
 0x90c   : > { %v5253_v32 = vadd.f32 %v7492_v7, %v9943_v60 }
 0x90d   : > { %v5244_v4 = vpop.f32.mrf.mxu1 }
 0x90e   : > { %v5245_v27 = vadd.f32 %v9943_v60, %v5244_v4  ;;  %v5399_v42 = vpack.c.bf16 %v5253_v32, %v5250_v6 }
 0x90f   : > { %v7495_v44 = vpop.f32.mrf.mxu1 }
 0x910   : > { %v8246_v14 = vpop.eup %8245  ;;  %v5398_v58 = vpack.c.bf16 %v5245_v27, %v5242_v24  ;;  %v5266_v45 = vadd.f32 %v7495_v44, %v9943_v60 }
 0x911   : > { %v8248_v5 = vpop.eup %8247  ;;  %v5257_v9 = vpop.f32.mrf.mxu1  ;;  %7549 = vmatprep.mubr.msk.bf16.mxu0 %vm2675_vm3, %v8246_v14 }
 0x912   : > { %8253 = vtanh.bf16 %v5398_v58  ;;  %7550 = vmatmul.mubr.msk.bf16.gmra.mxu0 %vm2675_vm3, %v8248_v5  ;;  %v5258_v43 = vadd.f32 %v9943_v60, %v5257_v9 }
 0x913   : > { %8255 = vtanh.bf16 %v5399_v42  ;;  %v7496_v13 = vpop.f32.mrf.mxu1 }
 0x914   : > { %v5269_v23 = vadd.f32 %v7496_v13, %v9943_v60 }
 0x915   : > { %v5260_v22 = vpop.f32.mrf.mxu1 }
 0x916   : > { %v5261_v2 = vadd.f32 %v9943_v60, %v5260_v22  ;;  %v5401_v39 = vpack.c.bf16 %v5269_v23, %v5266_v45 }
 0x917   : > { %v7499_v59 = vpop.f32.mrf.mxu1 }
 0x918   : > { %v8250_v57 = vpop.eup %8249  ;;  %v5400_v50 = vpack.c.bf16 %v5261_v2, %v5258_v43  ;;  %v5282_v51 = vadd.f32 %v7499_v59, %v9943_v60 }
 0x919   : > { %v8252_v18 = vpop.eup %8251  ;;  %v5273_v25 = vpop.f32.mrf.mxu1  ;;  %7553 = vmatprep.mubr.msk.bf16.mxu0 %vm2675_vm3, %v8250_v57 }
 0x91a   : > { %8257 = vtanh.bf16 %v5400_v50  ;;  %7554 = vmatmul.mubr.msk.bf16.gmra.mxu0 %vm2675_vm3, %v8252_v18  ;;  %v5274_v54 = vadd.f32 %v9943_v60, %v5273_v25 }
 0x91b   : > { %8259 = vtanh.bf16 %v5401_v39  ;;  %v7500_v10 = vpop.f32.mrf.mxu1 }
 0x91c   : > { %v5285_v48 = vadd.f32 %v7500_v10, %v9943_v60 }
 0x91d   : > { %v5276_v38 = vpop.f32.mrf.mxu1 }
 0x91e   : > { %v5277_v55 = vadd.f32 %v9943_v60, %v5276_v38  ;;  %v5403_v47 = vpack.c.bf16 %v5285_v48, %v5282_v51 }
 0x91f   : > { %v7503_v61 = vpop.f32.mrf.mxu1 }
 0x920   : > { %v8254_v62 = vpop.eup %8253  ;;  %v5402_v0 = vpack.c.bf16 %v5277_v55, %v5274_v54  ;;  %v5298_v33 = vadd.f32 %v7503_v61, %v9943_v60 }
 0x921   : > { %v8256_v41 = vpop.eup %8255  ;;  %v5289_v19 = vpop.f32.mrf.mxu1  ;;  %7557 = vmatprep.mubr.msk.bf16.mxu0 %vm2675_vm3, %v8254_v62 }
 0x922   : > { %8261 = vtanh.bf16 %v5402_v0  ;;  %7558 = vmatmul.mubr.msk.bf16.gmra.mxu0 %vm2675_vm3, %v8256_v41  ;;  %v5290_v12 = vadd.f32 %v9943_v60, %v5289_v19 }
 0x923   : > { %8263 = vtanh.bf16 %v5403_v47  ;;  %v7504_v16 = vpop.f32.mrf.mxu1 }
 0x924   : > { %v5301_v11 = vadd.f32 %v7504_v16, %v9943_v60 }
 0x925   : > { %v5292_v37 = vpop.f32.mrf.mxu1 }
 0x926   : > { %v5293_v31 = vadd.f32 %v9943_v60, %v5292_v37  ;;  %v5405_v63 = vpack.c.bf16 %v5301_v11, %v5298_v33 }
 0x927   : > { %v7507_v52 = vpop.f32.mrf.mxu1 }
 0x928   : > { %v8258_v34 = vpop.eup %8257  ;;  %v5404_v8 = vpack.c.bf16 %v5293_v31, %v5290_v12  ;;  %v5314_v49 = vadd.f32 %v7507_v52, %v9943_v60 }
 0x929   : > { %v8260_v20 = vpop.eup %8259  ;;  %v5305_v46 = vpop.f32.mrf.mxu1  ;;  %7561 = vmatprep.mubr.msk.bf16.mxu0 %vm2675_vm3, %v8258_v34 }
 0x92a   : > { %8265 = vtanh.bf16 %v5404_v8  ;;  %7562 = vmatmul.mubr.msk.bf16.gmra.mxu0 %vm2675_vm3, %v8260_v20  ;;  %v5306_v1 = vadd.f32 %v9943_v60, %v5305_v46 }
 0x92b   : > { %8267 = vtanh.bf16 %v5405_v63  ;;  %v7508_v35 = vpop.f32.mrf.mxu1 }
 0x92c   : > { %v5317_v28 = vadd.f32 %v7508_v35, %v9943_v60 }
 0x92d   : > { %v5308_v21 = vpop.f32.mrf.mxu1 }
 0x92e   : > { %v5309_v15 = vadd.f32 %v9943_v60, %v5308_v21  ;;  %v5407_v30 = vpack.c.bf16 %v5317_v28, %v5314_v49 }
 0x92f   : > { %v7511_v17 = vpop.f32.mrf.mxu1 }
 0x930   : > { %v8262_v26 = vpop.eup %8261  ;;  %v5406_v29 = vpack.c.bf16 %v5309_v15, %v5306_v1  ;;  %v5330_v56 = vadd.f32 %v7511_v17, %v9943_v60 }
 0x931   : > { %v8264_v3 = vpop.eup %8263  ;;  %v5321_v36 = vpop.f32.mrf.mxu1  ;;  %7565 = vmatprep.mubr.msk.bf16.mxu0 %vm2675_vm3, %v8262_v26 }
 0x932   : > { %8269 = vtanh.bf16 %v5406_v29  ;;  %7566 = vmatmul.mubr.msk.bf16.gmra.mxu0 %vm2675_vm3, %v8264_v3  ;;  %v5322_v32 = vadd.f32 %v9943_v60, %v5321_v36 }
 0x933   : > { %8271 = vtanh.bf16 %v5407_v30  ;;  %v7512_v40 = vpop.f32.mrf.mxu1 }
 0x934   : > { %v5333_v53 = vadd.f32 %v7512_v40, %v9943_v60 }
 0x935   : > { %v5324_v7 = vpop.f32.mrf.mxu1 }
 0x936   : > { %v5325_v6 = vadd.f32 %v9943_v60, %v5324_v7  ;;  %v5409_v4 = vpack.c.bf16 %v5333_v53, %v5330_v56 }
 0x937   : > { %v7515_v24 = vpop.f32.mrf.mxu1 }
 0x938   : > { %v8266_v27 = vpop.eup %8265  ;;  %v5408_v42 = vpack.c.bf16 %v5325_v6, %v5322_v32  ;;  %v5346_v9 = vadd.f32 %v7515_v24, %v9943_v60 }
 0x939   : > { %v8268_v44 = vpop.eup %8267  ;;  %v5337_v14 = vpop.f32.mrf.mxu1  ;;  %7569 = vmatprep.mubr.msk.bf16.mxu0 %vm2675_vm3, %v8266_v27 }
 0x93a   : > { %8273 = vtanh.bf16 %v5408_v42  ;;  %7570 = vmatmul.mubr.msk.bf16.gmra.mxu0 %vm2675_vm3, %v8268_v44  ;;  %v5338_v23 = vadd.f32 %v9943_v60, %v5337_v14 }
 0x93b   : > { %8275 = vtanh.bf16 %v5409_v4  ;;  %v7516_v58 = vpop.f32.mrf.mxu1 }
 0x93c   : > { %v5349_v5 = vadd.f32 %v7516_v58, %v9943_v60 }
 0x93d   : > { %v5340_v13 = vpop.f32.mrf.mxu1 }
 0x93e   : > { %v5341_v45 = vadd.f32 %v9943_v60, %v5340_v13  ;;  %v5411_v22 = vpack.c.bf16 %v5349_v5, %v5346_v9 }
 0x93f   : > { %v7519_v43 = vpop.f32.mrf.mxu1 }
 0x940   : > { %v8270_v2 = vpop.eup %8269  ;;  %v5410_v39 = vpack.c.bf16 %v5341_v45, %v5338_v23  ;;  %v5362_v25 = vadd.f32 %v7519_v43, %v9943_v60 }
 0x941   : > { %v8272_v59 = vpop.eup %8271  ;;  %v5353_v57 = vpop.f32.mrf.mxu1  ;;  %7573 = vmatprep.mubr.msk.bf16.mxu0 %vm2675_vm3, %v8270_v2 }
 0x942   : > { %8277 = vtanh.bf16 %v5410_v39  ;;  %7574 = vmatmul.mubr.msk.bf16.gmra.mxu0 %vm2675_vm3, %v8272_v59  ;;  %v5354_v48 = vadd.f32 %v9943_v60, %v5353_v57 }
 0x943   : > { %8279 = vtanh.bf16 %v5411_v22  ;;  %v7520_v50 = vpop.f32.mrf.mxu1 }
 0x944   : > { %v5365_v18 = vadd.f32 %v7520_v50, %v9943_v60 }
 0x945   : > { %v5356_v10 = vpop.f32.mrf.mxu1 }
 0x946   : > { %v5357_v51 = vadd.f32 %v9943_v60, %v5356_v10  ;;  %v5413_v38 = vpack.c.bf16 %v5365_v18, %v5362_v25 }
 0x947   : > { %v7523_v54 = vpop.f32.mrf.mxu1 }
 0x948   : > { %v8274_v55 = vpop.eup %8273  ;;  %v5412_v47 = vpack.c.bf16 %v5357_v51, %v5354_v48  ;;  %v5378_v19 = vadd.f32 %v7523_v54, %v9943_v60 }
 0x949   : > { %v8276_v61 = vpop.eup %8275  ;;  %v5369_v62 = vpop.f32.mrf.mxu1  ;;  %7577 = vmatprep.mubr.msk.bf16.mxu0 %vm2675_vm3, %v8274_v55 }
 0x94a   : > { %8281 = vtanh.bf16 %v5412_v47  ;;  %7578 = vmatmul.mubr.msk.bf16.gmra.mxu0 %vm2675_vm3, %v8276_v61  ;;  %v5370_v11 = vadd.f32 %v9943_v60, %v5369_v62 }
 0x94b   : > { %8283 = vtanh.bf16 %v5413_v38  ;;  %v7524_v0 = vpop.f32.mrf.mxu1 }
 0x94c   : > { %v5381_v41 = vadd.f32 %v7524_v0, %v9943_v60 }
 0x94d   : > { %v5372_v16 = vpop.f32.mrf.mxu1 }
 0x94e   : > { %v5373_v33 = vadd.f32 %v9943_v60, %v5372_v16  ;;  %v5415_v37 = vpack.c.bf16 %v5381_v41, %v5378_v19  ;;  %v10044_v60 = vld [vmem:[%s10266_s21] ss:$0 sm:$0xff] }
 0x950   : > { %v8278_v12 = vpop.eup %8277  ;;  %v5414_v31 = vpack.c.bf16 %v5373_v33, %v5370_v11 }
 0x951   : > { %v8280_v63 = vpop.eup %8279  ;;  %7581 = vmatprep.mubr.msk.bf16.mxu0 %vm2675_vm3, %v8278_v12 }
 0x952   : > { %8285 = vtanh.bf16 %v5414_v31  ;;  %7582 = vmatmul.mubr.msk.bf16.gmra.mxu0 %vm2675_vm3, %v8280_v63 }
 0x953   : > { %8287 = vtanh.bf16 %v5415_v37 }
 0x958   : > { %v8282_v52 = vpop.eup %8281 }
 0x959   : > { %v8284_v34 = vpop.eup %8283  ;;  %7585 = vmatprep.mubr.msk.bf16.mxu0 %vm2675_vm3, %v8282_v52 }
 0x95a   : > { %7586 = vmatmul.mubr.msk.bf16.gmra.mxu0 %vm2675_vm3, %v8284_v34 }
 0x960   : > { %v8286_v8 = vpop.eup %8285 }
 0x961   : > { %v8288_v20 = vpop.eup %8287  ;;  %7589 = vmatprep.mubr.msk.bf16.mxu0 %vm2675_vm3, %v8286_v8 }
 0x962   : > { %7590 = vmatmul.mubr.msk.bf16.gmra.mxu0 %vm2675_vm3, %v8288_v20 }
 0x9aa   : > { %v7531_v46 = vpop.f32.mrf.mxu0 }
 0x9ab   : > { %v5610_v35 = vadd.f32 %v7531_v46, %v10044_v60 }
 0x9ac   : > { %v5601_v28 = vpop.f32.mrf.mxu0 }
 0x9ad   : > { %v5858_v49 = vsub.f32 0.0, %v5610_v35  ;;  %v5602_v21 = vadd.f32 %v10044_v60, %v5601_v28 }
 0x9ae   : > { %v7532_v1 = vpop.f32.mrf.mxu0 }
 0x9af   : > { %v5924_v15 = vmul.f32 1.442695, %v5858_v49  ;;  %v5856_v30 = vsub.f32 0.0, %v5602_v21  ;;  %v5613_v17 = vadd.f32 %v7532_v1, %v10044_v60 }
 0x9b0   : > { %v5604_v26 = vpop.f32.mrf.mxu0 }
 0x9b1   : > { %8289 = vpow2.f32 %v5924_v15  ;;  %v5920_v29 = vmul.f32 1.442695, %v5856_v30  ;;  %v5859_v3 = vsub.f32 0.0, %v5613_v17  ;;  %v5605_v36 = vadd.f32 %v10044_v60, %v5604_v26 }
 0x9b2   : > { %v7535_v40 = vpop.f32.mrf.mxu0 }
 0x9b3   : > { %8291 = vpow2.f32 %v5920_v29  ;;  %v5926_v53 = vmul.f32 1.442695, %v5859_v3  ;;  %v5857_v56 = vsub.f32 0.0, %v5605_v36  ;;  %v5626_v7 = vadd.f32 %v7535_v40, %v10044_v60 }
 0x9b4   : > { %v5617_v32 = vpop.f32.mrf.mxu0 }
 0x9b5   : > { %8293 = vpow2.f32 %v5926_v53  ;;  %v5922_v6 = vmul.f32 1.442695, %v5857_v56  ;;  %v5862_v4 = vsub.f32 0.0, %v5626_v7  ;;  %v5618_v24 = vadd.f32 %v10044_v60, %v5617_v32 }
 0x9b6   : > { %v7536_v27 = vpop.f32.mrf.mxu0 }
 0x9b7   : > { %8295 = vpow2.f32 %v5922_v6  ;;  %v5932_v42 = vmul.f32 1.442695, %v5862_v4  ;;  %v5860_v44 = vsub.f32 0.0, %v5618_v24  ;;  %v5629_v14 = vadd.f32 %v7536_v27, %v10044_v60 }
 0x9b8   : > { %v5620_v58 = vpop.f32.mrf.mxu0 }
 0x9b9   : > { %8297 = vpow2.f32 %v5932_v42  ;;  %v5928_v5 = vmul.f32 1.442695, %v5860_v44  ;;  %v5863_v9 = vsub.f32 0.0, %v5629_v14  ;;  %v5621_v13 = vadd.f32 %v10044_v60, %v5620_v58 }
 0x9ba   : > { %v7539_v23 = vpop.f32.mrf.mxu0 }
 0x9bb   : > { %8299 = vpow2.f32 %v5928_v5  ;;  %v5934_v45 = vmul.f32 1.442695, %v5863_v9  ;;  %v5861_v22 = vsub.f32 0.0, %v5621_v13  ;;  %v5642_v43 = vadd.f32 %v7539_v23, %v10044_v60 }
 0x9bc   : > { %v5633_v2 = vpop.f32.mrf.mxu0 }
 0x9bd   : > { %8301 = vpow2.f32 %v5934_v45  ;;  %v5930_v39 = vmul.f32 1.442695, %v5861_v22  ;;  %v5866_v59 = vsub.f32 0.0, %v5642_v43  ;;  %v5634_v57 = vadd.f32 %v10044_v60, %v5633_v2 }
 0x9be   : > { %v8290_v50 = vpop.eup %8289  ;;  %v7540_v18 = vpop.f32.mrf.mxu0 }
 0x9bf   : > { %v6050_v25 = vadd.f32 1.0, %v8290_v50  ;;  %8303 = vpow2.f32 %v5930_v39  ;;  %v5940_v10 = vmul.f32 1.442695, %v5866_v59  ;;  %v5864_v48 = vsub.f32 0.0, %v5634_v57 }
 0x9c0   : > { %v8292_v51 = vpop.eup %8291  ;;  %v5645_v38 = vadd.f32 %v7540_v18, %v10044_v60  ;;  %v5636_v54 = vpop.f32.mrf.mxu0 }
 0x9c1   : > { %8305 = vrcp.f32 %v6050_v25  ;;  %v6048_v55 = vadd.f32 1.0, %v8292_v51  ;;  %v5936_v47 = vmul.f32 1.442695, %v5864_v48  ;;  %v5637_v61 = vadd.f32 %v10044_v60, %v5636_v54 }
 0x9c2   : > { %v8294_v62 = vpop.eup %8293  ;;  %8307 = vpow2.f32 %v5940_v10  ;;  %v5867_v0 = vsub.f32 0.0, %v5645_v38  ;;  %v7543_v41 = vpop.f32.mrf.mxu0 }
 0x9c3   : > { %8309 = vrcp.f32 %v6048_v55  ;;  %v6051_v19 = vadd.f32 1.0, %v8294_v62  ;;  %v5865_v16 = vsub.f32 0.0, %v5637_v61  ;;  %v5658_v11 = vadd.f32 %v7543_v41, %v10044_v60 }
 0x9c4   : > { %v8296_v33 = vpop.eup %8295  ;;  %8311 = vpow2.f32 %v5936_v47  ;;  %v5942_v37 = vmul.f32 1.442695, %v5867_v0  ;;  %v5649_v12 = vpop.f32.mrf.mxu0 }
 0x9c5   : > { %8313 = vrcp.f32 %v6051_v19  ;;  %v6049_v31 = vadd.f32 1.0, %v8296_v33  ;;  %v5938_v63 = vmul.f32 1.442695, %v5865_v16  ;;  %v5870_v52 = vsub.f32 0.0, %v5658_v11 }
 0x9c6   : > { %v8298_v34 = vpop.eup %8297  ;;  %8315 = vpow2.f32 %v5942_v37  ;;  %v5650_v8 = vadd.f32 %v10044_v60, %v5649_v12  ;;  %v7544_v20 = vpop.f32.mrf.mxu0 }
 0x9c7   : > { %8317 = vrcp.f32 %v6049_v31  ;;  %v6054_v46 = vadd.f32 1.0, %v8298_v34  ;;  %v5948_v35 = vmul.f32 1.442695, %v5870_v52  ;;  %v5661_v28 = vadd.f32 %v7544_v20, %v10044_v60 }
 0x9c8   : > { %v8300_v49 = vpop.eup %8299  ;;  %8319 = vpow2.f32 %v5938_v63  ;;  %v5868_v21 = vsub.f32 0.0, %v5650_v8  ;;  %v5652_v1 = vpop.f32.mrf.mxu0 }
 0x9c9   : > { %8321 = vrcp.f32 %v6054_v46  ;;  %v6052_v15 = vadd.f32 1.0, %v8300_v49  ;;  %v5871_v30 = vsub.f32 0.0, %v5661_v28  ;;  %v5653_v17 = vadd.f32 %v10044_v60, %v5652_v1 }
 0x9ca   : > { %v8302_v26 = vpop.eup %8301  ;;  %8323 = vpow2.f32 %v5948_v35  ;;  %v5944_v29 = vmul.f32 1.442695, %v5868_v21  ;;  %v7547_v3 = vpop.f32.mrf.mxu0 }
 0x9cb   : > { %8325 = vrcp.f32 %v6052_v15  ;;  %v6055_v36 = vadd.f32 1.0, %v8302_v26  ;;  %v5950_v40 = vmul.f32 1.442695, %v5871_v30  ;;  %v5869_v53 = vsub.f32 0.0, %v5653_v17 }
 0x9cc   : > { %v8304_v56 = vpop.eup %8303  ;;  %8327 = vpow2.f32 %v5944_v29  ;;  %v5674_v7 = vadd.f32 %v7547_v3, %v10044_v60  ;;  %v5665_v32 = vpop.f32.mrf.mxu0 }
 0x9cd   : > { %8329 = vrcp.f32 %v6055_v36  ;;  %v6053_v6 = vadd.f32 1.0, %v8304_v56  ;;  %v5946_v4 = vmul.f32 1.442695, %v5869_v53  ;;  %v5666_v24 = vadd.f32 %v10044_v60, %v5665_v32 }
 0x9ce   : > { %v8306_v27 = vpop.eup %8305  ;;  %8331 = vpow2.f32 %v5950_v40  ;;  %v5874_v42 = vsub.f32 0.0, %v5674_v7  ;;  %v7548_v44 = vpop.f32.mrf.mxu0 }
 0x9cf   : > { %v8308_v14 = vpop.eup %8307  ;;  %6178 = vst.msk [vmem:[%s10067_s6 + $0x10] sm:$0xff] %vm792_vm1, %v8306_v27  ;;  %8333 = vrcp.f32 %v6053_v6  ;;  %v5872_v58 = vsub.f32 0.0, %v5666_v24  ;;  %v5677_v5 = vadd.f32 %v7548_v44, %v10044_v60 }
 0x9d0   : > { %v8310_v9 = vpop.eup %8309  ;;  %v6058_v13 = vadd.f32 1.0, %v8308_v14  ;;  %8335 = vpow2.f32 %v5946_v4  ;;  %v5956_v23 = vmul.f32 1.442695, %v5874_v42  ;;  %v5668_v45 = vpop.f32.mrf.mxu0 }
 0x9d1   : > { %v8312_v22 = vpop.eup %8311  ;;  %6176 = vst.msk [vmem:[%s10067_s6] sm:$0xff] %vm792_vm1, %v8310_v9  ;;  %v5952_v43 = vmul.f32 1.442695, %v5872_v58  ;;  %v5875_v2 = vsub.f32 0.0, %v5677_v5  ;;  %v5669_v39 = vadd.f32 %v10044_v60, %v5668_v45 }
 0x9d2   : > { %v8314_v59 = vpop.eup %8313  ;;  %8337 = vrcp.f32 %v6058_v13  ;;  %v6056_v57 = vadd.f32 1.0, %v8312_v22  ;;  %v7551_v50 = vpop.f32.mrf.mxu0 }
 0x9d3   : > { %v8316_v18 = vpop.eup %8315  ;;  %6179 = vst.msk [vmem:[%s10067_s6 + $0x18] sm:$0xff] %vm792_vm1, %v8314_v59  ;;  %8339 = vpow2.f32 %v5956_v23  ;;  %v5958_v25 = vmul.f32 1.442695, %v5875_v2  ;;  %v5873_v10 = vsub.f32 0.0, %v5669_v39  ;;  %v5690_v48 = vadd.f32 %v7551_v50, %v10044_v60 }
 0x9d4   : > { %v8318_v51 = vpop.eup %8317  ;;  %8341 = vrcp.f32 %v6056_v57  ;;  %v6059_v38 = vadd.f32 1.0, %v8316_v18  ;;  %v5681_v54 = vpop.f32.mrf.mxu0 }
 0x9d5   : > { %v8320_v55 = vpop.eup %8319  ;;  %6177 = vst.msk [vmem:[%s10067_s6 + $0x8] sm:$0xff] %vm792_vm1, %v8318_v51  ;;  %8343 = vpow2.f32 %v5952_v43  ;;  %v5954_v47 = vmul.f32 1.442695, %v5873_v10  ;;  %v5878_v61 = vsub.f32 0.0, %v5690_v48  ;;  %v5682_v62 = vadd.f32 %v10044_v60, %v5681_v54 }
 0x9d6   : > { %v8322_v0 = vpop.eup %8321  ;;  %8345 = vrcp.f32 %v6059_v38  ;;  %v6057_v41 = vadd.f32 1.0, %v8320_v55  ;;  %v7552_v19 = vpop.f32.mrf.mxu0 }
 0x9d7   : > { %v8324_v16 = vpop.eup %8323  ;;  %6182 = vst.msk [vmem:[%s10067_s6 + $0x30] sm:$0xff] %vm792_vm1, %v8322_v0  ;;  %8347 = vpow2.f32 %v5958_v25  ;;  %v5964_v11 = vmul.f32 1.442695, %v5878_v61  ;;  %v5876_v33 = vsub.f32 0.0, %v5682_v62  ;;  %v5693_v37 = vadd.f32 %v7552_v19, %v10044_v60 }
 0x9d8   : > { %v8326_v12 = vpop.eup %8325  ;;  %8349 = vrcp.f32 %v6057_v41  ;;  %v6062_v31 = vadd.f32 1.0, %v8324_v16  ;;  %v5684_v63 = vpop.f32.mrf.mxu0 }
 0x9d9   : > { %v8328_v52 = vpop.eup %8327  ;;  %6180 = vst.msk [vmem:[%s10067_s6 + $0x20] sm:$0xff] %vm792_vm1, %v8326_v12  ;;  %8351 = vpow2.f32 %v5954_v47  ;;  %v5960_v34 = vmul.f32 1.442695, %v5876_v33  ;;  %v5879_v8 = vsub.f32 0.0, %v5693_v37  ;;  %v5685_v20 = vadd.f32 %v10044_v60, %v5684_v63 }
 0x9da   : > { %v8330_v46 = vpop.eup %8329  ;;  %8353 = vrcp.f32 %v6062_v31  ;;  %v6060_v35 = vadd.f32 1.0, %v8328_v52  ;;  %v7555_v28 = vpop.f32.mrf.mxu0 }
 0x9db   : > { %v8332_v49 = vpop.eup %8331  ;;  %6183 = vst.msk [vmem:[%s10067_s6 + $0x38] sm:$0xff] %vm792_vm1, %v8330_v46  ;;  %8355 = vpow2.f32 %v5964_v11  ;;  %v5966_v21 = vmul.f32 1.442695, %v5879_v8  ;;  %v5877_v1 = vsub.f32 0.0, %v5685_v20  ;;  %v5706_v15 = vadd.f32 %v7555_v28, %v10044_v60 }
 0x9dc   : > { %v8334_v30 = vpop.eup %8333  ;;  %8357 = vrcp.f32 %v6060_v35  ;;  %v6063_v17 = vadd.f32 1.0, %v8332_v49  ;;  %v5697_v26 = vpop.f32.mrf.mxu0 }
 0x9dd   : > { %v8336_v29 = vpop.eup %8335  ;;  %6181 = vst.msk [vmem:[%s10067_s6 + $0x28] sm:$0xff] %vm792_vm1, %v8334_v30  ;;  %8359 = vpow2.f32 %v5960_v34  ;;  %v5962_v3 = vmul.f32 1.442695, %v5877_v1  ;;  %v5882_v36 = vsub.f32 0.0, %v5706_v15  ;;  %v5698_v40 = vadd.f32 %v10044_v60, %v5697_v26 }
 0x9de   : > { %8361 = vrcp.f32 %v6063_v17  ;;  %v6061_v53 = vadd.f32 1.0, %v8336_v29  ;;  %v7556_v56 = vpop.f32.mrf.mxu0 }
 0x9df   : > { %v8338_v7 = vpop.eup %8337  ;;  %8363 = vpow2.f32 %v5966_v21  ;;  %v5972_v32 = vmul.f32 1.442695, %v5882_v36  ;;  %v5880_v6 = vsub.f32 0.0, %v5698_v40  ;;  %v5709_v4 = vadd.f32 %v7556_v56, %v10044_v60 }
 0x9e0   : > { %v8340_v24 = vpop.eup %8339  ;;  %6186 = vst.msk [vmem:[%s10067_s6 + $0x50] sm:$0xff] %vm792_vm1, %v8338_v7  ;;  %8365 = vrcp.f32 %v6061_v53  ;;  %v5700_v27 = vpop.f32.mrf.mxu0 }
 0x9e1   : > { %v8342_v42 = vpop.eup %8341  ;;  %v6066_v44 = vadd.f32 1.0, %v8340_v24  ;;  %8367 = vpow2.f32 %v5962_v3  ;;  %v5968_v14 = vmul.f32 1.442695, %v5880_v6  ;;  %v5883_v58 = vsub.f32 0.0, %v5709_v4 }
 0x9e2   : > { %v8344_v5 = vpop.eup %8343  ;;  %6184 = vst.msk [vmem:[%s10067_s6 + $0x40] sm:$0xff] %vm792_vm1, %v8342_v42  ;;  %8369 = vpow2.f32 %v5972_v32  ;;  %v5701_v9 = vadd.f32 %v10044_v60, %v5700_v27  ;;  %v7559_v13 = vpop.f32.mrf.mxu0 }
 0x9e3   : > { %v8346_v23 = vpop.eup %8345  ;;  %8371 = vrcp.f32 %v6066_v44  ;;  %v6064_v45 = vadd.f32 1.0, %v8344_v5  ;;  %v5974_v22 = vmul.f32 1.442695, %v5883_v58  ;;  %v5722_v43 = vadd.f32 %v7559_v13, %v10044_v60 }
 0x9e4   : > { %v8348_v2 = vpop.eup %8347  ;;  %6187 = vst.msk [vmem:[%s10067_s6 + $0x58] sm:$0xff] %vm792_vm1, %v8346_v23  ;;  %8373 = vpow2.f32 %v5968_v14  ;;  %v5881_v39 = vsub.f32 0.0, %v5701_v9  ;;  %v5713_v59 = vpop.f32.mrf.mxu0 }
 0x9e5   : > { %v8350_v57 = vpop.eup %8349  ;;  %8375 = vrcp.f32 %v6064_v45  ;;  %v6067_v50 = vadd.f32 1.0, %v8348_v2  ;;  %v5886_v18 = vsub.f32 0.0, %v5722_v43  ;;  %v5714_v25 = vadd.f32 %v10044_v60, %v5713_v59 }
 0x9e6   : > { %v8352_v10 = vpop.eup %8351  ;;  %6185 = vst.msk [vmem:[%s10067_s6 + $0x48] sm:$0xff] %vm792_vm1, %v8350_v57  ;;  %8377 = vpow2.f32 %v5974_v22  ;;  %v5970_v48 = vmul.f32 1.442695, %v5881_v39  ;;  %v7560_v51 = vpop.f32.mrf.mxu0 }
 0x9e7   : > { %v8354_v38 = vpop.eup %8353  ;;  %8379 = vrcp.f32 %v6067_v50  ;;  %v6065_v54 = vadd.f32 1.0, %v8352_v10  ;;  %v5980_v55 = vmul.f32 1.442695, %v5886_v18  ;;  %v5884_v47 = vsub.f32 0.0, %v5714_v25 }
 0x9e8   : > { %v8356_v61 = vpop.eup %8355  ;;  %6190 = vst.msk [vmem:[%s10067_s6 + $0x70] sm:$0xff] %vm792_vm1, %v8354_v38  ;;  %8381 = vpow2.f32 %v5970_v48  ;;  %v5725_v62 = vadd.f32 %v7560_v51, %v10044_v60  ;;  %v5716_v0 = vpop.f32.mrf.mxu0 }
 0x9e9   : > { %v8358_v41 = vpop.eup %8357  ;;  %8383 = vrcp.f32 %v6065_v54  ;;  %v6070_v19 = vadd.f32 1.0, %v8356_v61  ;;  %v5976_v16 = vmul.f32 1.442695, %v5884_v47  ;;  %v5717_v11 = vadd.f32 %v10044_v60, %v5716_v0 }
 0x9ea   : > { %v8360_v33 = vpop.eup %8359  ;;  %6188 = vst.msk [vmem:[%s10067_s6 + $0x60] sm:$0xff] %vm792_vm1, %v8358_v41  ;;  %8385 = vpow2.f32 %v5980_v55  ;;  %v5887_v37 = vsub.f32 0.0, %v5725_v62  ;;  %v7563_v12 = vpop.f32.mrf.mxu0 }
 0x9eb   : > { %v8362_v31 = vpop.eup %8361  ;;  %8387 = vrcp.f32 %v6070_v19  ;;  %v6068_v63 = vadd.f32 1.0, %v8360_v33  ;;  %v5885_v52 = vsub.f32 0.0, %v5717_v11  ;;  %v5738_v34 = vadd.f32 %v7563_v12, %v10044_v60 }
 0x9ec   : > { %v8364_v8 = vpop.eup %8363  ;;  %6191 = vst.msk [vmem:[%s10067_s6 + $0x78] sm:$0xff] %vm792_vm1, %v8362_v31  ;;  %8389 = vpow2.f32 %v5976_v16  ;;  %v5982_v20 = vmul.f32 1.442695, %v5887_v37  ;;  %v5729_v46 = vpop.f32.mrf.mxu0 }
 0x9ed   : > { %v8366_v35 = vpop.eup %8365  ;;  %8391 = vrcp.f32 %v6068_v63  ;;  %v6071_v28 = vadd.f32 1.0, %v8364_v8  ;;  %v5978_v49 = vmul.f32 1.442695, %v5885_v52  ;;  %v5890_v21 = vsub.f32 0.0, %v5738_v34 }
 0x9ee   : > { %v8368_v1 = vpop.eup %8367  ;;  %6189 = vst.msk [vmem:[%s10067_s6 + $0x68] sm:$0xff] %vm792_vm1, %v8366_v35  ;;  %8393 = vpow2.f32 %v5982_v20  ;;  %v5730_v15 = vadd.f32 %v10044_v60, %v5729_v46  ;;  %v7564_v30 = vpop.f32.mrf.mxu0 }
 0x9ef   : > { %v8370_v17 = vpop.eup %8369  ;;  %8395 = vrcp.f32 %v6071_v28  ;;  %v6069_v26 = vadd.f32 1.0, %v8368_v1  ;;  %v5988_v29 = vmul.f32 1.442695, %v5890_v21  ;;  %v5741_v3 = vadd.f32 %v7564_v30, %v10044_v60 }
 0x9f0   : > { %v8372_v36 = vpop.eup %8371  ;;  %v6074_v40 = vadd.f32 1.0, %v8370_v17  ;;  %8397 = vpow2.f32 %v5978_v49  ;;  %v5888_v53 = vsub.f32 0.0, %v5730_v15  ;;  %v5732_v56 = vpop.f32.mrf.mxu0 }
 0x9f1   : > { %v8374_v7 = vpop.eup %8373  ;;  %6194 = vst.msk [vmem:[%s10067_s6 + $0x90] sm:$0xff] %vm792_vm1, %v8372_v36  ;;  %8399 = vrcp.f32 %v6069_v26  ;;  %v5891_v32 = vsub.f32 0.0, %v5741_v3  ;;  %v5733_v6 = vadd.f32 %v10044_v60, %v5732_v56 }
 0x9f2   : > { %v8376_v4 = vpop.eup %8375  ;;  %8401 = vrcp.f32 %v6074_v40  ;;  %v6072_v24 = vadd.f32 1.0, %v8374_v7  ;;  %v5984_v27 = vmul.f32 1.442695, %v5888_v53  ;;  %v7567_v42 = vpop.f32.mrf.mxu0 }
 0x9f3   : > { %v8378_v44 = vpop.eup %8377  ;;  %6192 = vst.msk [vmem:[%s10067_s6 + $0x80] sm:$0xff] %vm792_vm1, %v8376_v4  ;;  %8403 = vpow2.f32 %v5988_v29  ;;  %v5990_v14 = vmul.f32 1.442695, %v5891_v32  ;;  %v5889_v58 = vsub.f32 0.0, %v5733_v6  ;;  %v5754_v5 = vadd.f32 %v7567_v42, %v10044_v60 }
 0x9f4   : > { %v8380_v9 = vpop.eup %8379  ;;  %8405 = vrcp.f32 %v6072_v24  ;;  %v6075_v13 = vadd.f32 1.0, %v8378_v44  ;;  %v5745_v23 = vpop.f32.mrf.mxu0 }
 0x9f5   : > { %v8382_v45 = vpop.eup %8381  ;;  %6195 = vst.msk [vmem:[%s10067_s6 + $0x98] sm:$0xff] %vm792_vm1, %v8380_v9  ;;  %8407 = vpow2.f32 %v5984_v27  ;;  %v5986_v22 = vmul.f32 1.442695, %v5889_v58  ;;  %v5894_v43 = vsub.f32 0.0, %v5754_v5  ;;  %v5746_v2 = vadd.f32 %v10044_v60, %v5745_v23 }
 0x9f6   : > { %v8384_v39 = vpop.eup %8383  ;;  %8409 = vrcp.f32 %v6075_v13  ;;  %v6073_v59 = vadd.f32 1.0, %v8382_v45  ;;  %v7568_v57 = vpop.f32.mrf.mxu0 }
 0x9f7   : > { %v8386_v50 = vpop.eup %8385  ;;  %6193 = vst.msk [vmem:[%s10067_s6 + $0x88] sm:$0xff] %vm792_vm1, %v8384_v39  ;;  %8411 = vpow2.f32 %v5990_v14  ;;  %v5996_v18 = vmul.f32 1.442695, %v5894_v43  ;;  %v5892_v25 = vsub.f32 0.0, %v5746_v2  ;;  %v5757_v10 = vadd.f32 %v7568_v57, %v10044_v60 }
 0x9f8   : > { %v8388_v48 = vpop.eup %8387  ;;  %8413 = vrcp.f32 %v6073_v59  ;;  %v6078_v51 = vadd.f32 1.0, %v8386_v50  ;;  %v5748_v38 = vpop.f32.mrf.mxu0 }
 0x9f9   : > { %v8390_v54 = vpop.eup %8389  ;;  %6198 = vst.msk [vmem:[%s10067_s6 + $0xb0] sm:$0xff] %vm792_vm1, %v8388_v48  ;;  %8415 = vpow2.f32 %v5986_v22  ;;  %v5992_v55 = vmul.f32 1.442695, %v5892_v25  ;;  %v5895_v47 = vsub.f32 0.0, %v5757_v10  ;;  %v5749_v61 = vadd.f32 %v10044_v60, %v5748_v38 }
 0x9fa   : > { %v8392_v62 = vpop.eup %8391  ;;  %8417 = vrcp.f32 %v6078_v51  ;;  %v6076_v0 = vadd.f32 1.0, %v8390_v54  ;;  %v7571_v41 = vpop.f32.mrf.mxu0 }
 0x9fb   : > { %v8394_v19 = vpop.eup %8393  ;;  %6196 = vst.msk [vmem:[%s10067_s6 + $0xa0] sm:$0xff] %vm792_vm1, %v8392_v62  ;;  %8419 = vpow2.f32 %v5996_v18  ;;  %v5998_v16 = vmul.f32 1.442695, %v5895_v47  ;;  %v5893_v11 = vsub.f32 0.0, %v5749_v61  ;;  %v5770_v33 = vadd.f32 %v7571_v41, %v10044_v60 }
 0x9fc   : > { %v8396_v37 = vpop.eup %8395  ;;  %8421 = vrcp.f32 %v6076_v0  ;;  %v6079_v12 = vadd.f32 1.0, %v8394_v19  ;;  %v5761_v31 = vpop.f32.mrf.mxu0 }
 0x9fd   : > { %v8398_v63 = vpop.eup %8397  ;;  %6199 = vst.msk [vmem:[%s10067_s6 + $0xb8] sm:$0xff] %vm792_vm1, %v8396_v37  ;;  %8423 = vpow2.f32 %v5992_v55  ;;  %v5994_v52 = vmul.f32 1.442695, %v5893_v11  ;;  %v5898_v34 = vsub.f32 0.0, %v5770_v33  ;;  %v5762_v8 = vadd.f32 %v10044_v60, %v5761_v31 }
 0x9fe   : > { %v8400_v20 = vpop.eup %8399  ;;  %8425 = vrcp.f32 %v6079_v12  ;;  %v6077_v46 = vadd.f32 1.0, %v8398_v63  ;;  %v7572_v35 = vpop.f32.mrf.mxu0 }
 0x9ff   : > { %v8402_v28 = vpop.eup %8401  ;;  %6197 = vst.msk [vmem:[%s10067_s6 + $0xa8] sm:$0xff] %vm792_vm1, %v8400_v20  ;;  %8427 = vpow2.f32 %v5998_v16  ;;  %v6004_v49 = vmul.f32 1.442695, %v5898_v34  ;;  %v5896_v21 = vsub.f32 0.0, %v5762_v8  ;;  %v5773_v1 = vadd.f32 %v7572_v35, %v10044_v60 }
 0xa00   : > { %v8404_v15 = vpop.eup %8403  ;;  %6202 = vst.msk [vmem:[%s10067_s6 + $0xd0] sm:$0xff] %vm792_vm1, %v8402_v28  ;;  %8429 = vrcp.f32 %v6077_v46  ;;  %v5764_v30 = vpop.f32.mrf.mxu0 }
 0xa01   : > { %v8406_v17 = vpop.eup %8405  ;;  %v6082_v26 = vadd.f32 1.0, %v8404_v15  ;;  %8431 = vpow2.f32 %v5994_v52  ;;  %v6000_v29 = vmul.f32 1.442695, %v5896_v21  ;;  %v5899_v3 = vsub.f32 0.0, %v5773_v1 }
 0xa02   : > { %v8408_v36 = vpop.eup %8407  ;;  %6200 = vst.msk [vmem:[%s10067_s6 + $0xc0] sm:$0xff] %vm792_vm1, %v8406_v17  ;;  %8433 = vpow2.f32 %v6004_v49  ;;  %v5765_v40 = vadd.f32 %v10044_v60, %v5764_v30  ;;  %v7575_v53 = vpop.f32.mrf.mxu0 }
 0xa03   : > { %v8410_v56 = vpop.eup %8409  ;;  %8435 = vrcp.f32 %v6082_v26  ;;  %v6080_v7 = vadd.f32 1.0, %v8408_v36  ;;  %v6006_v32 = vmul.f32 1.442695, %v5899_v3  ;;  %v5786_v6 = vadd.f32 %v7575_v53, %v10044_v60 }
 0xa04   : > { %v8412_v4 = vpop.eup %8411  ;;  %6203 = vst.msk [vmem:[%s10067_s6 + $0xd8] sm:$0xff] %vm792_vm1, %v8410_v56  ;;  %8437 = vpow2.f32 %v6000_v29  ;;  %v5897_v24 = vsub.f32 0.0, %v5765_v40  ;;  %v5777_v27 = vpop.f32.mrf.mxu0 }
 0xa05   : > { %v8414_v42 = vpop.eup %8413  ;;  %8439 = vrcp.f32 %v6080_v7  ;;  %v6083_v44 = vadd.f32 1.0, %v8412_v4  ;;  %v5902_v14 = vsub.f32 0.0, %v5786_v6  ;;  %v5778_v58 = vadd.f32 %v10044_v60, %v5777_v27 }
 0xa06   : > { %v8416_v5 = vpop.eup %8415  ;;  %6201 = vst.msk [vmem:[%s10067_s6 + $0xc8] sm:$0xff] %vm792_vm1, %v8414_v42  ;;  %8441 = vpow2.f32 %v6006_v32  ;;  %v6002_v9 = vmul.f32 1.442695, %v5897_v24  ;;  %v7576_v13 = vpop.f32.mrf.mxu0 }
 0xa07   : > { %v8418_v23 = vpop.eup %8417  ;;  %8443 = vrcp.f32 %v6083_v44  ;;  %v6081_v45 = vadd.f32 1.0, %v8416_v5  ;;  %v6012_v22 = vmul.f32 1.442695, %v5902_v14  ;;  %v5900_v43 = vsub.f32 0.0, %v5778_v58 }
 0xa08   : > { %v8420_v2 = vpop.eup %8419  ;;  %6206 = vst.msk [vmem:[%s10067_s6 + $0xf0] sm:$0xff] %vm792_vm1, %v8418_v23  ;;  %8445 = vpow2.f32 %v6002_v9  ;;  %v5789_v39 = vadd.f32 %v7576_v13, %v10044_v60  ;;  %v5780_v59 = vpop.f32.mrf.mxu0 }
 0xa09   : > { %v8422_v57 = vpop.eup %8421  ;;  %8447 = vrcp.f32 %v6081_v45  ;;  %v6086_v50 = vadd.f32 1.0, %v8420_v2  ;;  %v6008_v18 = vmul.f32 1.442695, %v5900_v43  ;;  %v5781_v25 = vadd.f32 %v10044_v60, %v5780_v59 }
 0xa0a   : > { %v8424_v10 = vpop.eup %8423  ;;  %6204 = vst.msk [vmem:[%s10067_s6 + $0xe0] sm:$0xff] %vm792_vm1, %v8422_v57  ;;  %8449 = vpow2.f32 %v6012_v22  ;;  %v5903_v48 = vsub.f32 0.0, %v5789_v39  ;;  %v7579_v51 = vpop.f32.mrf.mxu0 }
 0xa0b   : > { %v8426_v38 = vpop.eup %8425  ;;  %8451 = vrcp.f32 %v6086_v50  ;;  %v6084_v54 = vadd.f32 1.0, %v8424_v10  ;;  %v5901_v55 = vsub.f32 0.0, %v5781_v25  ;;  %v5802_v47 = vadd.f32 %v7579_v51, %v10044_v60 }
 0xa0c   : > { %v8428_v61 = vpop.eup %8427  ;;  %6207 = vst.msk [vmem:[%s10067_s6 + $0xf8] sm:$0xff] %vm792_vm1, %v8426_v38  ;;  %8453 = vpow2.f32 %v6008_v18  ;;  %v6014_v62 = vmul.f32 1.442695, %v5903_v48  ;;  %v5793_v0 = vpop.f32.mrf.mxu0 }
 0xa0d   : > { %v8430_v41 = vpop.eup %8429  ;;  %8455 = vrcp.f32 %v6084_v54  ;;  %v6087_v19 = vadd.f32 1.0, %v8428_v61  ;;  %v6010_v16 = vmul.f32 1.442695, %v5901_v55  ;;  %v5906_v11 = vsub.f32 0.0, %v5802_v47 }
 0xa0e   : > { %v8432_v33 = vpop.eup %8431  ;;  %6205 = vst.msk [vmem:[%s10067_s6 + $0xe8] sm:$0xff] %vm792_vm1, %v8430_v41  ;;  %8457 = vpow2.f32 %v6014_v62  ;;  %v5794_v37 = vadd.f32 %v10044_v60, %v5793_v0  ;;  %v7580_v12 = vpop.f32.mrf.mxu0 }
 0xa0f   : > { %v8434_v31 = vpop.eup %8433  ;;  %8459 = vrcp.f32 %v6087_v19  ;;  %v6085_v63 = vadd.f32 1.0, %v8432_v33  ;;  %v6020_v52 = vmul.f32 1.442695, %v5906_v11  ;;  %v5805_v34 = vadd.f32 %v7580_v12, %v10044_v60  ;;  %v8545_v33 = vld [vmem:[%s10266_s21] ss:$0 sm:$0xff] }
 0xa10   : > { %v8436_v8 = vpop.eup %8435  ;;  %v6090_v20 = vadd.f32 1.0, %v8434_v31  ;;  %8461 = vpow2.f32 %v6010_v16  ;;  %v5904_v46 = vsub.f32 0.0, %v5794_v37  ;;  %v5796_v35 = vpop.f32.mrf.mxu0 }
 0xa11   : > { %v8438_v28 = vpop.eup %8437  ;;  %6210 = vst.msk [vmem:[%s10067_s6 + $0x110] sm:$0xff] %vm792_vm1, %v8436_v8  ;;  %8463 = vrcp.f32 %v6085_v63  ;;  %v5907_v49 = vsub.f32 0.0, %v5805_v34  ;;  %v5797_v21 = vadd.f32 %v10044_v60, %v5796_v35 }
 0xa12   : > { %v8440_v1 = vpop.eup %8439  ;;  %8465 = vrcp.f32 %v6090_v20  ;;  %v6088_v15 = vadd.f32 1.0, %v8438_v28  ;;  %v6016_v30 = vmul.f32 1.442695, %v5904_v46  ;;  %v7583_v17 = vpop.f32.mrf.mxu0 }
 0xa13   : > { %v8442_v26 = vpop.eup %8441  ;;  %6208 = vst.msk [vmem:[%s10067_s6 + $0x100] sm:$0xff] %vm792_vm1, %v8440_v1  ;;  %8467 = vpow2.f32 %v6020_v52  ;;  %v6022_v29 = vmul.f32 1.442695, %v5907_v49  ;;  %v5905_v3 = vsub.f32 0.0, %v5797_v21  ;;  %v5818_v36 = vadd.f32 %v7583_v17, %v10044_v60 }
 0xa14   : > { %v8444_v40 = vpop.eup %8443  ;;  %8469 = vrcp.f32 %v6088_v15  ;;  %v6091_v53 = vadd.f32 1.0, %v8442_v26  ;;  %v5809_v56 = vpop.f32.mrf.mxu0 }
 0xa15   : > { %v8446_v7 = vpop.eup %8445  ;;  %6211 = vst.msk [vmem:[%s10067_s6 + $0x118] sm:$0xff] %vm792_vm1, %v8444_v40  ;;  %8471 = vpow2.f32 %v6016_v30  ;;  %v6018_v32 = vmul.f32 1.442695, %v5905_v3  ;;  %v5910_v6 = vsub.f32 0.0, %v5818_v36  ;;  %v5810_v4 = vadd.f32 %v10044_v60, %v5809_v56 }
 0xa16   : > { %v8448_v24 = vpop.eup %8447  ;;  %8473 = vrcp.f32 %v6091_v53  ;;  %v6089_v27 = vadd.f32 1.0, %v8446_v7  ;;  %v7584_v42 = vpop.f32.mrf.mxu0 }
 0xa17   : > { %v8450_v44 = vpop.eup %8449  ;;  %6209 = vst.msk [vmem:[%s10067_s6 + $0x108] sm:$0xff] %vm792_vm1, %v8448_v24  ;;  %8475 = vpow2.f32 %v6022_v29  ;;  %v6028_v14 = vmul.f32 1.442695, %v5910_v6  ;;  %v5908_v58 = vsub.f32 0.0, %v5810_v4  ;;  %v5821_v5 = vadd.f32 %v7584_v42, %v10044_v60 }
 0xa18   : > { %v8452_v9 = vpop.eup %8451  ;;  %8477 = vrcp.f32 %v6089_v27  ;;  %v6094_v13 = vadd.f32 1.0, %v8450_v44  ;;  %v5812_v23 = vpop.f32.mrf.mxu0 }
 0xa19   : > { %v8454_v45 = vpop.eup %8453  ;;  %6214 = vst.msk [vmem:[%s10067_s6 + $0x130] sm:$0xff] %vm792_vm1, %v8452_v9  ;;  %8479 = vpow2.f32 %v6018_v32  ;;  %v6024_v22 = vmul.f32 1.442695, %v5908_v58  ;;  %v5911_v43 = vsub.f32 0.0, %v5821_v5  ;;  %v5813_v2 = vadd.f32 %v10044_v60, %v5812_v23 }
 0xa1a   : > { %v8456_v39 = vpop.eup %8455  ;;  %8481 = vrcp.f32 %v6094_v13  ;;  %v6092_v59 = vadd.f32 1.0, %v8454_v45  ;;  %v7587_v57 = vpop.f32.mrf.mxu0 }
 0xa1b   : > { %v8458_v50 = vpop.eup %8457  ;;  %6212 = vst.msk [vmem:[%s10067_s6 + $0x120] sm:$0xff] %vm792_vm1, %v8456_v39  ;;  %8483 = vpow2.f32 %v6028_v14  ;;  %v6030_v18 = vmul.f32 1.442695, %v5911_v43  ;;  %v5909_v25 = vsub.f32 0.0, %v5813_v2  ;;  %v5834_v10 = vadd.f32 %v7587_v57, %v10044_v60 }
 0xa1c   : > { %v8460_v48 = vpop.eup %8459  ;;  %8485 = vrcp.f32 %v6092_v59  ;;  %v6095_v51 = vadd.f32 1.0, %v8458_v50  ;;  %v5825_v38 = vpop.f32.mrf.mxu0 }
 0xa1d   : > { %v8462_v54 = vpop.eup %8461  ;;  %6215 = vst.msk [vmem:[%s10067_s6 + $0x138] sm:$0xff] %vm792_vm1, %v8460_v48  ;;  %8487 = vpow2.f32 %v6024_v22  ;;  %v6026_v55 = vmul.f32 1.442695, %v5909_v25  ;;  %v5914_v47 = vsub.f32 0.0, %v5834_v10  ;;  %v5826_v61 = vadd.f32 %v10044_v60, %v5825_v38 }
 0xa1e   : > { %v8464_v62 = vpop.eup %8463  ;;  %8489 = vrcp.f32 %v6095_v51  ;;  %v6093_v0 = vadd.f32 1.0, %v8462_v54  ;;  %v7588_v41 = vpop.f32.mrf.mxu0 }
 0xa1f   : > { %v8466_v19 = vpop.eup %8465  ;;  %6213 = vst.msk [vmem:[%s10067_s6 + $0x128] sm:$0xff] %vm792_vm1, %v8464_v62  ;;  %8491 = vpow2.f32 %v6030_v18  ;;  %v6036_v16 = vmul.f32 1.442695, %v5914_v47  ;;  %v5912_v11 = vsub.f32 0.0, %v5826_v61  ;;  %v5837_v37 = vadd.f32 %v8545_v33, %v7588_v41 }
 0xa20   : > { %v8468_v12 = vpop.eup %8467  ;;  %6218 = vst.msk [vmem:[%s10067_s6 + $0x150] sm:$0xff] %vm792_vm1, %v8466_v19  ;;  %8493 = vrcp.f32 %v6093_v0  ;;  %v5828_v60 = vpop.f32.mrf.mxu0 }
 0xa21   : > { %v8470_v31 = vpop.eup %8469  ;;  %v6098_v63 = vadd.f32 1.0, %v8468_v12  ;;  %8495 = vpow2.f32 %v6026_v55  ;;  %v6032_v52 = vmul.f32 1.442695, %v5912_v11  ;;  %v5915_v34 = vsub.f32 0.0, %v5837_v37 }
 0xa22   : > { %v8472_v8 = vpop.eup %8471  ;;  %6216 = vst.msk [vmem:[%s10067_s6 + $0x140] sm:$0xff] %vm792_vm1, %v8470_v31  ;;  %8497 = vpow2.f32 %v6036_v16  ;;  %v5829_v20 = vadd.f32 %v8545_v33, %v5828_v60  ;;  %v7591_v46 = vpop.f32.mrf.mxu0 }
 0xa23   : > { %v8474_v35 = vpop.eup %8473  ;;  %8499 = vrcp.f32 %v6098_v63  ;;  %v6096_v28 = vadd.f32 1.0, %v8472_v8  ;;  %v6038_v49 = vmul.f32 1.442695, %v5915_v34  ;;  %v5850_v21 = vadd.f32 %v8545_v33, %v7591_v46 }
 0xa24   : > { %v8476_v1 = vpop.eup %8475  ;;  %6219 = vst.msk [vmem:[%s10067_s6 + $0x158] sm:$0xff] %vm792_vm1, %v8474_v35  ;;  %8501 = vpow2.f32 %v6032_v52  ;;  %v5913_v15 = vsub.f32 0.0, %v5829_v20  ;;  %v5841_v30 = vpop.f32.mrf.mxu0 }
 0xa25   : > { %v8478_v17 = vpop.eup %8477  ;;  %8503 = vrcp.f32 %v6096_v28  ;;  %v6099_v26 = vadd.f32 1.0, %v8476_v1  ;;  %v5918_v29 = vsub.f32 0.0, %v5850_v21  ;;  %v5842_v3 = vadd.f32 %v8545_v33, %v5841_v30 }
 0xa26   : > { %v8480_v36 = vpop.eup %8479  ;;  %6217 = vst.msk [vmem:[%s10067_s6 + $0x148] sm:$0xff] %vm792_vm1, %v8478_v17  ;;  %8505 = vpow2.f32 %v6038_v49  ;;  %v6034_v40 = vmul.f32 1.442695, %v5913_v15  ;;  %v7592_v53 = vpop.f32.mrf.mxu0 }
 0xa27   : > { %v8482_v56 = vpop.eup %8481  ;;  %8507 = vrcp.f32 %v6099_v26  ;;  %v6097_v7 = vadd.f32 1.0, %v8480_v36  ;;  %v6044_v32 = vmul.f32 1.442695, %v5918_v29  ;;  %v5916_v6 = vsub.f32 0.0, %v5842_v3 }
 0xa28   : > { %v8484_v4 = vpop.eup %8483  ;;  %6222 = vst.msk [vmem:[%s10067_s6 + $0x170] sm:$0xff] %vm792_vm1, %v8482_v56  ;;  %8509 = vpow2.f32 %v6034_v40  ;;  %v5853_v24 = vadd.f32 %v8545_v33, %v7592_v53  ;;  %v5844_v27 = vpop.f32.mrf.mxu0 }
 0xa29   : > { %v8486_v42 = vpop.eup %8485  ;;  %8511 = vrcp.f32 %v6097_v7  ;;  %v6102_v44 = vadd.f32 1.0, %v8484_v4  ;;  %v6040_v14 = vmul.f32 1.442695, %v5916_v6  ;;  %v5845_v58 = vadd.f32 %v8545_v33, %v5844_v27 }
 0xa2a   : > { %v8488_v5 = vpop.eup %8487  ;;  %6220 = vst.msk [vmem:[%s10067_s6 + $0x160] sm:$0xff] %vm792_vm1, %v8486_v42  ;;  %8513 = vpow2.f32 %v6044_v32  ;;  %v5919_v9 = vsub.f32 0.0, %v5853_v24 }
 0xa2b   : > { %v8490_v13 = vpop.eup %8489  ;;  %8515 = vrcp.f32 %v6102_v44  ;;  %v6100_v23 = vadd.f32 1.0, %v8488_v5  ;;  %v5917_v45 = vsub.f32 0.0, %v5845_v58 }
 0xa2c   : > { %v8492_v22 = vpop.eup %8491  ;;  %6223 = vst.msk [vmem:[%s10067_s6 + $0x178] sm:$0xff] %vm792_vm1, %v8490_v13  ;;  %8517 = vpow2.f32 %v6040_v14  ;;  %v6046_v43 = vmul.f32 1.442695, %v5919_v9 }
 0xa2d   : > { %v8494_v2 = vpop.eup %8493  ;;  %8519 = vrcp.f32 %v6100_v23  ;;  %v6103_v39 = vadd.f32 1.0, %v8492_v22  ;;  %v6042_v59 = vmul.f32 1.442695, %v5917_v45 }
 0xa2e   : > { %v8496_v57 = vpop.eup %8495  ;;  %6221 = vst.msk [vmem:[%s10067_s6 + $0x168] sm:$0xff] %vm792_vm1, %v8494_v2  ;;  %8521 = vpow2.f32 %v6046_v43 }
 0xa2f   : > { %v8498_v50 = vpop.eup %8497  ;;  %8523 = vrcp.f32 %v6103_v39  ;;  %v6101_v18 = vadd.f32 1.0, %v8496_v57 }
 0xa30   : > { %v8500_v25 = vpop.eup %8499  ;;  %v6106_v10 = vadd.f32 1.0, %v8498_v50  ;;  %8525 = vpow2.f32 %v6042_v59 }
 0xa31   : > { %v8502_v48 = vpop.eup %8501  ;;  %6226 = vst.msk [vmem:[%s10067_s6 + $0x190] sm:$0xff] %vm792_vm1, %v8500_v25  ;;  %8527 = vrcp.f32 %v6101_v18 }
 0xa32   : > { %v8504_v51 = vpop.eup %8503  ;;  %8529 = vrcp.f32 %v6106_v10  ;;  %v6104_v38 = vadd.f32 1.0, %v8502_v48 }
 0xa33   : > { %v8506_v54 = vpop.eup %8505  ;;  %6224 = vst.msk [vmem:[%s10067_s6 + $0x180] sm:$0xff] %vm792_vm1, %v8504_v51 }
 0xa34   : > { %v8508_v55 = vpop.eup %8507  ;;  %8531 = vrcp.f32 %v6104_v38  ;;  %v6107_v47 = vadd.f32 1.0, %v8506_v54 }
 0xa35   : > { %v8510_v61 = vpop.eup %8509  ;;  %6227 = vst.msk [vmem:[%s10067_s6 + $0x198] sm:$0xff] %vm792_vm1, %v8508_v55 }
 0xa36   : > { %v8512_v62 = vpop.eup %8511  ;;  %8533 = vrcp.f32 %v6107_v47  ;;  %v6105_v0 = vadd.f32 1.0, %v8510_v61 }
 0xa37   : > { %v8514_v41 = vpop.eup %8513  ;;  %6225 = vst.msk [vmem:[%s10067_s6 + $0x188] sm:$0xff] %vm792_vm1, %v8512_v62 }
 0xa38   : > { %v8516_v19 = vpop.eup %8515  ;;  %8535 = vrcp.f32 %v6105_v0  ;;  %v6110_v16 = vadd.f32 1.0, %v8514_v41 }
 0xa39   : > { %v8518_v11 = vpop.eup %8517  ;;  %6230 = vst.msk [vmem:[%s10067_s6 + $0x1b0] sm:$0xff] %vm792_vm1, %v8516_v19 }
 0xa3a   : > { %v8520_v33 = vpop.eup %8519  ;;  %8537 = vrcp.f32 %v6110_v16  ;;  %v6108_v37 = vadd.f32 1.0, %v8518_v11 }
 0xa3b   : > { %v8522_v12 = vpop.eup %8521  ;;  %6228 = vst.msk [vmem:[%s10067_s6 + $0x1a0] sm:$0xff] %vm792_vm1, %v8520_v33 }
 0xa3c   : > { %v8524_v60 = vpop.eup %8523  ;;  %8539 = vrcp.f32 %v6108_v37  ;;  %v6111_v31 = vadd.f32 1.0, %v8522_v12 }
 0xa3d   : > { %v8526_v63 = vpop.eup %8525  ;;  %6231 = vst.msk [vmem:[%s10067_s6 + $0x1b8] sm:$0xff] %vm792_vm1, %v8524_v60 }
 0xa3e   : > { %v8528_v52 = vpop.eup %8527  ;;  %8541 = vrcp.f32 %v6111_v31  ;;  %v6109_v34 = vadd.f32 1.0, %v8526_v63 }
 0xa3f   : > { %v8530_v8 = vpop.eup %8529  ;;  %6229 = vst.msk [vmem:[%s10067_s6 + $0x1a8] sm:$0xff] %vm792_vm1, %v8528_v52 }
 0xa40   : > { %6234 = vst.msk [vmem:[%s10067_s6 + $0x1d0] sm:$0xff] %vm792_vm1, %v8530_v8  ;;  %8543 = vrcp.f32 %v6109_v34 }
 0xa41   : > { %v8532_v20 = vpop.eup %8531 }
 0xa42   : > { %6232 = vst.msk [vmem:[%s10067_s6 + $0x1c0] sm:$0xff] %vm792_vm1, %v8532_v20 }
 0xa43   : > { %v8534_v46 = vpop.eup %8533 }
 0xa44   : > { %6235 = vst.msk [vmem:[%s10067_s6 + $0x1d8] sm:$0xff] %vm792_vm1, %v8534_v46 }
 0xa45   : > { %v8536_v35 = vpop.eup %8535 }
 0xa46   : > { %6233 = vst.msk [vmem:[%s10067_s6 + $0x1c8] sm:$0xff] %vm792_vm1, %v8536_v35 }
 0xa47   : > { %v8538_v28 = vpop.eup %8537 }
 0xa48   : > { %6238 = vst.msk [vmem:[%s10067_s6 + $0x1f0] sm:$0xff] %vm792_vm1, %v8538_v28 }
 0xa49   : > { %v8540_v49 = vpop.eup %8539 }
 0xa4a   : > { %6236 = vst.msk [vmem:[%s10067_s6 + $0x1e0] sm:$0xff] %vm792_vm1, %v8540_v49 }
 0xa4b   : > { %v8542_v21 = vpop.eup %8541 }
 0xa4c   : > { %6239 = vst.msk [vmem:[%s10067_s6 + $0x1f8] sm:$0xff] %vm792_vm1, %v8542_v21 }
 0xa4d   : > { %v8544_v1 = vpop.eup %8543 }
 0xa4e   : > { %6237 = vst.msk [vmem:[%s10067_s6 + $0x1e8] sm:$0xff] %vm792_vm1, %v8544_v1 }
 0xa4f PF: > { %s32_s3 = sadd.s32 1, %s8552_s3  }
 0xa50   : > { %p29_p4 = scmp.ge.s32.totalorder %s32_s3, 4  }
 0xa52   :  { %31 = sbr.rel (!%p29_p4) target bundleno = 8 (0x8), region = 138 }

</bundles_post_ra>
